<compile_context>
chip_gen: v7x
topology: tpu7x:2x2x1
jax: 0.10.0
libtpu: 0.0.40
codegen_flags: <defaults>
</compile_context>

<pallas_src>
import jax
import jax.numpy as jnp
from jax import lax
from jax.experimental import pallas as pl
from jax.experimental.pallas import tpu as pltpu

K_MAX = 64          # max_num_neighbors in radius()
C_IN = 4            # input point-feature channels
C_RAW = C_IN + 3    # PointNetConv local-MLP input: [x_j || pos_j - pos_i] = 7
CP = 8              # padded channel dim; channel CP-1 carries the valid mask (and b1)
H1, H2 = 16, 32     # nn = Seq(Linear(7,16), ReLU, Linear(16,32), ReLU)
G = 16              # neighbors packed per MXU pass (contraction G*CP=128, G*H1=256)
TILE_M_MAX = 256    # centers per grid step (128 or 256 lanes)

assert K_MAX % G == 0 and CP == C_RAW + 1


def _round_up(a, b):
    return (a + b - 1) // b * b


def _choose_tile_m(m):
    """Lane-dense 128/256 tiles; prefer >=4 grid steps (2 per v7x TensorCore)."""
    if m >= 4 * TILE_M_MAX:
        return TILE_M_MAX
    return 128


# ---------------------------------------------------------------------------
# Pallas kernel: per-edge MLP (2x Linear+ReLU) + masked max over neighbors,
# i.e. PointNetConv(local_nn, aggr='max', add_self_loops=False).
# ---------------------------------------------------------------------------
def _sa_conv_kernel(feat_ref, mask_ref, w1_ref, w2_ref, b2_ref, out_ref):
    # feat_ref: (K//G, G*CP, TM) bf16  packed edge features, centers on the lane axis
    # mask_ref: (K//G, G,    TM) bf16  per-neighbor validity (1.0 / 0.0)
    # w1_ref:   (G*H1, G*CP)     bf16  block-diagonal; b1 folded into mask-channel cols
    # w2_ref:   (G*H2, G*H1)     bf16  block-diagonal
    # b2_ref:   (H2, 128)        f32
    # out_ref:  (H2, TM)         f32
    n_chunks, g, tm = mask_ref.shape
    h2 = out_ref.shape[0]

    w1 = w1_ref[...]
    w2 = w2_ref[...]
    b2b = jnp.broadcast_to(b2_ref[:, 0:1], (h2, tm))      # hoisted out of the loop

    def chunk(c, acc):
        f = feat_ref[c]                                    # (G*CP, TM) bf16
        h = jnp.dot(w1, f, preferred_element_type=jnp.float32)       # (G*H1, TM) f32
        h = jnp.maximum(h, 0.0).astype(jnp.bfloat16)
        z = jnp.dot(w2, h, preferred_element_type=jnp.float32)       # (G*H2, TM) f32
        mg = mask_ref[c].astype(jnp.float32)               # (G, TM)
        # (pre + b2) * mask; invalid/padded slots -> exactly 0.  No explicit ReLU:
        # acc starts at 0 and max_k relu(z_k) == max(0, max_k z_k).
        z = (z.reshape(g, h2, tm) + b2b[None]) * mg[:, None, :]
        return jnp.maximum(acc, jnp.max(z, axis=0))        # running max, 8 vregs

    out_ref[...] = lax.fori_loop(0, n_chunks, chunk,
                                 jnp.zeros((h2, tm), jnp.float32), unroll=True)


def pointnet_conv_pallas(featT, maskT, w1bd, w2bd, b2t, tile_m):
    kg, gcp, mp = featT.shape
    _, g, _ = maskT.shape
    gh1 = w1bd.shape[0]
    gh2 = w2bd.shape[0]
    h2 = b2t.shape[0]
    grid = (mp // tile_m,)
    return pl.pallas_call(
        _sa_conv_kernel,
        out_shape=jax.ShapeDtypeStruct((h2, mp), jnp.float32),
        grid_spec=pltpu.PrefetchScalarGridSpec(
            num_scalar_prefetch=0,
            grid=grid,
            in_specs=[
                pl.BlockSpec((kg, gcp, tile_m), lambda i: (0, 0, i)),
                pl.BlockSpec((kg, g, tile_m), lambda i: (0, 0, i)),
                pl.BlockSpec((gh1, gcp), lambda i: (0, 0)),    # resident weights
                pl.BlockSpec((gh2, gh1), lambda i: (0, 0)),
                pl.BlockSpec((h2, 128), lambda i: (0, 0)),
            ],
            out_specs=pl.BlockSpec((h2, tile_m), lambda i: (0, i)),
        ),
        compiler_params=pltpu.CompilerParams(
            dimension_semantics=("parallel",),
            vmem_limit_bytes=32 * 1024 * 1024,
        ),
    )(featT, maskT, w1bd, w2bd, b2t)


# ---------------------------------------------------------------------------
# Glue (plain JAX): FPS and the radius ball query are data-dependent graph
# construction, not the tensor hot path.
# ---------------------------------------------------------------------------
def fps_per_batch(pos_b, n_sample):
    # TODO(synk): torch_cluster.fps uses a random start point; we start at index 0.
    n = pos_b.shape[0]

    def body(i, state):
        min_d, idxs = state
        last = pos_b[idxs[i - 1]]
        d = jnp.sum((pos_b - last) ** 2, axis=-1)
        min_d = jnp.minimum(min_d, d)
        nxt = jnp.argmax(min_d).astype(jnp.int32)
        return min_d, idxs.at[i].set(nxt)

    min_d = jnp.full((n,), jnp.inf, jnp.float32)
    idxs = jnp.zeros((n_sample,), jnp.int32)
    _, idxs = lax.fori_loop(1, n_sample, body, (min_d, idxs))
    return idxs


def radius_neighbors(pos, batch, pos_q, batch_q, r, k_max):
    """First k_max in-radius same-batch neighbors per query (sort-free selection)."""
    # TODO(synk): torch_cluster.radius may pick a different subset when a query has
    # more than k_max points in radius; we keep the first k_max in index order.
    m, n = pos_q.shape[0], pos.shape[0]
    d2 = jnp.sum((pos_q[:, None, :] - pos[None, :, :]) ** 2, axis=-1)     # (M, N)
    valid = (d2 <= r * r) & (batch_q[:, None] == batch[None, :])
    cnt = jnp.cumsum(valid.astype(jnp.int32), axis=1)                      # running count
    keep = valid & (cnt <= k_max)
    slot = jnp.where(keep, cnt - 1, k_max)                                  # col k_max = dropped
    rows = jnp.broadcast_to(jnp.arange(m, dtype=jnp.int32)[:, None], (m, n))
    cols = jnp.broadcast_to(jnp.arange(n, dtype=jnp.int32)[None, :], (m, n))
    nbr_idx = jnp.zeros((m, k_max + 1), jnp.int32).at[rows, slot].set(cols)[:, :k_max]
    n_valid = jnp.minimum(jnp.sum(valid.astype(jnp.int32), axis=1), k_max)
    nbr_mask = jnp.arange(k_max, dtype=jnp.int32)[None, :] < n_valid[:, None]
    return nbr_idx, nbr_mask


def sa_module_forward(x, pos, batch, params, *, ratio, r, n_per_batch, n_batches):
    w1, b1, w2, b2 = params          # w1 (C_RAW,H1), b1 (H1,), w2 (H1,H2), b2 (H2,)

    # fps(pos, batch, ratio)
    n_sample = int(ratio * n_per_batch)
    pos_batched = pos.reshape(n_batches, n_per_batch, 3)
    idx_local = jax.vmap(lambda p: fps_per_batch(p, n_sample))(pos_batched)
    idx = (idx_local +
           (jnp.arange(n_batches, dtype=jnp.int32) * n_per_batch)[:, None]).reshape(-1)
    pos_q, batch_q = pos[idx], batch[idx]

    # radius(pos, pos[idx], r, batch, batch[idx], max_num_neighbors=64)
    nbr_idx, nbr_mask = radius_neighbors(pos, batch, pos_q, batch_q, r, K_MAX)

    # per-edge features [x_j || pos_j - pos_i || mask]  -> (M, K, CP)
    # TODO(synk): fuse this gather/relayout into the Pallas kernel (scalar-prefetch
    # nbr_idx + in-VMEM gather) so feat never round-trips through HBM and rel can
    # stay f32 instead of bf16.
    maskf = nbr_mask.astype(jnp.float32)
    x_j = x[nbr_idx]                                      # (M, K, C_IN)
    rel = pos[nbr_idx] - pos_q[:, None, :]                # (M, K, 3)
    feat = jnp.concatenate([x_j, rel, maskf[..., None]], axis=-1)   # (M, K, CP)

    m = feat.shape[0]
    tile_m = _choose_tile_m(m)
    mp = _round_up(m, tile_m)

    # pack: centers on the 128-lane axis, G neighbors stacked along the contraction dim
    featT = jnp.transpose(feat, (1, 2, 0))                           # (K, CP, M)
    featT = jnp.pad(featT, ((0, 0), (0, 0), (0, mp - m)))
    featT = featT.reshape(K_MAX // G, G * CP, mp).astype(jnp.bfloat16)
    maskT = jnp.pad(maskf.T, ((0, 0), (0, mp - m)))
    maskT = maskT.reshape(K_MAX // G, G, mp).astype(jnp.bfloat16)

    # block-diagonal weights (one resident copy); b1 folded into the mask-channel column
    w1e = jnp.concatenate([w1, b1[None, :]], axis=0)                 # (CP, H1)
    eye = jnp.eye(G, dtype=jnp.float32)
    w1bd = jnp.kron(eye, w1e.T).astype(jnp.bfloat16)                 # (G*H1, G*CP)
    w2bd = jnp.kron(eye, w2.T).astype(jnp.bfloat16)                  # (G*H2, G*H1)
    b2t = jnp.broadcast_to(b2.astype(jnp.float32)[:, None], (H2, 128))

    outT = pointnet_conv_pallas(featT, maskT, w1bd, w2bd, b2t, tile_m)   # (H2, M_pad)
    out = outT.T[:m]                                                     # (M, H2)
    return out, pos_q, batch_q, (feat, nbr_mask)


if __name__ == "__main__":
    key = jax.random.PRNGKey(0)
    N_PER_B, B = 256, 2
    N = N_PER_B * B
    RATIO, R = 0.5, 0.3

    k_pos, k_x, k_w1, k_b1, k_w2, k_b2 = jax.random.split(key, 6)
    pos = jax.random.uniform(k_pos, (N, 3), jnp.float32)
    x = jax.random.normal(k_x, (N, C_IN), jnp.float32)
    batch = jnp.repeat(jnp.arange(B, dtype=jnp.int32), N_PER_B)

    # nn = Seq(Linear(7,16), ReLU, Linear(16,32), ReLU)
    w1 = jax.random.normal(k_w1, (C_RAW, H1), jnp.float32) * 0.2
    b1 = jax.random.normal(k_b1, (H1,), jnp.float32) * 0.1
    w2 = jax.random.normal(k_w2, (H1, H2), jnp.float32) * 0.2
    b2 = jax.random.normal(k_b2, (H2,), jnp.float32) * 0.1
    params = (w1, b1, w2, b2)

    out, new_pos, new_batch, (feat, nbr_mask) = sa_module_forward(
        x, pos, batch, params, ratio=RATIO, r=R,
        n_per_batch=N_PER_B, n_batches=B)
    out = jax.block_until_ready(out)
    m = out.shape[0]

    # plain-JAX reference for the Pallas hot path (same bf16-rounded inputs).
    # NOTE(synk): feat / weights are bf16 on the HBM/MXU path; the f32 PyTorch
    # module output differs by the usual bf16 quantization.
    w1e = jnp.concatenate([w1, b1[None, :]], axis=0)
    fq = feat.astype(jnp.bfloat16).astype(jnp.float32)                # (M, K, CP)
    w1q = w1e.astype(jnp.bfloat16).astype(jnp.float32)                # (CP, H1)
    w2q = w2.astype(jnp.bfloat16).astype(jnp.float32)                 # (H1, H2)
    h = jnp.maximum(jnp.einsum("mkc,ch->mkh", fq, w1q), 0.0)
    h = h.astype(jnp.bfloat16).astype(jnp.float32)
    h = jnp.maximum(jnp.einsum("mkh,hg->mkg", h, w2q) + b2, 0.0)      # (M, K, H2)
    neg = jnp.where(nbr_mask[..., None], h, -jnp.inf)
    ref = jnp.where(jnp.any(nbr_mask, axis=1)[:, None],
                    jnp.max(neg, axis=1), 0.0)                         # (M, H2)

    assert out.shape == (m, H2)
    assert new_pos.shape == (m, 3) and new_batch.shape == (m,)
    assert jnp.allclose(out, ref, atol=5e-3, rtol=1e-3), \
        float(jnp.max(jnp.abs(out - ref)))

    print("KERNEL_OK")
</pallas_src>

<mosaic_0001>
module attributes {stable_mosaic.version = 11 : i64} {
  func.func @_sa_conv_kernel(%arg0: i32, %arg1: memref<4x128x128xbf16, #tpu.memory_space<vmem>>, %arg2: memref<4x16x128xbf16, #tpu.memory_space<vmem>>, %arg3: memref<256x128xbf16, #tpu.memory_space<vmem>>, %arg4: memref<512x256xbf16, #tpu.memory_space<vmem>>, %arg5: memref<32x128xf32, #tpu.memory_space<vmem>>, %arg6: memref<32x128xf32, #tpu.memory_space<vmem>>) attributes {dimension_semantics = [#tpu.dimension_semantics<parallel>], iteration_bounds = array<i64: 2>, scalar_prefetch = 0 : i64, scratch_operands = 0 : i64, tpu.core_type = #tpu.core_type<tc>, window_params = [{transform_indices = @transform_0, window_bounds = array<i64: 4, 128, 128>}, {transform_indices = @transform_1, window_bounds = array<i64: 4, 16, 128>}, {pipeline_mode = #tpu.pipeline_mode<synchronous>, transform_indices = @transform_2, window_bounds = array<i64: 256, 128>}, {pipeline_mode = #tpu.pipeline_mode<synchronous>, transform_indices = @transform_3, window_bounds = array<i64: 512, 256>}, {pipeline_mode = #tpu.pipeline_mode<synchronous>, transform_indices = @transform_4, window_bounds = array<i64: 32, 128>}, {transform_indices = @transform_5, window_bounds = array<i64: 32, 128>}]} {
    %c0 = arith.constant 0 : index
    %c0_0 = arith.constant 0 : index
    %0 = vector.load %arg3[%c0, %c0_0] : memref<256x128xbf16, #tpu.memory_space<vmem>>, vector<256x128xbf16>
    %c0_1 = arith.constant 0 : index
    %c0_2 = arith.constant 0 : index
    %1 = vector.load %arg4[%c0_1, %c0_2] : memref<512x256xbf16, #tpu.memory_space<vmem>>, vector<512x256xbf16>
    %c0_3 = arith.constant 0 : index
    %c0_4 = arith.constant 0 : index
    %2 = vector.load %arg5[%c0_3, %c0_4] : memref<32x128xf32, #tpu.memory_space<vmem>>, vector<32x1xf32>
    %3 = vector.shape_cast %2 : vector<32x1xf32> to vector<32x1xf32>
    %4 = vector.broadcast %3 : vector<32x1xf32> to vector<32x128xf32>
    %cst = arith.constant 0.000000e+00 : f32
    %5 = vector.broadcast %cst : f32 to vector<32x128xf32>
    %c0_i32 = arith.constant 0 : i32
    %6 = arith.index_cast %c0_i32 : i32 to index
    %c0_5 = arith.constant 0 : index
    %c0_6 = arith.constant 0 : index
    %7 = vector.load %arg1[%6, %c0_5, %c0_6] : memref<4x128x128xbf16, #tpu.memory_space<vmem>>, vector<1x128x128xbf16>
    %8 = vector.shape_cast %7 : vector<1x128x128xbf16> to vector<128x128xbf16>
    %cst_7 = arith.constant dense<0.000000e+00> : vector<256x128xf32>
    %9 = tpu.matmul %0, %8, %cst_7 {dimension_numbers = #tpu.dot_dimension_numbers<[1], [0], [0], [1], [0, 0, 1, 1], [], []>} : vector<256x128xbf16>, vector<128x128xbf16>, vector<256x128xf32> -> vector<256x128xf32>
    %cst_8 = arith.constant 0.000000e+00 : f32
    %10 = vector.broadcast %cst_8 : f32 to vector<256x128xf32>
    %11 = arith.maximumf %9, %10 : vector<256x128xf32>
    %12 = arith.truncf %11 : vector<256x128xf32> to vector<256x128xbf16>
    %cst_9 = arith.constant dense<0.000000e+00> : vector<512x128xf32>
    %13 = tpu.matmul %1, %12, %cst_9 {dimension_numbers = #tpu.dot_dimension_numbers<[1], [0], [0], [1], [0, 0, 1, 1], [], []>} : vector<512x256xbf16>, vector<256x128xbf16>, vector<512x128xf32> -> vector<512x128xf32>
    %14 = arith.index_cast %c0_i32 : i32 to index
    %c0_10 = arith.constant 0 : index
    %c0_11 = arith.constant 0 : index
    %15 = vector.load %arg2[%14, %c0_10, %c0_11] : memref<4x16x128xbf16, #tpu.memory_space<vmem>>, vector<1x16x128xbf16>
    %16 = vector.shape_cast %15 : vector<1x16x128xbf16> to vector<16x128xbf16>
    %17 = arith.extf %16 : vector<16x128xbf16> to vector<16x128xf32>
    %18 = vector.shape_cast %13 : vector<512x128xf32> to vector<16x32x128xf32>
    %19 = vector.shape_cast %4 : vector<32x128xf32> to vector<1x32x128xf32>
    %20 = vector.broadcast %19 : vector<1x32x128xf32> to vector<16x32x128xf32>
    %21 = arith.addf %18, %20 : vector<16x32x128xf32>
    %22 = vector.shape_cast %17 : vector<16x128xf32> to vector<16x1x128xf32>
    %23 = vector.broadcast %22 : vector<16x1x128xf32> to vector<16x32x128xf32>
    %24 = arith.mulf %21, %23 : vector<16x32x128xf32>
    %cst_12 = arith.constant dense<0xFF800000> : vector<32x128xf32>
    %25 = vector.multi_reduction <maximumf>, %24, %cst_12 [0] : vector<16x32x128xf32> to vector<32x128xf32>
    %26 = arith.maximumf %5, %25 : vector<32x128xf32>
    %c1_i32 = arith.constant 1 : i32
    %27 = arith.index_cast %c1_i32 : i32 to index
    %c0_13 = arith.constant 0 : index
    %c0_14 = arith.constant 0 : index
    %28 = vector.load %arg1[%27, %c0_13, %c0_14] : memref<4x128x128xbf16, #tpu.memory_space<vmem>>, vector<1x128x128xbf16>
    %29 = vector.shape_cast %28 : vector<1x128x128xbf16> to vector<128x128xbf16>
    %cst_15 = arith.constant dense<0.000000e+00> : vector<256x128xf32>
    %30 = tpu.matmul %0, %29, %cst_15 {dimension_numbers = #tpu.dot_dimension_numbers<[1], [0], [0], [1], [0, 0, 1, 1], [], []>} : vector<256x128xbf16>, vector<128x128xbf16>, vector<256x128xf32> -> vector<256x128xf32>
    %cst_16 = arith.constant 0.000000e+00 : f32
    %31 = vector.broadcast %cst_16 : f32 to vector<256x128xf32>
    %32 = arith.maximumf %30, %31 : vector<256x128xf32>
    %33 = arith.truncf %32 : vector<256x128xf32> to vector<256x128xbf16>
    %cst_17 = arith.constant dense<0.000000e+00> : vector<512x128xf32>
    %34 = tpu.matmul %1, %33, %cst_17 {dimension_numbers = #tpu.dot_dimension_numbers<[1], [0], [0], [1], [0, 0, 1, 1], [], []>} : vector<512x256xbf16>, vector<256x128xbf16>, vector<512x128xf32> -> vector<512x128xf32>
    %35 = arith.index_cast %c1_i32 : i32 to index
    %c0_18 = arith.constant 0 : index
    %c0_19 = arith.constant 0 : index
    %36 = vector.load %arg2[%35, %c0_18, %c0_19] : memref<4x16x128xbf16, #tpu.memory_space<vmem>>, vector<1x16x128xbf16>
    %37 = vector.shape_cast %36 : vector<1x16x128xbf16> to vector<16x128xbf16>
    %38 = arith.extf %37 : vector<16x128xbf16> to vector<16x128xf32>
    %39 = vector.shape_cast %34 : vector<512x128xf32> to vector<16x32x128xf32>
    %40 = vector.shape_cast %4 : vector<32x128xf32> to vector<1x32x128xf32>
    %41 = vector.broadcast %40 : vector<1x32x128xf32> to vector<16x32x128xf32>
    %42 = arith.addf %39, %41 : vector<16x32x128xf32>
    %43 = vector.shape_cast %38 : vector<16x128xf32> to vector<16x1x128xf32>
    %44 = vector.broadcast %43 : vector<16x1x128xf32> to vector<16x32x128xf32>
    %45 = arith.mulf %42, %44 : vector<16x32x128xf32>
    %cst_20 = arith.constant dense<0xFF800000> : vector<32x128xf32>
    %46 = vector.multi_reduction <maximumf>, %45, %cst_20 [0] : vector<16x32x128xf32> to vector<32x128xf32>
    %47 = arith.maximumf %26, %46 : vector<32x128xf32>
    %c2_i32 = arith.constant 2 : i32
    %48 = arith.index_cast %c2_i32 : i32 to index
    %c0_21 = arith.constant 0 : index
    %c0_22 = arith.constant 0 : index
    %49 = vector.load %arg1[%48, %c0_21, %c0_22] : memref<4x128x128xbf16, #tpu.memory_space<vmem>>, vector<1x128x128xbf16>
    %50 = vector.shape_cast %49 : vector<1x128x128xbf16> to vector<128x128xbf16>
    %cst_23 = arith.constant dense<0.000000e+00> : vector<256x128xf32>
    %51 = tpu.matmul %0, %50, %cst_23 {dimension_numbers = #tpu.dot_dimension_numbers<[1], [0], [0], [1], [0, 0, 1, 1], [], []>} : vector<256x128xbf16>, vector<128x128xbf16>, vector<256x128xf32> -> vector<256x128xf32>
    %cst_24 = arith.constant 0.000000e+00 : f32
    %52 = vector.broadcast %cst_24 : f32 to vector<256x128xf32>
    %53 = arith.maximumf %51, %52 : vector<256x128xf32>
    %54 = arith.truncf %53 : vector<256x128xf32> to vector<256x128xbf16>
    %cst_25 = arith.constant dense<0.000000e+00> : vector<512x128xf32>
    %55 = tpu.matmul %1, %54, %cst_25 {dimension_numbers = #tpu.dot_dimension_numbers<[1], [0], [0], [1], [0, 0, 1, 1], [], []>} : vector<512x256xbf16>, vector<256x128xbf16>, vector<512x128xf32> -> vector<512x128xf32>
    %56 = arith.index_cast %c2_i32 : i32 to index
    %c0_26 = arith.constant 0 : index
    %c0_27 = arith.constant 0 : index
    %57 = vector.load %arg2[%56, %c0_26, %c0_27] : memref<4x16x128xbf16, #tpu.memory_space<vmem>>, vector<1x16x128xbf16>
    %58 = vector.shape_cast %57 : vector<1x16x128xbf16> to vector<16x128xbf16>
    %59 = arith.extf %58 : vector<16x128xbf16> to vector<16x128xf32>
    %60 = vector.shape_cast %55 : vector<512x128xf32> to vector<16x32x128xf32>
    %61 = vector.shape_cast %4 : vector<32x128xf32> to vector<1x32x128xf32>
    %62 = vector.broadcast %61 : vector<1x32x128xf32> to vector<16x32x128xf32>
    %63 = arith.addf %60, %62 : vector<16x32x128xf32>
    %64 = vector.shape_cast %59 : vector<16x128xf32> to vector<16x1x128xf32>
    %65 = vector.broadcast %64 : vector<16x1x128xf32> to vector<16x32x128xf32>
    %66 = arith.mulf %63, %65 : vector<16x32x128xf32>
    %cst_28 = arith.constant dense<0xFF800000> : vector<32x128xf32>
    %67 = vector.multi_reduction <maximumf>, %66, %cst_28 [0] : vector<16x32x128xf32> to vector<32x128xf32>
    %68 = arith.maximumf %47, %67 : vector<32x128xf32>
    %c3_i32 = arith.constant 3 : i32
    %69 = arith.index_cast %c3_i32 : i32 to index
    %c0_29 = arith.constant 0 : index
    %c0_30 = arith.constant 0 : index
    %70 = vector.load %arg1[%69, %c0_29, %c0_30] : memref<4x128x128xbf16, #tpu.memory_space<vmem>>, vector<1x128x128xbf16>
    %71 = vector.shape_cast %70 : vector<1x128x128xbf16> to vector<128x128xbf16>
    %cst_31 = arith.constant dense<0.000000e+00> : vector<256x128xf32>
    %72 = tpu.matmul %0, %71, %cst_31 {dimension_numbers = #tpu.dot_dimension_numbers<[1], [0], [0], [1], [0, 0, 1, 1], [], []>} : vector<256x128xbf16>, vector<128x128xbf16>, vector<256x128xf32> -> vector<256x128xf32>
    %cst_32 = arith.constant 0.000000e+00 : f32
    %73 = vector.broadcast %cst_32 : f32 to vector<256x128xf32>
    %74 = arith.maximumf %72, %73 : vector<256x128xf32>
    %75 = arith.truncf %74 : vector<256x128xf32> to vector<256x128xbf16>
    %cst_33 = arith.constant dense<0.000000e+00> : vector<512x128xf32>
    %76 = tpu.matmul %1, %75, %cst_33 {dimension_numbers = #tpu.dot_dimension_numbers<[1], [0], [0], [1], [0, 0, 1, 1], [], []>} : vector<512x256xbf16>, vector<256x128xbf16>, vector<512x128xf32> -> vector<512x128xf32>
    %77 = arith.index_cast %c3_i32 : i32 to index
    %c0_34 = arith.constant 0 : index
    %c0_35 = arith.constant 0 : index
    %78 = vector.load %arg2[%77, %c0_34, %c0_35] : memref<4x16x128xbf16, #tpu.memory_space<vmem>>, vector<1x16x128xbf16>
    %79 = vector.shape_cast %78 : vector<1x16x128xbf16> to vector<16x128xbf16>
    %80 = arith.extf %79 : vector<16x128xbf16> to vector<16x128xf32>
    %81 = vector.shape_cast %76 : vector<512x128xf32> to vector<16x32x128xf32>
    %82 = vector.shape_cast %4 : vector<32x128xf32> to vector<1x32x128xf32>
    %83 = vector.broadcast %82 : vector<1x32x128xf32> to vector<16x32x128xf32>
    %84 = arith.addf %81, %83 : vector<16x32x128xf32>
    %85 = vector.shape_cast %80 : vector<16x128xf32> to vector<16x1x128xf32>
    %86 = vector.broadcast %85 : vector<16x1x128xf32> to vector<16x32x128xf32>
    %87 = arith.mulf %84, %86 : vector<16x32x128xf32>
    %cst_36 = arith.constant dense<0xFF800000> : vector<32x128xf32>
    %88 = vector.multi_reduction <maximumf>, %87, %cst_36 [0] : vector<16x32x128xf32> to vector<32x128xf32>
    %89 = arith.maximumf %68, %88 : vector<32x128xf32>
    %c4_i32 = arith.constant 4 : i32
    %c0_37 = arith.constant 0 : index
    %c0_38 = arith.constant 0 : index
    %90 = vector.load %arg6[%c0_37, %c0_38] : memref<32x128xf32, #tpu.memory_space<vmem>>, vector<32x128xf32>
    tpu.vector_store %arg6[%c0_37, %c0_38], %89 {strides = array<i32>} : memref<32x128xf32, #tpu.memory_space<vmem>>, vector<32x128xf32>,
    return
  }
  func.func @transform_0(%arg0: i32) -> (i32, i32, i32) {
    %c0_i32 = arith.constant 0 : i32
    %c0_i32_0 = arith.constant 0 : i32
    %c0_i32_1 = arith.constant 0 : i32
    return %c0_i32, %c0_i32_0, %arg0 : i32, i32, i32
  }
  func.func @transform_1(%arg0: i32) -> (i32, i32, i32) {
    %c0_i32 = arith.constant 0 : i32
    %c0_i32_0 = arith.constant 0 : i32
    %c0_i32_1 = arith.constant 0 : i32
    return %c0_i32, %c0_i32_0, %arg0 : i32, i32, i32
  }
  func.func @transform_2(%arg0: i32) -> (i32, i32) {
    %c0_i32 = arith.constant 0 : i32
    %c0_i32_0 = arith.constant 0 : i32
    %c0_i32_1 = arith.constant 0 : i32
    return %c0_i32, %c0_i32_0 : i32, i32
  }
  func.func @transform_3(%arg0: i32) -> (i32, i32) {
    %c0_i32 = arith.constant 0 : i32
    %c0_i32_0 = arith.constant 0 : i32
    %c0_i32_1 = arith.constant 0 : i32
    return %c0_i32, %c0_i32_0 : i32, i32
  }
  func.func @transform_4(%arg0: i32) -> (i32, i32) {
    %c0_i32 = arith.constant 0 : i32
    %c0_i32_0 = arith.constant 0 : i32
    %c0_i32_1 = arith.constant 0 : i32
    return %c0_i32, %c0_i32_0 : i32, i32
  }
  func.func @transform_5(%arg0: i32) -> (i32, i32) {
    %c0_i32 = arith.constant 0 : i32
    %c0_i32_0 = arith.constant 0 : i32
    return %c0_i32, %arg0 : i32, i32
  }
}

</mosaic_0001>

<bundles_post_ra>
// kernel: tpu_custom_call.1
= control target key start
LH: loop header
LB: loop body
LE: loop exit
PB: predicated region body
PF: predicated region fallthrough
CT: control target
= control target key end

     0   :  { %s7329_s0 = inlined_call_operand.hbm [shape: bf16[4,128,256], index: 0, kind: input, shape index: {}]   ;;  %s7330_s1 = inlined_call_operand.hbm [shape: bf16[4,16,256], index: 1, kind: input, shape index: {}]   ;;  %s7331_s2 = inlined_call_operand.hbm [shape: bf16[256,128], index: 2, kind: input, shape index: {}]   ;;  %s7332_s3 = inlined_call_operand.hbm [shape: bf16[512,256], index: 3, kind: input, shape index: {}]   ;;  %s7333_s4 = inlined_call_operand.hbm [shape: f32[32,128], index: 4, kind: input, shape index: {}]   ;;  %s7334_s5 = inlined_call_operand.hbm [shape: f32[32,256], index: 5, kind: output, shape index: {}]  }
   0x1   :  { %7347 = sst [smem:[#allocation20_spill]] %s7331_s2 }
   0x2   :  { %10 = vsyncpa [#allocation3], 0 }
   0x3   :  { %12 = vsyncpa [#allocation3 + $0x1], 0 }
   0x4   :  { %13 = vsyncpa [#allocation6], 0 }
   0x5   :  { %15 = vsyncpa [#allocation6 + $0x1], 0 }
   0x6   :  { %16 = vsyncpa [#allocation9], 0 }
   0x7   :  { %17 = vsyncpa [#allocation4], 0 }
   0x8   :  { %19 = vsyncpa [#allocation4 + $0x1], 0  ;;  %s5840_s18 = smov 0   ;;  %s5842_s19 = smov 0  }
   0x9   :  { %s5844_s20 = smov 0   ;;  %s5846_s21 = smov 0  }
   0xa LB: > { %s5861_s22 = sadd.s32 4294967295, %s5793_s21   ;;  %s4760_s23 = sadd.s32 4294967294, %s5793_s21   ;;  %s5793_s21 = sphi %s5846_s21, %s7375_s21   ;;  %s5789_s20 = sphi %s5844_s20, %s7379_s20   ;;  %s5785_s19 = sphi %s5842_s19, %s7378_s19   ;;  %s5781_s18 = sphi %s5840_s18, %s7377_s18  }
   0xb   : > { %s5865_s24 = sadd.s32 1, %s5793_s21   ;;  %s32_s25 = sadd.s32 1, %s5789_s20 }
   0xc   : > { %7348 = sst [smem:[#allocation17_spill]] %s5865_s24  ;;  %s29_s26 = ssub.s32 %s5793_s21, %s5865_s24 }
   0xd   : > { %p39_p0 = scmp.ne.s32.totalorder %s5789_s20, %s5785_s19  ;;  %p30_p1 = scmp.eq.s32.totalorder %s29_s26, 0 }
   0xe   : > { %p40_p2 = scmp.eq.s32.totalorder %s5793_s21, 0  ;;  %p45_p3 = scmp.ne.s32.totalorder %s5785_s19, %s5781_s18 }
   0xf   : > { %p7335_p4 = scmp.eq.s32.totalorder %s5861_s22, 0  ;;  %p158_p7 = scmp.eq.s32.totalorder %s5861_s22, 1 }
  0x10   : > { %s5877_s27 = scalar_select %p30_p1, %s5789_s20, %s32_s25  }
  0x11   : > { %p5879_p5 = por %p40_p2, %p39_p0  ;;  %p5885_p6 = por %p7335_p4, %p45_p3 }
  0x12   : > { %7349 = sst [smem:[#allocation18_spill]] %s5877_s27  ;;  %p164_p8 = scmp.eq.s32.totalorder %s4760_s23, 1 }
  0x13   : > { %s7350_s28 = scalar_select %p5879_p5, 1, 0 }
  0x14   : > { %s7351_s29 = scalar_select %p5885_p6, 1, 0 }
  0x15   : > { %p4761_p9 = scmp.ge.s32.totalorder %s5793_s21, 1  ;;  %p171_p10 = scmp.lt.s32.totalorder %s5793_s21, 3 }
  0x16   : > { %p5892_p11 = por %p158_p7, %p39_p0  ;;  %p5896_p12 = por %p164_p8, %p45_p3 }
  0x17   : > { %p5900_p13 = pnand %p4761_p9, %p171_p10  ;;  %s5795_s8 = smov [#allocation7]  }
  0x18   : > { %s7352_s30 = scalar_select %p5892_p11, 1, 0 }
  0x19   : > { %s7353_s6 = scalar_select %p5896_p12, 1, 0 }
  0x1a   : > { %s7355_s7 = scalar_select %p5900_p13, 1, 0 }
  0x1b   : > { %7354 = sst [smem:[#allocation19_spill]] %s7353_s6  ;;  %p5272_p1 = pneg %p5900_p13 }
  0x1c   : > { %s183_s9 = sshll.u32 %s5795_s8, 4  ;;  %s5796_s11 = smov [#allocation8]   ;;  %s184_s9 = int_to_ptr.vmem [resolvable:$true] %s183_s9 }
  0x1d   : > { %p5908_p2 = pnand %p5272_p1, %p7335_p4  ;;  %s196_s12 = sshll.u32 %s5796_s11, 4  ;;  %s197_s12 = int_to_ptr.vmem [resolvable:$true] %s196_s12 }
  0x1e   : > { %s7357_s2 = sld [smem:[#allocation20_spill]] }
  0x1f   : > { %p5922_p8 = pneg %p5908_p2 }
  0x24   : > { %s5571_s15 = scalar_lea.hbm %s7357_s2, 2048 }
  0x25   : > { %p5572_p7 = scmp.ne.s32.totalorder %s7357_s2, %s5571_s15  ;;  %p5578_p1 = scmp.lt.u32.totalorder %s5571_s15, %s7357_s2 }
  0x27   : > { %p5574_p9 = pnand %p5922_p8, %p5572_p7 }
  0x29   : > { %p5575_p10 = pneg %p5574_p9 }
  0x2b   : > { %p5580_p0 = pnand %p5578_p1, %p5575_p10 }
  0x2d   : > { %5583 = shalt.err (!%p5580_p0)
}
  0x2e   : > { %s5584_s8 = scalar_lea.vmem %s184_s9, 2048  ;;  %p5592_p11 = scmp.lt.s32.totalorder %s184_s9, %s184_s9 }
  0x2f   : > { %p5585_p4 = scmp.ne.s32.totalorder %s184_s9, %s5584_s8  ;;  %p5593_p6 = scmp.lt.s32.totalorder %s5584_s8, %s5584_s8 }
  0x31   : > { %p5587_p3 = pnand %p5585_p4, %p5922_p8  ;;  %p5594_p13 = por %p5593_p6, %p5592_p11 }
  0x33   : > { %p5588_p12 = pneg %p5587_p3 }
  0x35   : > { %p5595_p5 = pnand %p5594_p13, %p5588_p12 }
  0x37   : > { %5598 = shalt.err (!%p5595_p5)
}
  0x38   : > { %s7340_s11 = smov 64   ;;  %s7342_s13 = smov 4  }
  0x39   : > { %5275 = dma.hbm_to_vmem [thread:$0]  (!%p5908_p2), %s7357_s2, 2048, %s184_s9, [#allocation6], %s7340_s11, %s7340_s11, %s7342_s13  }
  0x3a   : > { %p7359_p4 = scmp.ne.s32.totalorder %s7350_s28, 0  ;;  %p7360_p0 = scmp.lt.s32.totalorder %s5793_s21, 2 }
  0x3b   : > { %s5599_s26 = scalar_lea.hbm %s7332_s3, 8192 }
  0x3c   : > { %p5945_p3 = pnand %p7360_p0, %p7359_p4  ;;  %p5600_p5 = scmp.ne.s32.totalorder %s7332_s3, %s5599_s26 }
  0x3d   : > { %p5606_p12 = scmp.lt.u32.totalorder %s5599_s26, %s7332_s3 }
  0x3e   : > { %s7361_s16 = scalar_select %p5945_p3, 1, 0 }
  0x3f   : > { %p5602_p6 = pnand %p5600_p5, %p5922_p8 }
  0x41   : > { %p5603_p11 = pneg %p5602_p6 }
  0x43   : > { %p5608_p13 = pnand %p5606_p12, %p5603_p11 }
  0x45   : > { %5611 = shalt.err (!%p5608_p13)
}
  0x46   : > { %s5612_s28 = scalar_lea.vmem %s197_s12, 8192  ;;  %p5620_p1 = scmp.lt.s32.totalorder %s197_s12, %s197_s12 }
  0x47   : > { %p5613_p7 = scmp.ne.s32.totalorder %s197_s12, %s5612_s28  ;;  %p5621_p4 = scmp.lt.s32.totalorder %s5612_s28, %s5612_s28 }
  0x49   : > { %p5615_p9 = pnand %p5613_p7, %p5922_p8  ;;  %p5622_p0 = por %p5621_p4, %p5620_p1 }
  0x4b   : > { %p5616_p10 = pneg %p5615_p9 }
  0x4d   : > { %p5623_p3 = pnand %p5622_p0, %p5616_p10 }
  0x4f   : > { %5626 = shalt.err (!%p5623_p3)
}
  0x50   : > { %s5799_s27 = smov 128   ;;  %s5800_s15 = smov 8  }
  0x51   : > { %5278 = dma.hbm_to_vmem [thread:$0]  (!%p5908_p2), %s7332_s3, 8192, %s197_s12, [#allocation9], %s5799_s27, %s5799_s27, %s5800_s15  }
  0x52   : > { %s5801_s26 = smov [#allocation10]   ;;  %s5970_s14 = sand.u32 1, %s5789_s20  }
  0x53   : > { %s209_s8 = sshll.u32 %s5801_s26, 4  ;;  %s5627_s11 = scalar_lea.hbm %s7333_s4, 512  ;;  %s210_s8 = int_to_ptr.vmem [resolvable:$true] %s209_s8 }
  0x54   : > { %p5628_p3 = scmp.ne.s32.totalorder %s7333_s4, %s5627_s11  ;;  %p5634_p11 = scmp.lt.u32.totalorder %s5627_s11, %s7333_s4 }
  0x56   : > { %p5630_p5 = pnand %p5628_p3, %p5922_p8 }
  0x58   : > { %p5631_p6 = pneg %p5630_p5 }
  0x5a   : > { %p5636_p12 = pnand %p5634_p11, %p5631_p6 }
  0x5c   : > { %5639 = shalt.err (!%p5636_p12)
}
  0x5d   : > { %s5640_s12 = scalar_lea.vmem %s210_s8, 512  ;;  %p5648_p10 = scmp.lt.s32.totalorder %s210_s8, %s210_s8 }
  0x5e   : > { %p5641_p13 = scmp.ne.s32.totalorder %s210_s8, %s5640_s12  ;;  %p5649_p1 = scmp.lt.s32.totalorder %s5640_s12, %s5640_s12 }
  0x60   : > { %p5643_p7 = pnand %p5641_p13, %p5922_p8  ;;  %p5650_p4 = por %p5649_p1, %p5648_p10 }
  0x62   : > { %p5644_p9 = pneg %p5643_p7 }
  0x64   : > { %p5651_p0 = pnand %p5650_p4, %p5644_p9 }
  0x66   : > { %5654 = shalt.err (!%p5651_p0)
}
  0x67   : > { %5281 = dma.hbm_to_vmem [thread:$0]  (!%p5908_p2), %s7333_s4, 512, %s210_s8, [#allocation9], %s5799_s27, %s5799_s27, %s5800_s15  }
  0x68   : > { %s4766_s6 = sshll.u32 %s5970_s14, 8  ;;  %s4767_s23 = sshll.u32 %s5793_s21, 6 }
  0x69   : > { %s5999_s10 = scalar_lea.hbm %s7329_s0, %s4767_s23  ;;  %s227_s17 = scalar_lea.vmem [#allocation2], %s4766_s6 }
  0x6a   : > { %s233_s25 = sshll.u32 %s227_s17, 4  ;;  %s243_s26 = sand.u32 1, %s5793_s21   ;;  %s6001_s25 = int_to_ptr.vmem [resolvable:$true] %s233_s25 }
  0x6b   : > { %s224_s9 = scalar_lea.sflag [#allocation3], %s5970_s14  ;;  %s5655_s28 = scalar_lea.hbm %s5999_s10, 4096 }
  0x6c   : > { %p5656_p2 = scmp.ne.s32.totalorder %s5999_s10, %s5655_s28  ;;  %p7362_p8 = scmp.ne.s32.totalorder %s7361_s16, 0 }
  0x6d   : > { %s5660_s12 = scalar_lea.hbm %s7329_s0, 8192  ;;  %p5661_p11 = scmp.lt.u32.totalorder %s5999_s10, %s7329_s0 }
  0x6e   : > { %p5657_p3 = pneg %p7362_p8  ;;  %p5662_p12 = scmp.lt.u32.totalorder %s5660_s12, %s5655_s28 }
  0x6f   : > { %p5664_p7 = scmp.lt.u32.totalorder %s5655_s28, %s5999_s10 }
  0x70   : > { %p5658_p5 = pnand %p5657_p3, %p5656_p2  ;;  %p5663_p13 = por %p5662_p12, %p5661_p11 }
  0x72   : > { %p5659_p6 = pneg %p5658_p5  ;;  %p5665_p9 = por %p5664_p7, %p5663_p13 }
  0x74   : > { %p5666_p10 = pnand %p5665_p9, %p5659_p6 }
  0x76   : > { %5669 = shalt.err (!%p5666_p10)
}
  0x77   : > { %s5670_s6 = scalar_lea.vmem %s6001_s25, 4096  ;;  %s5802_s11 = smov [#allocation2]  }
  0x78   : > { %p5671_p1 = scmp.ne.s32.totalorder %s6001_s25, %s5670_s6  ;;  %s5675_s13 = sshll.u32 %s5802_s11, 4  ;;  %s5676_s13 = int_to_ptr.vmem [resolvable:$false] %s5675_s13 }
  0x79   : > { %s5677_s17 = scalar_lea.vmem %s5676_s13, 8192  ;;  %p5678_p2 = scmp.lt.s32.totalorder %s6001_s25, %s5676_s13 }
  0x7a   : > { %p5673_p4 = pnand %p5671_p1, %p5657_p3  ;;  %p5679_p5 = scmp.lt.s32.totalorder %s5677_s17, %s5670_s6 }
  0x7c   : > { %p5674_p0 = pneg %p5673_p4  ;;  %p5680_p11 = por %p5679_p5, %p5678_p2 }
  0x7e   : > { %p5681_p12 = pnand %p5680_p11, %p5674_p0 }
  0x80   : > { %5684 = shalt.err (!%p5681_p12)
}
  0x81   : > { %s7363_s28 = smov 4   ;;  %s7364_s15 = smov 64  }
  0x82   : > { %5285 = dma.hbm_to_vmem [thread:$0]  (!%p7362_p8), %s5999_s10, 4096, %s6001_s25, %s224_s9, %s5799_s27, %s7364_s15, %s7363_s28  }
  0x83   : > { %s6040_s2 = scalar_lea.hbm %s7330_s1, %s4767_s23  ;;  %s4768_s24 = sshll.u32 %s5970_s14, 5 }
  0x84   : > { %s247_s6 = scalar_lea.vmem [#allocation5], %s4768_s24  ;;  %s6047_s13 = scalar_lea.sflag [#allocation6], %s243_s26 }
  0x85   : > { %s253_s11 = sshll.u32 %s247_s6, 4  ;;  %s5685_s17 = scalar_lea.hbm %s6040_s2, 512  ;;  %s6043_s11 = int_to_ptr.vmem [resolvable:$true] %s253_s11 }
  0x86   : > { %p5686_p6 = scmp.ne.s32.totalorder %s6040_s2, %s5685_s17  ;;  %s5690_s25 = scalar_lea.hbm %s7330_s1, 1024 }
  0x87   : > { %p5691_p9 = scmp.lt.u32.totalorder %s6040_s2, %s7330_s1  ;;  %p5692_p10 = scmp.lt.u32.totalorder %s5690_s25, %s5685_s17 }
  0x88   : > { %p5688_p13 = pnand %p5686_p6, %p5657_p3  ;;  %p5694_p4 = scmp.lt.u32.totalorder %s5685_s17, %s6040_s2 }
  0x89   : > { %p5693_p1 = por %p5692_p10, %p5691_p9 }
  0x8a   : > { %p5689_p7 = pneg %p5688_p13 }
  0x8b   : > { %p5695_p0 = por %p5694_p4, %p5693_p1 }
  0x8d   : > { %p5696_p2 = pnand %p5695_p0, %p5689_p7 }
  0x8f   : > { %5699 = shalt.err (!%p5696_p2)
}
  0x90   : > { %s5700_s14 = scalar_lea.vmem %s6043_s11, 512  ;;  %s5803_s26 = smov [#allocation5]  }
  0x91   : > { %p5701_p5 = scmp.ne.s32.totalorder %s6043_s11, %s5700_s14  ;;  %s5705_s12 = sshll.u32 %s5803_s26, 4  ;;  %s5706_s12 = int_to_ptr.vmem [resolvable:$false] %s5705_s12 }
  0x92   : > { %s5707_s24 = scalar_lea.vmem %s5706_s12, 1024  ;;  %p5708_p6 = scmp.lt.s32.totalorder %s6043_s11, %s5706_s12 }
  0x93   : > { %p5703_p11 = pnand %p5701_p5, %p5657_p3  ;;  %p5709_p13 = scmp.lt.s32.totalorder %s5707_s24, %s5700_s14 }
  0x95   : > { %p5704_p12 = pneg %p5703_p11  ;;  %p5710_p9 = por %p5709_p13, %p5708_p6 }
  0x97   : > { %p5711_p10 = pnand %p5710_p9, %p5704_p12 }
  0x99   : > { %5714 = shalt.err (!%p5711_p10)
}
  0x9a   : > { %5288 = dma.hbm_to_vmem [thread:$0]  (!%p7362_p8), %s6040_s2, 512, %s6043_s11, %s6047_s13, %s5799_s27, %s7364_s15, %s7363_s28  }
  0x9b   : > { %p7365_p3 = scmp.ne.s32.totalorder %s7355_s7, 0 }
  0x9c   : > { %s6079_s6 = sand.u32 (!%p7365_p3), 1, %s5785_s19   ;;  %p7366_p7 = scmp.ne.s32.totalorder (!%p7365_p3), %s7351_s29, 0 }
  0x9d   : > { %265 = sbr.rel (%p7365_p3) target bundleno = 1516 (0x5ec), region = 40  ;;  %s4771_s17 = sshll.u32 (!%p7365_p3), %s6079_s6, 8 }
  0x9e   : > { %s268_s23 = scalar_lea.sflag (!%p7365_p3), [#allocation3], %s6079_s6  ;;  %s6083_s10 = scalar_lea.vmem (!%p7365_p3), [#allocation2], %s4771_s17 }
  0xa4   : > { %5760 = dma.done.wait (%p7366_p7), %s268_s23, 4096  }
  0xa5   : > { %5762 = vsyncadd (%p7366_p7), %s268_s23, 4294963200  ;;  %s276_s7 = sand.u32 1, %s5861_s22   ;;  %s4772_s16 = sshll.u32 %s6079_s6, 5 }
  0xa6   : > { %s277_s27 = scalar_lea.sflag [#allocation6], %s276_s7  ;;  %s6093_s28 = scalar_lea.vmem [#allocation5], %s4772_s16 }
  0xa7   : > { %5764 = dma.done.wait (%p7366_p7), %s277_s27, 512  }
  0xa8   : > { %5766 = vsyncadd (%p7366_p7), %s277_s27, 4294966784  ;;  %p7367_p8 = scmp.eq.s32.totalorder %s5861_s22, 0 }
  0xaa   : > { %5768 = dma.done.wait (%p7367_p8), [#allocation6], 2048   ;;  %p7368_p1 = pmov %p7367_p8 }
  0xac   : > { %5770 = vsyncadd (%p7368_p1), [#allocation6], 4294965248  ;;  %p7369_p4 = pmov %p7368_p1 }
  0xad   : > { %p7370_p0 = pmov %p7368_p1 }
  0xae   : > { %5772 = dma.done.wait (%p7369_p4), [#allocation9], 8704  }
  0xaf   : > { %5774 = vsyncadd (%p7370_p0), [#allocation9], 4294958592  ;;  %v5347_v0 = vld [vmem:[%s6083_s10] sm:$0xff]   ;;  %v5349_v2 = vld [vmem:[%s6083_s10 + $0x8] sm:$0xff]   ;;  %v5804_v32 = vmov 0   ;;  %s323_s29 = scalar_lea.vmem [#allocation11], %s4772_s16 }
  0xb0   : > { %v5348_v1 = vld [vmem:[%s6083_s10 + $0x40] sm:$0xff]   ;;  %5062 = vmatprep.subr.bf16.mxu1 %v5347_v0  ;;  %v5350_v3 = vld [vmem:[%s6083_s10 + $0x48] sm:$0xff]   ;;  %v5351_v4 = vld [vmem:[%s6083_s10 + $0x10] sm:$0xff]   ;;  %5345 = vset.pattern.permute.xlu0 %v5804_v32  ;;  %s4636_s15 = sshll.u32 %s323_s29, 4  ;;  %s4944_s2 = sshll.u32 %s5861_s22, 7  ;;  %s7279_s15 = int_to_ptr.vmem [resolvable:$true] %s4636_s15 }
  0xb1   : > { %5110 = vmatprep.subr.bf16.mxu0 %v5348_v1  ;;  %5063 = vmatpush3.bf16.msra.mxu1 %v5347_v0  ;;  %v5352_v5 = vld [vmem:[%s6083_s10 + $0x50] sm:$0xff]   ;;  %v5353_v6 = vld [vmem:[%s6083_s10 + $0x18] sm:$0xff]   ;;  %v5355_v8 = vld [vmem:[%s6083_s10 + $0x20] sm:$0xff]   ;;  %s7285_s25 = scalar_lea.hbm %s7334_s5, %s4944_s2  ;;  %s4624_s9 = scalar_lea.sflag [#allocation4], %s6079_s6 }
  0xb2   : > { %5111 = vmatpush3.bf16.msra.mxu0 %v5348_v1  ;;  %5064 = vmatprep.subr.bf16.mxu1 %v5349_v2  ;;  %v5354_v7 = vld [vmem:[%s6083_s10 + $0x58] sm:$0xff]   ;;  %v5356_v9 = vld [vmem:[%s6083_s10 + $0x60] sm:$0xff]   ;;  %v5357_v10 = vld [vmem:[%s6083_s10 + $0x28] sm:$0xff]   ;;  %s5715_s8 = scalar_lea.vmem %s7279_s15, 512  ;;  %p7371_p5 = scmp.ne.s32.totalorder %s7352_s30, 0 }
  0xb3   : > { %5112 = vmatprep.subr.bf16.mxu0 %v5350_v3  ;;  %v5363_v11 = vld [vmem:[#allocation7] sm:$0xff]   ;;  %v5358_v12 = vld [vmem:[%s6083_s10 + $0x68] sm:$0xff]   ;;  %v5359_v13 = vld [vmem:[%s6083_s10 + $0x30] sm:$0xff]   ;;  %5346 = vset.pattern.permute.xlu1 %v5804_v32  ;;  %p5716_p2 = scmp.ne.s32.totalorder %s7279_s15, %s5715_s8  ;;  %s5806_s22 = smov [#allocation11]  }
  0xb4   : > { %5078 = vmatprep.mubr.bf16.mxu1 %v5363_v11  ;;  %5126 = vmatprep.mubr.bf16.mxu0 %v5363_v11  ;;  %v5360_v14 = vld [vmem:[%s6083_s10 + $0x70] sm:$0xff]   ;;  %v5361_v15 = vld [vmem:[%s6083_s10 + $0x38] sm:$0xff]   ;;  %v5364_v17 = vld [vmem:[#allocation7 + $0x8] sm:$0xff]   ;;  %s5719_s14 = sshll.u32 %s5806_s22, 4  ;;  %s5720_s14 = int_to_ptr.vmem [resolvable:$false] %s5719_s14 }
  0xb5   : > { %5065 = vmatpush3.bf16.msra.mxu1 %v5349_v2  ;;  %v5362_v16 = vld [vmem:[%s6083_s10 + $0x78] sm:$0xff]   ;;  %v5365_v18 = vld [vmem:[#allocation7 + $0x10] sm:$0xff]   ;;  %v5367_v20 = vld [vmem:[#allocation7 + $0x20] sm:$0xff]   ;;  %p5717_p11 = pnand %p5716_p2, %p7371_p5  ;;  %s5721_s26 = scalar_lea.vmem %s5720_s14, 1024 }
  0xb6   : > { %5113 = vmatpush3.bf16.msra.mxu0 %v5350_v3  ;;  %5066 = vmatprep.subr.bf16.mxu1 %v5351_v4  ;;  %v5366_v19 = vld [vmem:[#allocation7 + $0x18] sm:$0xff]   ;;  %v5368_v21 = vld [vmem:[#allocation7 + $0x28] sm:$0xff]   ;;  %v5369_v22 = vld [vmem:[#allocation7 + $0x30] sm:$0xff]   ;;  %p5722_p6 = scmp.lt.s32.totalorder %s7279_s15, %s5720_s14  ;;  %p5723_p13 = scmp.lt.s32.totalorder %s5721_s26, %s5715_s8 }
  0xb7   : > { %5114 = vmatprep.subr.bf16.mxu0 %v5352_v5  ;;  %v5370_v23 = vld [vmem:[#allocation7 + $0x38] sm:$0xff]   ;;  %v5371_v24 = vld [vmem:[#allocation7 + $0x40] sm:$0xff]   ;;  %v5372_v25 = vld [vmem:[#allocation7 + $0x48] sm:$0xff]   ;;  %p5718_p12 = pneg %p5717_p11 }
  0xb8   : > { %v5373_v26 = vld [vmem:[#allocation7 + $0x50] sm:$0xff]   ;;  %v5374_v27 = vld [vmem:[#allocation7 + $0x58] sm:$0xff]   ;;  %v5375_v28 = vld [vmem:[#allocation7 + $0x60] sm:$0xff]   ;;  %p5724_p9 = por %p5723_p13, %p5722_p6 }
  0xb9   : > { %5067 = vmatpush3.bf16.msra.mxu1 %v5351_v4  ;;  %v5376_v29 = vld [vmem:[#allocation7 + $0x68] sm:$0xff]   ;;  %v5377_v30 = vld [vmem:[#allocation7 + $0x70] sm:$0xff]   ;;  %v5378_v31 = vld [vmem:[#allocation7 + $0x78] sm:$0xff]  }
  0xba   : > { %5115 = vmatpush3.bf16.msra.mxu0 %v5352_v5  ;;  %5068 = vmatprep.subr.bf16.mxu1 %v5353_v6  ;;  %v5381_v33 = vld [vmem:[#allocation8 + $0x4] ss:$8 sps:$4 sm:$0xff]   ;;  %p5725_p10 = pnand %p5724_p9, %p5718_p12 }
  0xbb   : > { %5116 = vmatprep.subr.bf16.mxu0 %v5354_v7 }
  0xbd   : > { %5069 = vmatpush3.bf16.msra.mxu1 %v5353_v6 }
  0xbe   : > { %5117 = vmatpush3.bf16.msra.mxu0 %v5354_v7  ;;  %5070 = vmatprep.subr.bf16.mxu1 %v5355_v8 }
  0xbf   : > { %5118 = vmatprep.subr.bf16.mxu0 %v5356_v9 }
  0xc1   : > { %5071 = vmatpush3.bf16.msra.mxu1 %v5355_v8 }
  0xc2   : > { %5119 = vmatpush3.bf16.msra.mxu0 %v5356_v9  ;;  %5072 = vmatprep.subr.bf16.mxu1 %v5357_v10 }
  0xc3   : > { %5120 = vmatprep.subr.bf16.mxu0 %v5358_v12 }
  0xc5   : > { %5073 = vmatpush3.bf16.msra.mxu1 %v5357_v10 }
  0xc6   : > { %5121 = vmatpush3.bf16.msra.mxu0 %v5358_v12  ;;  %5074 = vmatprep.subr.bf16.mxu1 %v5359_v13 }
  0xc7   : > { %5122 = vmatprep.subr.bf16.mxu0 %v5360_v14 }
  0xc9   : > { %5075 = vmatpush3.bf16.msra.mxu1 %v5359_v13 }
  0xca   : > { %5123 = vmatpush3.bf16.msra.mxu0 %v5360_v14  ;;  %5076 = vmatprep.subr.bf16.mxu1 %v5361_v15 }
  0xcb   : > { %5124 = vmatprep.subr.bf16.mxu0 %v5362_v16 }
  0xcd   : > { %5077 = vmatpush3.bf16.msra.mxu1 %v5361_v15 }
  0xce   : > { %5125 = vmatpush3.bf16.msra.mxu0 %v5362_v16  ;;  %1114 = vmatprep.subr.bf16.mxu1 %v5804_v32 }
  0xcf   : > { %2073 = vmatprep.subr.bf16.mxu0 %v5804_v32 }
  0xd0   : > { %5079 = vmatmul.mubr.bf16.vlgmr.msra.gmra.mrb[0].mxu1 %v5364_v17 }
  0xd1   : > { %5127 = vmatmul.mubr.bf16.vlgmr.msra.gmra.mrb[0].mxu0 %v5364_v17  ;;  %5082 = vmatprep.mubr.bf16.mxu1 %v5365_v18 }
  0xd2   : > { %5130 = vmatprep.mubr.bf16.mxu0 %v5365_v18 }
  0xd8   : > { %5083 = vmatmul.mubr.bf16.gmra.mrb[4].mxu1 %v5366_v19 }
  0xd9   : > { %5131 = vmatmul.mubr.bf16.gmra.mrb[4].mxu0 %v5366_v19  ;;  %5086 = vmatprep.mubr.bf16.mxu1 %v5367_v20 }
  0xda   : > { %5134 = vmatprep.mubr.bf16.mxu0 %v5367_v20 }
  0xe0   : > { %5087 = vmatmul.mubr.bf16.gmra.mrb[8].mxu1 %v5368_v21 }
  0xe1   : > { %5135 = vmatmul.mubr.bf16.gmra.mrb[8].mxu0 %v5368_v21  ;;  %5090 = vmatprep.mubr.bf16.mxu1 %v5369_v22 }
  0xe2   : > { %5138 = vmatprep.mubr.bf16.mxu0 %v5369_v22 }
  0xe8   : > { %5091 = vmatmul.mubr.bf16.gmra.mrb[12].mxu1 %v5370_v23 }
  0xe9   : > { %5139 = vmatmul.mubr.bf16.gmra.mrb[12].mxu0 %v5370_v23  ;;  %5094 = vmatprep.mubr.bf16.mxu1 %v5371_v24 }
  0xea   : > { %5142 = vmatprep.mubr.bf16.mxu0 %v5371_v24 }
  0xf0   : > { %5095 = vmatmul.mubr.bf16.gmra.mrb[16].mxu1 %v5372_v25 }
  0xf1   : > { %5143 = vmatmul.mubr.bf16.gmra.mrb[16].mxu0 %v5372_v25  ;;  %5098 = vmatprep.mubr.bf16.mxu1 %v5373_v26 }
  0xf2   : > { %5146 = vmatprep.mubr.bf16.mxu0 %v5373_v26 }
  0xf8   : > { %5099 = vmatmul.mubr.bf16.gmra.mrb[20].mxu1 %v5374_v27 }
  0xf9   : > { %5147 = vmatmul.mubr.bf16.gmra.mrb[20].mxu0 %v5374_v27  ;;  %5102 = vmatprep.mubr.bf16.mxu1 %v5375_v28 }
  0xfa   : > { %5150 = vmatprep.mubr.bf16.mxu0 %v5375_v28 }
 0x100   : > { %5103 = vmatmul.mubr.bf16.gmra.mrb[24].mxu1 %v5376_v29 }
 0x101   : > { %5151 = vmatmul.mubr.bf16.gmra.mrb[24].mxu0 %v5376_v29  ;;  %5106 = vmatprep.mubr.bf16.mxu1 %v5377_v30 }
 0x102   : > { %5154 = vmatprep.mubr.bf16.mxu0 %v5377_v30 }
 0x108   : > { %5107 = vmatmul.mubr.bf16.gmra.mrb[28].mxu1 %v5378_v31 }
 0x109   : > { %5155 = vmatmul.mubr.bf16.gmra.mrb[28].mxu0 %v5378_v31  ;;  %1146 = vmatprep.mubr.bf16.mxu1 %v5381_v33  ;;  %v421_v31 = vld [vmem:[#allocation10] sm:$0xff] }
 0x10a   : > { %2105 = vmatprep.mubr.bf16.mxu0 %v5381_v33  ;;  %1409 = vperm.xlu0 %5345, %v421_v31  }
 0x1a3   : > { %v5080_v34 = vpop.f32.mrb[0].mxu1 }
 0x1a4   : > { %v5128_v35 = vpop.f32.mrb[0].mxu0  ;;  %v619_v36 = vpop.f32.mrb[1].mxu1  ;;  %v748_v40 = vmax.f32 %v5080_v34, 0.0 }
 0x1a5   : > { %v2027_v37 = vmax.f32 %v5128_v35, 0.0  ;;  %v1898_v38 = vpop.f32.mrb[1].mxu0  ;;  %v5081_v39 = vpop.f32.mrb[2].mxu1  ;;  %v746_v45 = vmax.f32 %v619_v36, 0.0 }
 0x1a6   : > { %v2025_v41 = vmax.f32 %v1898_v38, 0.0  ;;  %v749_v42 = vmax.f32 %v5081_v39, 0.0  ;;  %v5129_v43 = vpop.f32.mrb[2].mxu0  ;;  %v622_v44 = vpop.f32.mrb[3].mxu1 }
 0x1a7   : > { %v2028_v46 = vmax.f32 %v5129_v43, 0.0  ;;  %v747_v47 = vmax.f32 %v622_v44, 0.0  ;;  %v1901_v48 = vpop.f32.mrb[3].mxu0  ;;  %v422_v43 = vld [vmem:[#allocation10 + $0x8] sm:$0xff] }
 0x1a8   : > { %v779_v49 = vpack.c.bf16 %v749_v42, %v748_v40  ;;  %v2026_v50 = vmax.f32 %v1901_v48, 0.0  ;;  %1414 = vperm.xlu0 %5345, %v422_v43  }
 0x1a9   : > { %v2058_v51 = vpack.c.bf16 %v2028_v46, %v2027_v37  ;;  %v778_v52 = vpack.c.bf16 %v747_v47, %v746_v45 }
 0x1aa   : > { %v2057_v53 = vpack.c.bf16 %v2026_v50, %v2025_v41 }
 0x1ab   : > { %v5084_v54 = vpop.f32.mrb[4].mxu1  ;;  %1115 = vmatpush1.bf16.msra.mxu1 %v778_v52 }
 0x1ac   : > { %v5132_v55 = vpop.f32.mrb[4].mxu0  ;;  %2074 = vmatpush1.bf16.msra.mxu0 %v2057_v53  ;;  %v635_v56 = vpop.f32.mrb[5].mxu1  ;;  %1116 = vmatprep.subr.bf16.mxu1 %v5804_v32  ;;  %v752_v60 = vmax.f32 %v5084_v54, 0.0  ;;  %v423_v54 = vld [vmem:[#allocation10 + $0x10] sm:$0xff] }
 0x1ad   : > { %v2031_v57 = vmax.f32 %v5132_v55, 0.0  ;;  %v1914_v58 = vpop.f32.mrb[5].mxu0  ;;  %v5085_v59 = vpop.f32.mrb[6].mxu1  ;;  %2075 = vmatprep.subr.bf16.mxu0 %v5804_v32  ;;  %v750_v1 = vmax.f32 %v635_v56, 0.0  ;;  %1419 = vperm.xlu1 %5346, %v423_v54  }
 0x1ae   : > { %v2029_v61 = vmax.f32 %v1914_v58, 0.0  ;;  %v753_v62 = vmax.f32 %v5085_v59, 0.0  ;;  %v5133_v63 = vpop.f32.mrb[6].mxu0  ;;  %v638_v0 = vpop.f32.mrb[7].mxu1 }
 0x1af   : > { %v2032_v2 = vmax.f32 %v5133_v63, 0.0  ;;  %v751_v3 = vmax.f32 %v638_v0, 0.0  ;;  %v1917_v4 = vpop.f32.mrb[7].mxu0  ;;  %1117 = vmatpush1.bf16.msra.mxu1 %v779_v49 }
 0x1b0   : > { %v781_v5 = vpack.c.bf16 %v753_v62, %v752_v60  ;;  %v2030_v6 = vmax.f32 %v1917_v4, 0.0  ;;  %2076 = vmatpush1.bf16.msra.mxu0 %v2058_v51  ;;  %1118 = vmatprep.subr.bf16.mxu1 %v5804_v32 }
 0x1b1   : > { %v2060_v7 = vpack.c.bf16 %v2032_v2, %v2031_v57  ;;  %v780_v8 = vpack.c.bf16 %v751_v3, %v750_v1  ;;  %2077 = vmatprep.subr.bf16.mxu0 %v5804_v32  ;;  %v424_v1 = vld [vmem:[#allocation10 + $0x18] sm:$0xff] }
 0x1b2   : > { %v2059_v9 = vpack.c.bf16 %v2030_v6, %v2029_v61  ;;  %1424 = vperm.xlu1 %5346, %v424_v1  }
 0x1b3   : > { %v5088_v10 = vpop.f32.mrb[8].mxu1  ;;  %1119 = vmatpush1.bf16.msra.mxu1 %v780_v8 }
 0x1b4   : > { %v5136_v11 = vpop.f32.mrb[8].mxu0  ;;  %2078 = vmatpush1.bf16.msra.mxu0 %v2059_v9  ;;  %v651_v12 = vpop.f32.mrb[9].mxu1  ;;  %1120 = vmatprep.subr.bf16.mxu1 %v5804_v32  ;;  %v756_v16 = vmax.f32 %v5088_v10, 0.0 }
 0x1b5   : > { %v2035_v13 = vmax.f32 %v5136_v11, 0.0  ;;  %v1930_v14 = vpop.f32.mrb[9].mxu0  ;;  %v5089_v15 = vpop.f32.mrb[10].mxu1  ;;  %2079 = vmatprep.subr.bf16.mxu0 %v5804_v32  ;;  %v754_v21 = vmax.f32 %v651_v12, 0.0 }
 0x1b6   : > { %v2033_v17 = vmax.f32 %v1930_v14, 0.0  ;;  %v757_v18 = vmax.f32 %v5089_v15, 0.0  ;;  %v5137_v19 = vpop.f32.mrb[10].mxu0  ;;  %v654_v20 = vpop.f32.mrb[11].mxu1 }
 0x1b7   : > { %v2036_v22 = vmax.f32 %v5137_v19, 0.0  ;;  %v755_v23 = vmax.f32 %v654_v20, 0.0  ;;  %v1933_v24 = vpop.f32.mrb[11].mxu0  ;;  %1121 = vmatpush1.bf16.msra.mxu1 %v781_v5 }
 0x1b8   : > { %v783_v25 = vpack.c.bf16 %v757_v18, %v756_v16  ;;  %v2034_v26 = vmax.f32 %v1933_v24, 0.0  ;;  %2080 = vmatpush1.bf16.msra.mxu0 %v2060_v7  ;;  %1122 = vmatprep.subr.bf16.mxu1 %v5804_v32 }
 0x1b9   : > { %v2062_v27 = vpack.c.bf16 %v2036_v22, %v2035_v13  ;;  %v782_v28 = vpack.c.bf16 %v755_v23, %v754_v21  ;;  %2081 = vmatprep.subr.bf16.mxu0 %v5804_v32 }
 0x1ba   : > { %v2061_v29 = vpack.c.bf16 %v2034_v26, %v2033_v17 }
 0x1bb   : > { %v5092_v30 = vpop.f32.mrb[12].mxu1  ;;  %1123 = vmatpush1.bf16.msra.mxu1 %v782_v28 }
 0x1bc   : > { %v5140_v33 = vpop.f32.mrb[12].mxu0  ;;  %2082 = vmatpush1.bf16.msra.mxu0 %v2061_v29  ;;  %v667_v34 = vpop.f32.mrb[13].mxu1  ;;  %1124 = vmatprep.subr.bf16.mxu1 %v5804_v32  ;;  %v760_v38 = vmax.f32 %v5092_v30, 0.0 }
 0x1bd   : > { %v2039_v35 = vmax.f32 %v5140_v33, 0.0  ;;  %v1946_v36 = vpop.f32.mrb[13].mxu0  ;;  %v5093_v37 = vpop.f32.mrb[14].mxu1  ;;  %2083 = vmatprep.subr.bf16.mxu0 %v5804_v32  ;;  %v758_v44 = vmax.f32 %v667_v34, 0.0 }
 0x1be   : > { %v2037_v39 = vmax.f32 %v1946_v36, 0.0  ;;  %v761_v40 = vmax.f32 %v5093_v37, 0.0  ;;  %v5141_v41 = vpop.f32.mrb[14].mxu0  ;;  %v670_v42 = vpop.f32.mrb[15].mxu1 }
 0x1bf   : > { %v2040_v45 = vmax.f32 %v5141_v41, 0.0  ;;  %v759_v46 = vmax.f32 %v670_v42, 0.0  ;;  %v1949_v47 = vpop.f32.mrb[15].mxu0  ;;  %1125 = vmatpush1.bf16.msra.mxu1 %v783_v25 }
 0x1c0   : > { %v785_v48 = vpack.c.bf16 %v761_v40, %v760_v38  ;;  %v2038_v49 = vmax.f32 %v1949_v47, 0.0  ;;  %2084 = vmatpush1.bf16.msra.mxu0 %v2062_v27  ;;  %1126 = vmatprep.subr.bf16.mxu1 %v5804_v32 }
 0x1c1   : > { %v2064_v50 = vpack.c.bf16 %v2040_v45, %v2039_v35  ;;  %v784_v51 = vpack.c.bf16 %v759_v46, %v758_v44  ;;  %2085 = vmatprep.subr.bf16.mxu0 %v5804_v32 }
 0x1c2   : > { %v2063_v52 = vpack.c.bf16 %v2038_v49, %v2037_v39 }
 0x1c3   : > { %v5096_v53 = vpop.f32.mrb[16].mxu1  ;;  %1127 = vmatpush1.bf16.msra.mxu1 %v784_v51 }
 0x1c4   : > { %v5144_v55 = vpop.f32.mrb[16].mxu0  ;;  %2086 = vmatpush1.bf16.msra.mxu0 %v2063_v52  ;;  %v683_v56 = vpop.f32.mrb[17].mxu1  ;;  %1128 = vmatprep.subr.bf16.mxu1 %v5804_v32  ;;  %v764_v60 = vmax.f32 %v5096_v53, 0.0 }
 0x1c5   : > { %v2043_v57 = vmax.f32 %v5144_v55, 0.0  ;;  %v1962_v58 = vpop.f32.mrb[17].mxu0  ;;  %v5097_v59 = vpop.f32.mrb[18].mxu1  ;;  %2087 = vmatprep.subr.bf16.mxu0 %v5804_v32  ;;  %v762_v2 = vmax.f32 %v683_v56, 0.0 }
 0x1c6   : > { %v2041_v61 = vmax.f32 %v1962_v58, 0.0  ;;  %v765_v62 = vmax.f32 %v5097_v59, 0.0  ;;  %v5145_v63 = vpop.f32.mrb[18].mxu0  ;;  %v686_v0 = vpop.f32.mrb[19].mxu1 }
 0x1c7   : > { %v2044_v3 = vmax.f32 %v5145_v63, 0.0  ;;  %v763_v4 = vmax.f32 %v686_v0, 0.0  ;;  %v1965_v5 = vpop.f32.mrb[19].mxu0  ;;  %1129 = vmatpush1.bf16.msra.mxu1 %v785_v48 }
 0x1c8   : > { %v787_v6 = vpack.c.bf16 %v765_v62, %v764_v60  ;;  %v2042_v7 = vmax.f32 %v1965_v5, 0.0  ;;  %2088 = vmatpush1.bf16.msra.mxu0 %v2064_v50  ;;  %1130 = vmatprep.subr.bf16.mxu1 %v5804_v32 }
 0x1c9   : > { %v2066_v8 = vpack.c.bf16 %v2044_v3, %v2043_v57  ;;  %v786_v9 = vpack.c.bf16 %v763_v4, %v762_v2  ;;  %2089 = vmatprep.subr.bf16.mxu0 %v5804_v32 }
 0x1ca   : > { %v2065_v10 = vpack.c.bf16 %v2042_v7, %v2041_v61 }
 0x1cb   : > { %v5100_v11 = vpop.f32.mrb[20].mxu1  ;;  %1131 = vmatpush1.bf16.msra.mxu1 %v786_v9  ;;  %v5383_v9 = vld [vmem:[%s6083_s10 + $0xc0] sm:$0xff]  }
 0x1cc   : > { %v5148_v12 = vpop.f32.mrb[20].mxu0  ;;  %2090 = vmatpush1.bf16.msra.mxu0 %v2065_v10  ;;  %v699_v13 = vpop.f32.mrb[21].mxu1  ;;  %1132 = vmatprep.subr.bf16.mxu1 %v5804_v32  ;;  %v768_v17 = vmax.f32 %v5100_v11, 0.0  ;;  %v5379_v10 = vld [vmem:[#allocation8] ss:$8 sps:$4 sm:$0xff]  }
 0x1cd   : > { %v2047_v14 = vmax.f32 %v5148_v12, 0.0  ;;  %v1978_v15 = vpop.f32.mrb[21].mxu0  ;;  %v5101_v16 = vpop.f32.mrb[22].mxu1  ;;  %2091 = vmatprep.subr.bf16.mxu0 %v5804_v32  ;;  %v766_v22 = vmax.f32 %v699_v13, 0.0  ;;  %v5384_v11 = vld [vmem:[#allocation8 + $0x14] ss:$8 sps:$4 sm:$0xff]  }
 0x1ce   : > { %v2045_v18 = vmax.f32 %v1978_v15, 0.0  ;;  %v769_v19 = vmax.f32 %v5101_v16, 0.0  ;;  %v5149_v20 = vpop.f32.mrb[22].mxu0  ;;  %v702_v21 = vpop.f32.mrb[23].mxu1  ;;  %v5396_v12 = vld [vmem:[%s6083_s10 + $0x88] sm:$0xff]   ;;  %v5411_v15 = vld [vmem:[%s6083_s10 + $0xd0] sm:$0xff]  }
 0x1cf   : > { %v2048_v23 = vmax.f32 %v5149_v20, 0.0  ;;  %v767_v24 = vmax.f32 %v702_v21, 0.0  ;;  %v1981_v25 = vpop.f32.mrb[23].mxu0  ;;  %1133 = vmatpush1.bf16.msra.mxu1 %v787_v6  ;;  %v5397_v13 = vld [vmem:[%s6083_s10 + $0xc8] sm:$0xff]   ;;  %v5386_v16 = vld [vmem:[#allocation8 + $0x10] ss:$8 sps:$4 sm:$0xff]  }
 0x1d0   : > { %v789_v26 = vpack.c.bf16 %v769_v19, %v768_v17  ;;  %v2046_v27 = vmax.f32 %v1981_v25, 0.0  ;;  %2092 = vmatpush1.bf16.msra.mxu0 %v2066_v8  ;;  %1134 = vmatprep.subr.bf16.mxu1 %v5804_v32  ;;  %v5382_v8 = vld [vmem:[%s6083_s10 + $0x80] sm:$0xff]   ;;  %v5425_v19 = vld [vmem:[%s6083_s10 + $0xd8] sm:$0xff]  }
 0x1d1   : > { %v2068_v28 = vpack.c.bf16 %v2048_v23, %v2047_v14  ;;  %v788_v29 = vpack.c.bf16 %v767_v24, %v766_v22  ;;  %2093 = vmatprep.subr.bf16.mxu0 %v5804_v32  ;;  %v5410_v14 = vld [vmem:[%s6083_s10 + $0x90] sm:$0xff]   ;;  %v5387_v17 = vld [vmem:[#allocation8 + $0x24] ss:$8 sps:$4 sm:$0xff]   ;;  %v5389_v21 = vld [vmem:[#allocation8 + $0x20] ss:$8 sps:$4 sm:$0xff]  }
 0x1d2   : > { %v2067_v30 = vpack.c.bf16 %v2046_v27, %v2045_v18  ;;  %v5424_v18 = vld [vmem:[%s6083_s10 + $0x98] sm:$0xff]   ;;  %v5438_v20 = vld [vmem:[%s6083_s10 + $0xa0] sm:$0xff]  }
 0x1d3   : > { %v5104_v31 = vpop.f32.mrb[24].mxu1  ;;  %1135 = vmatpush1.bf16.msra.mxu1 %v788_v29  ;;  %v5439_v22 = vld [vmem:[%s6083_s10 + $0xe0] sm:$0xff]   ;;  %v5390_v23 = vld [vmem:[#allocation8 + $0x34] ss:$8 sps:$4 sm:$0xff]   ;;  %v5392_v24 = vld [vmem:[#allocation8 + $0x30] ss:$8 sps:$4 sm:$0xff]  }
 0x1d4   : > { %v5152_v33 = vpop.f32.mrb[24].mxu0  ;;  %2094 = vmatpush1.bf16.msra.mxu0 %v2067_v30  ;;  %v715_v34 = vpop.f32.mrb[25].mxu1  ;;  %1136 = vmatprep.subr.bf16.mxu1 %v5804_v32  ;;  %v772_v38 = vmax.f32 %v5104_v31, 0.0  ;;  %v5393_v25 = vld [vmem:[#allocation8 + $0x44] ss:$8 sps:$4 sm:$0xff]  }
 0x1d5   : > { %v2051_v35 = vmax.f32 %v5152_v33, 0.0  ;;  %v1994_v36 = vpop.f32.mrb[25].mxu0  ;;  %v5105_v37 = vpop.f32.mrb[26].mxu1  ;;  %2095 = vmatprep.subr.bf16.mxu0 %v5804_v32  ;;  %v770_v43 = vmax.f32 %v715_v34, 0.0  ;;  %v5398_v27 = vld [vmem:[#allocation8 + $0x54] ss:$8 sps:$4 sm:$0xff]  }
 0x1d6   : > { %v2049_v39 = vmax.f32 %v1994_v36, 0.0  ;;  %v773_v40 = vmax.f32 %v5105_v37, 0.0  ;;  %v5153_v41 = vpop.f32.mrb[26].mxu0  ;;  %v718_v42 = vpop.f32.mrb[27].mxu1  ;;  %v5453_v29 = vld [vmem:[%s6083_s10 + $0xe8] sm:$0xff]  }
 0x1d7   : > { %v2052_v44 = vmax.f32 %v5153_v41, 0.0  ;;  %v771_v45 = vmax.f32 %v718_v42, 0.0  ;;  %v1997_v46 = vpop.f32.mrb[27].mxu0  ;;  %1137 = vmatpush1.bf16.msra.mxu1 %v789_v26  ;;  %v5395_v26 = vld [vmem:[#allocation8 + $0x40] ss:$8 sps:$4 sm:$0xff]  }
 0x1d8   : > { %v791_v47 = vpack.c.bf16 %v773_v40, %v772_v38  ;;  %v2050_v48 = vmax.f32 %v1997_v46, 0.0  ;;  %2096 = vmatpush1.bf16.msra.mxu0 %v2068_v28  ;;  %1138 = vmatprep.subr.bf16.mxu1 %v5804_v32  ;;  %v5452_v28 = vld [vmem:[%s6083_s10 + $0xa8] sm:$0xff]   ;;  %v5400_v30 = vld [vmem:[#allocation8 + $0x50] ss:$8 sps:$4 sm:$0xff]   ;;  %v5404_v34 = vld [vmem:[#allocation8 + $0x74] ss:$8 sps:$4 sm:$0xff]  }
 0x1d9   : > { %v2070_v49 = vpack.c.bf16 %v2052_v44, %v2051_v35  ;;  %v790_v50 = vpack.c.bf16 %v771_v45, %v770_v43  ;;  %2097 = vmatprep.subr.bf16.mxu0 %v5804_v32  ;;  %v5401_v31 = vld [vmem:[#allocation8 + $0x64] ss:$8 sps:$4 sm:$0xff]   ;;  %v5403_v33 = vld [vmem:[#allocation8 + $0x60] ss:$8 sps:$4 sm:$0xff]   ;;  %v5406_v35 = vld [vmem:[#allocation8 + $0x70] ss:$8 sps:$4 sm:$0xff]  }
 0x1da   : > { %v2069_v51 = vpack.c.bf16 %v2050_v48, %v2049_v39  ;;  %v5407_v36 = vld [vmem:[#allocation8 + $0x84] ss:$8 sps:$4 sm:$0xff]   ;;  %v5409_v37 = vld [vmem:[#allocation8 + $0x80] ss:$8 sps:$4 sm:$0xff]   ;;  %v5412_v38 = vld [vmem:[#allocation8 + $0x94] ss:$8 sps:$4 sm:$0xff]  }
 0x1db   : > { %v5108_v52 = vpop.f32.mrb[28].mxu1  ;;  %1139 = vmatpush1.bf16.msra.mxu1 %v790_v50  ;;  %v5466_v39 = vld [vmem:[%s6083_s10 + $0xb0] sm:$0xff]   ;;  %v5415_v42 = vld [vmem:[#allocation8 + $0xa4] ss:$8 sps:$4 sm:$0xff]   ;;  %v5417_v43 = vld [vmem:[#allocation8 + $0xa0] ss:$8 sps:$4 sm:$0xff]  }
 0x1dc   : > { %v5156_v53 = vpop.f32.mrb[28].mxu0  ;;  %2098 = vmatpush1.bf16.msra.mxu0 %v2069_v51  ;;  %v731_v54 = vpop.f32.mrb[29].mxu1  ;;  %1140 = vmatprep.subr.bf16.mxu1 %v5804_v32  ;;  %v776_v58 = vmax.f32 %v5108_v52, 0.0  ;;  %v5467_v40 = vld [vmem:[%s6083_s10 + $0xf0] sm:$0xff]   ;;  %v5421_v46 = vld [vmem:[#allocation8 + $0xc4] ss:$8 sps:$4 sm:$0xff]  }
 0x1dd   : > { %v2055_v55 = vmax.f32 %v5156_v53, 0.0  ;;  %v2010_v56 = vpop.f32.mrb[29].mxu0  ;;  %v5109_v57 = vpop.f32.mrb[30].mxu1  ;;  %2099 = vmatprep.subr.bf16.mxu0 %v5804_v32  ;;  %v774_v63 = vmax.f32 %v731_v54, 0.0  ;;  %v5414_v41 = vld [vmem:[#allocation8 + $0x90] ss:$8 sps:$4 sm:$0xff]  }
 0x1de   : > { %v2053_v59 = vmax.f32 %v2010_v56, 0.0  ;;  %v777_v60 = vmax.f32 %v5109_v57, 0.0  ;;  %v5157_v61 = vpop.f32.mrb[30].mxu0  ;;  %v734_v62 = vpop.f32.mrb[31].mxu1  ;;  %v5418_v44 = vld [vmem:[#allocation8 + $0xb4] ss:$8 sps:$4 sm:$0xff]  }
 0x1df   : > { %v2056_v0 = vmax.f32 %v5157_v61, 0.0  ;;  %v775_v1 = vmax.f32 %v734_v62, 0.0  ;;  %v2013_v2 = vpop.f32.mrb[31].mxu0  ;;  %1141 = vmatpush1.bf16.msra.mxu1 %v791_v47  ;;  %v5420_v45 = vld [vmem:[#allocation8 + $0xb0] ss:$8 sps:$4 sm:$0xff]  }
 0x1e0   : > { %v793_v3 = vpack.c.bf16 %v777_v60, %v776_v58  ;;  %v2054_v4 = vmax.f32 %v2013_v2, 0.0  ;;  %2100 = vmatpush1.bf16.msra.mxu0 %v2070_v49  ;;  %1142 = vmatprep.subr.bf16.mxu1 %v5804_v32  ;;  %v5423_v47 = vld [vmem:[#allocation8 + $0xc0] ss:$8 sps:$4 sm:$0xff]   ;;  %v5426_v48 = vld [vmem:[#allocation8 + $0xd4] ss:$8 sps:$4 sm:$0xff]  }
 0x1e1   : > { %v2072_v5 = vpack.c.bf16 %v2056_v0, %v2055_v55  ;;  %v792_v6 = vpack.c.bf16 %v775_v1, %v774_v63  ;;  %2101 = vmatprep.subr.bf16.mxu0 %v5804_v32  ;;  %v5480_v49 = vld [vmem:[%s6083_s10 + $0xb8] sm:$0xff]   ;;  %v5429_v52 = vld [vmem:[#allocation8 + $0xe4] ss:$8 sps:$4 sm:$0xff]   ;;  %v5431_v53 = vld [vmem:[#allocation8 + $0xe0] ss:$8 sps:$4 sm:$0xff]  }
 0x1e2   : > { %v2071_v7 = vpack.c.bf16 %v2054_v4, %v2053_v59  ;;  %v5481_v50 = vld [vmem:[%s6083_s10 + $0xf8] sm:$0xff]   ;;  %v5435_v56 = vld [vmem:[#allocation8 + $0x104] ss:$8 sps:$4 sm:$0xff]   ;;  %v5437_v57 = vld [vmem:[#allocation8 + $0x100] ss:$8 sps:$4 sm:$0xff]  }
 0x1e3   : > { %1143 = vmatpush1.bf16.msra.mxu1 %v792_v6  ;;  %v5428_v51 = vld [vmem:[#allocation8 + $0xd0] ss:$8 sps:$4 sm:$0xff]   ;;  %v5432_v54 = vld [vmem:[#allocation8 + $0xf4] ss:$8 sps:$4 sm:$0xff]   ;;  %v5443_v60 = vld [vmem:[#allocation8 + $0x124] ss:$8 sps:$4 sm:$0xff]  }
 0x1e4   : > { %2102 = vmatpush1.bf16.msra.mxu0 %v2071_v7  ;;  %1144 = vmatprep.subr.bf16.mxu1 %v5804_v32  ;;  %v5434_v55 = vld [vmem:[#allocation8 + $0xf0] ss:$8 sps:$4 sm:$0xff]   ;;  %v5440_v58 = vld [vmem:[#allocation8 + $0x114] ss:$8 sps:$4 sm:$0xff]   ;;  %v5445_v61 = vld [vmem:[#allocation8 + $0x120] ss:$8 sps:$4 sm:$0xff]  }
 0x1e5   : > { %2103 = vmatprep.subr.bf16.mxu0 %v5804_v32  ;;  %v5442_v59 = vld [vmem:[#allocation8 + $0x110] ss:$8 sps:$4 sm:$0xff]   ;;  %v5446_v62 = vld [vmem:[#allocation8 + $0x134] ss:$8 sps:$4 sm:$0xff]   ;;  %v5449_v0 = vld [vmem:[#allocation8 + $0x144] ss:$8 sps:$4 sm:$0xff]  }
 0x1e6   : > { %v5448_v63 = vld [vmem:[#allocation8 + $0x130] ss:$8 sps:$4 sm:$0xff]   ;;  %v5451_v1 = vld [vmem:[#allocation8 + $0x140] ss:$8 sps:$4 sm:$0xff]   ;;  %v5454_v2 = vld [vmem:[#allocation8 + $0x154] ss:$8 sps:$4 sm:$0xff]  }
 0x1e7   : > { %1145 = vmatpush1.bf16.msra.mxu1 %v793_v3  ;;  %v5456_v3 = vld [vmem:[#allocation8 + $0x150] ss:$8 sps:$4 sm:$0xff]   ;;  %v5457_v4 = vld [vmem:[#allocation8 + $0x164] ss:$8 sps:$4 sm:$0xff]   ;;  %v5460_v6 = vld [vmem:[#allocation8 + $0x174] ss:$8 sps:$4 sm:$0xff]  }
 0x1e8   : > { %2104 = vmatpush1.bf16.msra.mxu0 %v2072_v5  ;;  %5158 = vmatprep.subr.bf16.mxu1 %v5382_v8  ;;  %v5459_v5 = vld [vmem:[#allocation8 + $0x160] ss:$8 sps:$4 sm:$0xff]   ;;  %v5462_v7 = vld [vmem:[#allocation8 + $0x170] ss:$8 sps:$4 sm:$0xff]  }
 0x1e9   : > { %5206 = vmatprep.subr.bf16.mxu0 %v5383_v9 }
 0x1ea   : > { %1147 = vmatmul.mubr.bf16.vlgmr.msra.gmra.mrb[32].mxu1 %v5379_v10 }
 0x1eb   : > { %2106 = vmatmul.mubr.bf16.vlgmr.msra.gmra.mrb[32].mxu0 %v5379_v10  ;;  %5159 = vmatpush3.bf16.msra.mxu1 %v5382_v8  ;;  %v5463_v8 = vld [vmem:[#allocation8 + $0x184] ss:$8 sps:$4 sm:$0xff]   ;;  %v5468_v10 = vld [vmem:[#allocation8 + $0x194] ss:$8 sps:$4 sm:$0xff]  }
 0x1ec   : > { %5207 = vmatpush3.bf16.msra.mxu0 %v5383_v9  ;;  %1154 = vmatprep.mubr.bf16.mxu1 %v5384_v11  ;;  %v5465_v9 = vld [vmem:[#allocation8 + $0x180] ss:$8 sps:$4 sm:$0xff]  }
 0x1ed   : > { %2113 = vmatprep.mubr.bf16.mxu0 %v5384_v11  ;;  %5160 = vmatprep.subr.bf16.mxu1 %v5396_v12  ;;  %v5470_v11 = vld [vmem:[#allocation8 + $0x190] ss:$8 sps:$4 sm:$0xff]  }
 0x1ee   : > { %5208 = vmatprep.subr.bf16.mxu0 %v5397_v13 }
 0x1ef   : > { %5161 = vmatpush3.bf16.msra.mxu1 %v5396_v12  ;;  %v5471_v12 = vld [vmem:[#allocation8 + $0x1a4] ss:$8 sps:$4 sm:$0xff]  }
 0x1f0   : > { %5209 = vmatpush3.bf16.msra.mxu0 %v5397_v13  ;;  %5162 = vmatprep.subr.bf16.mxu1 %v5410_v14  ;;  %v5473_v13 = vld [vmem:[#allocation8 + $0x1a0] ss:$8 sps:$4 sm:$0xff]  }
 0x1f1   : > { %5210 = vmatprep.subr.bf16.mxu0 %v5411_v15 }
 0x1f2   : > { %1155 = vmatmul.mubr.bf16.gmra.mrb[36].mxu1 %v5386_v16 }
 0x1f3   : > { %2114 = vmatmul.mubr.bf16.gmra.mrb[36].mxu0 %v5386_v16  ;;  %1162 = vmatprep.mubr.bf16.mxu1 %v5387_v17  ;;  %v1497_v16 = vlaneseq }
 0x1f4   : > { %2121 = vmatprep.mubr.bf16.mxu0 %v5387_v17  ;;  %5163 = vmatpush3.bf16.msra.mxu1 %v5410_v14  ;;  %v5805_v14 = vmov 1966171168   ;;  %v5474_v17 = vld [vmem:[#allocation8 + $0x1b4] ss:$8 sps:$4 sm:$0xff]  }
 0x1f5   : > { %5211 = vmatpush3.bf16.msra.mxu0 %v5411_v15  ;;  %5164 = vmatprep.subr.bf16.mxu1 %v5424_v18  ;;  %v1495_v15 = vunpack.c.l.s4 %v5805_v14 }
 0x1f6   : > { %5212 = vmatprep.subr.bf16.mxu0 %v5425_v19 }
 0x1f8   : > { %5165 = vmatpush3.bf16.msra.mxu1 %v5424_v18  ;;  %v1496_v18 = vunpack.c.0.s8 %v1495_v15 }
 0x1f9   : > { %5213 = vmatpush3.bf16.msra.mxu0 %v5425_v19  ;;  %5166 = vmatprep.subr.bf16.mxu1 %v5438_v20  ;;  %v1498_v19 = vshrl.u32 %v1497_v16, 7 }
 0x1fa   : > { %1163 = vmatmul.mubr.bf16.gmra.mrb[40].mxu1 %v5389_v21  ;;  %5214 = vmatprep.subr.bf16.mxu0 %v5439_v22 }
 0x1fb   : > { %2122 = vmatmul.mubr.bf16.gmra.mrb[40].mxu0 %v5389_v21  ;;  %1170 = vmatprep.mubr.bf16.mxu1 %v5390_v23  ;;  %v6179_v21 = vld [vmem:[%s6093_s28 + $0x8] sm:$0xff]  }
 0x1fc   : > { %2129 = vmatprep.mubr.bf16.mxu0 %v5390_v23  ;;  %5167 = vmatpush3.bf16.msra.mxu1 %v5438_v20  ;;  %v6176_v20 = vld [vmem:[%s6093_s28] sm:$0xff]  }
 0x1fd   : > { %5215 = vmatpush3.bf16.msra.mxu0 %v5439_v22  ;;  %5168 = vmatprep.subr.bf16.mxu1 %v5452_v28  ;;  %v6182_v23 = vunpack.c.l.bf16 %v6176_v20 }
 0x1fe   : > { %5216 = vmatprep.subr.bf16.mxu0 %v5453_v29 }
 0x200   : > { %5169 = vmatpush3.bf16.msra.mxu1 %v5452_v28  ;;  %v6187_v28 = vunpack.c.l.bf16 %v6179_v21 }
 0x201   : > { %5217 = vmatpush3.bf16.msra.mxu0 %v5453_v29  ;;  %5170 = vmatprep.subr.bf16.mxu1 %v5466_v39 }
 0x202   : > { %1171 = vmatmul.mubr.bf16.gmra.mrb[44].mxu1 %v5392_v24  ;;  %5218 = vmatprep.subr.bf16.mxu0 %v5467_v40 }
 0x203   : > { %2130 = vmatmul.mubr.bf16.gmra.mrb[44].mxu0 %v5392_v24  ;;  %1178 = vmatprep.mubr.bf16.mxu1 %v5393_v25  ;;  %v6184_v24 = vsub.s32 %v1496_v18, %v1498_v19 }
 0x204   : > { %2137 = vmatprep.mubr.bf16.mxu0 %v5393_v25  ;;  %5171 = vmatpush3.bf16.msra.mxu1 %v5466_v39  ;;  %v6193_v39 = vpop.permute.xlu0 %1409 }
 0x205   : > { %5219 = vmatpush3.bf16.msra.mxu0 %v5467_v40  ;;  %5172 = vmatprep.subr.bf16.mxu1 %v5480_v49 }
 0x206   : > { %5220 = vmatprep.subr.bf16.mxu0 %v5481_v50 }
 0x208   : > { %5173 = vmatpush3.bf16.msra.mxu1 %v5480_v49  ;;  %v6198_v49 = vsub.s32 0, %v1498_v19 }
 0x209   : > { %5221 = vmatpush3.bf16.msra.mxu0 %v5481_v50  ;;  %3013 = vmatprep.subr.bf16.mxu1 %v5804_v32 }
 0x20a   : > { %1179 = vmatmul.mubr.bf16.gmra.mrb[48].mxu1 %v5395_v26  ;;  %3953 = vmatprep.subr.bf16.mxu0 %v5804_v32 }
 0x20b   : > { %2138 = vmatmul.mubr.bf16.gmra.mrb[48].mxu0 %v5395_v26  ;;  %1186 = vmatprep.mubr.bf16.mxu1 %v5398_v27 }
 0x20c   : > { %2145 = vmatprep.mubr.bf16.mxu0 %v5398_v27  ;;  %v5476_v27 = vld [vmem:[#allocation8 + $0x1b0] ss:$8 sps:$4 sm:$0xff]  }
 0x212   : > { %1187 = vmatmul.mubr.bf16.gmra.mrb[52].mxu1 %v5400_v30 }
 0x213   : > { %2146 = vmatmul.mubr.bf16.gmra.mrb[52].mxu0 %v5400_v30  ;;  %1194 = vmatprep.mubr.bf16.mxu1 %v5401_v31 }
 0x214   : > { %2153 = vmatprep.mubr.bf16.mxu0 %v5401_v31  ;;  %v5477_v31 = vld [vmem:[#allocation8 + $0x1c4] ss:$8 sps:$4 sm:$0xff]  }
 0x21a   : > { %1195 = vmatmul.mubr.bf16.gmra.mrb[56].mxu1 %v5403_v33 }
 0x21b   : > { %2154 = vmatmul.mubr.bf16.gmra.mrb[56].mxu0 %v5403_v33  ;;  %1202 = vmatprep.mubr.bf16.mxu1 %v5404_v34 }
 0x21c   : > { %2161 = vmatprep.mubr.bf16.mxu0 %v5404_v34 }
 0x222   : > { %1203 = vmatmul.mubr.bf16.gmra.mrb[60].mxu1 %v5406_v35 }
 0x223   : > { %2162 = vmatmul.mubr.bf16.gmra.mrb[60].mxu0 %v5406_v35  ;;  %1210 = vmatprep.mubr.bf16.mxu1 %v5407_v36 }
 0x224   : > { %2169 = vmatprep.mubr.bf16.mxu0 %v5407_v36  ;;  %v1500_v36 = vrot.slane %v6182_v23, %v6184_v24 }
 0x22a   : > { %1211 = vmatmul.mubr.bf16.gmra.mrb[64].mxu1 %v5409_v37 }
 0x22b   : > { %2170 = vmatmul.mubr.bf16.gmra.mrb[64].mxu0 %v5409_v37  ;;  %1218 = vmatprep.mubr.bf16.mxu1 %v5412_v38  ;;  %v2440_v37 = vrot.slane %v6187_v28, %v6184_v24 }
 0x22c   : > { %2177 = vmatprep.mubr.bf16.mxu0 %v5412_v38  ;;  %v1508_v38 = vcombine.high %v1500_v36, %v1500_v36 }
 0x232   : > { %1219 = vmatmul.mubr.bf16.gmra.mrb[68].mxu1 %v5414_v41 }
 0x233   : > { %2178 = vmatmul.mubr.bf16.gmra.mrb[68].mxu0 %v5414_v41  ;;  %1226 = vmatprep.mubr.bf16.mxu1 %v5415_v42  ;;  %v2448_v41 = vcombine.high %v2440_v37, %v2440_v37 }
 0x234   : > { %2185 = vmatprep.mubr.bf16.mxu0 %v5415_v42 }
 0x23a   : > { %1227 = vmatmul.mubr.bf16.gmra.mrb[72].mxu1 %v5417_v43 }
 0x23b   : > { %2186 = vmatmul.mubr.bf16.gmra.mrb[72].mxu0 %v5417_v43  ;;  %1234 = vmatprep.mubr.bf16.mxu1 %v5418_v44 }
 0x23c   : > { %2193 = vmatprep.mubr.bf16.mxu0 %v5418_v44  ;;  %v5479_v44 = vld [vmem:[#allocation8 + $0x1c0] ss:$8 sps:$4 sm:$0xff]  }
 0x242   : > { %1235 = vmatmul.mubr.bf16.gmra.mrb[76].mxu1 %v5420_v45 }
 0x243   : > { %2194 = vmatmul.mubr.bf16.gmra.mrb[76].mxu0 %v5420_v45  ;;  %1242 = vmatprep.mubr.bf16.mxu1 %v5421_v46 }
 0x244   : > { %2201 = vmatprep.mubr.bf16.mxu0 %v5421_v46 }
 0x24a   : > { %1243 = vmatmul.mubr.bf16.gmra.mrb[80].mxu1 %v5423_v47 }
 0x24b   : > { %2202 = vmatmul.mubr.bf16.gmra.mrb[80].mxu0 %v5423_v47  ;;  %1250 = vmatprep.mubr.bf16.mxu1 %v5426_v48  ;;  %v5482_v47 = vld [vmem:[#allocation8 + $0x1d4] ss:$8 sps:$4 sm:$0xff]  }
 0x24c   : > { %2209 = vmatprep.mubr.bf16.mxu0 %v5426_v48  ;;  %v6196_v48 = vrot.slane %v1500_v36, %v6184_v24 }
 0x252   : > { %1251 = vmatmul.mubr.bf16.gmra.mrb[84].mxu1 %v5428_v51 }
 0x253   : > { %2210 = vmatmul.mubr.bf16.gmra.mrb[84].mxu0 %v5428_v51  ;;  %1258 = vmatprep.mubr.bf16.mxu1 %v5429_v52 }
 0x254   : > { %2217 = vmatprep.mubr.bf16.mxu0 %v5429_v52  ;;  %v6201_v52 = vrot.slane %v1508_v38, %v6184_v24 }
 0x25a   : > { %1259 = vmatmul.mubr.bf16.gmra.mrb[88].mxu1 %v5431_v53 }
 0x25b   : > { %2218 = vmatmul.mubr.bf16.gmra.mrb[88].mxu0 %v5431_v53  ;;  %1266 = vmatprep.mubr.bf16.mxu1 %v5432_v54  ;;  %v6204_v53 = vrot.slane %v2440_v37, %v6184_v24 }
 0x25c   : > { %2225 = vmatprep.mubr.bf16.mxu0 %v5432_v54 }
 0x262   : > { %1267 = vmatmul.mubr.bf16.gmra.mrb[92].mxu1 %v5434_v55 }
 0x263   : > { %2226 = vmatmul.mubr.bf16.gmra.mrb[92].mxu0 %v5434_v55  ;;  %1274 = vmatprep.mubr.bf16.mxu1 %v5435_v56  ;;  %v6207_v55 = vrot.slane %v2448_v41, %v6184_v24 }
 0x264   : > { %2233 = vmatprep.mubr.bf16.mxu0 %v5435_v56  ;;  %v6209_v56 = vpop.permute.xlu0 %1414 }
 0x26a   : > { %1275 = vmatmul.mubr.bf16.gmra.mrb[96].mxu1 %v5437_v57 }
 0x26b   : > { %2234 = vmatmul.mubr.bf16.gmra.mrb[96].mxu0 %v5437_v57  ;;  %1282 = vmatprep.mubr.bf16.mxu1 %v5440_v58 }
 0x26c   : > { %2241 = vmatprep.mubr.bf16.mxu0 %v5440_v58  ;;  %v6214_v58 = vrot.slane %v6196_v48, %v6198_v49 }
 0x272   : > { %1283 = vmatmul.mubr.bf16.gmra.mrb[100].mxu1 %v5442_v59 }
 0x273   : > { %2242 = vmatmul.mubr.bf16.gmra.mrb[100].mxu0 %v5442_v59  ;;  %1290 = vmatprep.mubr.bf16.mxu1 %v5443_v60  ;;  %v6218_v59 = vrot.slane %v6201_v52, %v6198_v49 }
 0x274   : > { %2249 = vmatprep.mubr.bf16.mxu0 %v5443_v60 }
 0x27a   : > { %1291 = vmatmul.mubr.bf16.gmra.mrb[104].mxu1 %v5445_v61 }
 0x27b   : > { %2250 = vmatmul.mubr.bf16.gmra.mrb[104].mxu0 %v5445_v61  ;;  %1298 = vmatprep.mubr.bf16.mxu1 %v5446_v62  ;;  %v6223_v61 = vrot.slane %v6204_v53, %v6198_v49 }
 0x27c   : > { %2257 = vmatprep.mubr.bf16.mxu0 %v5446_v62  ;;  %v6225_v62 = vpop.permute.xlu1 %1419 }
 0x282   : > { %1299 = vmatmul.mubr.bf16.gmra.mrb[108].mxu1 %v5448_v63 }
 0x283   : > { %2258 = vmatmul.mubr.bf16.gmra.mrb[108].mxu0 %v5448_v63  ;;  %1306 = vmatprep.mubr.bf16.mxu1 %v5449_v0 }
 0x284   : > { %2265 = vmatprep.mubr.bf16.mxu0 %v5449_v0  ;;  %v6229_v0 = vrot.slane %v6207_v55, %v6198_v49 }
 0x28a   : > { %1307 = vmatmul.mubr.bf16.gmra.mrb[112].mxu1 %v5451_v1 }
 0x28b   : > { %2266 = vmatmul.mubr.bf16.gmra.mrb[112].mxu0 %v5451_v1  ;;  %1314 = vmatprep.mubr.bf16.mxu1 %v5454_v2 }
 0x28c   : > { %2273 = vmatprep.mubr.bf16.mxu0 %v5454_v2 }
 0x292   : > { %1315 = vmatmul.mubr.bf16.gmra.mrb[116].mxu1 %v5456_v3 }
 0x293   : > { %2274 = vmatmul.mubr.bf16.gmra.mrb[116].mxu0 %v5456_v3  ;;  %1322 = vmatprep.mubr.bf16.mxu1 %v5457_v4 }
 0x294   : > { %2281 = vmatprep.mubr.bf16.mxu0 %v5457_v4 }
 0x29a   : > { %1323 = vmatmul.mubr.bf16.gmra.mrb[120].mxu1 %v5459_v5 }
 0x29b   : > { %2282 = vmatmul.mubr.bf16.gmra.mrb[120].mxu0 %v5459_v5  ;;  %1330 = vmatprep.mubr.bf16.mxu1 %v5460_v6  ;;  %v5484_v5 = vld [vmem:[#allocation8 + $0x1d0] ss:$8 sps:$4 sm:$0xff]  }
 0x29c   : > { %2289 = vmatprep.mubr.bf16.mxu0 %v5460_v6 }
 0x2a2   : > { %1331 = vmatmul.mubr.bf16.gmra.mrb[124].mxu1 %v5462_v7 }
 0x2a3   : > { %2290 = vmatmul.mubr.bf16.gmra.mrb[124].mxu0 %v5462_v7  ;;  %1338 = vmatprep.mubr.bf16.mxu1 %v5463_v8 }
 0x2a4   : > { %2297 = vmatprep.mubr.bf16.mxu0 %v5463_v8 }
 0x2aa   : > { %1339 = vmatmul.mubr.bf16.gmra.mrb[128].mxu1 %v5465_v9 }
 0x2ab   : > { %2298 = vmatmul.mubr.bf16.gmra.mrb[128].mxu0 %v5465_v9  ;;  %1346 = vmatprep.mubr.bf16.mxu1 %v5468_v10 }
 0x2ac   : > { %2305 = vmatprep.mubr.bf16.mxu0 %v5468_v10  ;;  %v5485_v10 = vld [vmem:[#allocation8 + $0x1e4] ss:$8 sps:$4 sm:$0xff]  }
 0x2b2   : > { %1347 = vmatmul.mubr.bf16.gmra.mrb[132].mxu1 %v5470_v11 }
 0x2b3   : > { %2306 = vmatmul.mubr.bf16.gmra.mrb[132].mxu0 %v5470_v11  ;;  %1354 = vmatprep.mubr.bf16.mxu1 %v5471_v12 }
 0x2b4   : > { %2313 = vmatprep.mubr.bf16.mxu0 %v5471_v12 }
 0x2ba   : > { %1355 = vmatmul.mubr.bf16.gmra.mrb[136].mxu1 %v5473_v13 }
 0x2bb   : > { %2314 = vmatmul.mubr.bf16.gmra.mrb[136].mxu0 %v5473_v13  ;;  %1362 = vmatprep.mubr.bf16.mxu1 %v5474_v17 }
 0x2bc   : > { %2321 = vmatprep.mubr.bf16.mxu0 %v5474_v17 }
 0x2bd   : > { %v1148_v22 = vpop.f32.mrb[32].mxu1 }
 0x2be   : > { %v2107_v25 = vpop.f32.mrb[32].mxu0  ;;  %v1150_v26 = vpop.f32.mrb[33].mxu1  ;;  %v1427_v57 = vadd.f32 %v6193_v39, %v1148_v22 }
 0x2bf   : > { %v2109_v29 = vpop.f32.mrb[33].mxu0  ;;  %v1151_v30 = vpop.f32.mrb[34].mxu1  ;;  %v2367_v60 = vadd.f32 %v2107_v25, %v6193_v39 }
 0x2c0   : > { %v2110_v33 = vpop.f32.mrb[34].mxu0  ;;  %v1153_v34 = vpop.f32.mrb[35].mxu1  ;;  %v1428_v1 = vadd.f32 %v6209_v56, %v1151_v30  ;;  %v6236_v11 = vmul.f32 %v6214_v58, %v1427_v57  ;;  %v5488_v57 = vld [vmem:[#allocation8 + $0x1f4] ss:$8 sps:$4 sm:$0xff]  }
 0x2c1   : > { %v2112_v35 = vpop.f32.mrb[35].mxu0  ;;  %v2368_v6 = vadd.f32 %v2110_v33, %v6209_v56  ;;  %v6243_v16 = vmul.f32 %v6223_v61, %v2367_v60  ;;  %v6260_v29 = vpop.permute.xlu1 %1424 }
 0x2c2   : > { %1363 = vmatmul.mubr.bf16.gmra.mrb[140].mxu1 %v5476_v27  ;;  %v6250_v22 = vmul.f32 %v6214_v58, %v1428_v1 }
 0x2c3   : > { %2322 = vmatmul.mubr.bf16.gmra.mrb[140].mxu0 %v5476_v27  ;;  %1370 = vmatprep.mubr.bf16.mxu1 %v5477_v31  ;;  %v6258_v27 = vmul.f32 %v6223_v61, %v2368_v6  ;;  %v2478_v6 = vcombine.high %v6204_v53, %v6204_v53 }
 0x2c4   : > { %2329 = vmatprep.mubr.bf16.mxu0 %v5477_v31 }
 0x2c5   : > { %v1156_v40 = vpop.f32.mrb[36].mxu1 }
 0x2c6   : > { %v2115_v42 = vpop.f32.mrb[36].mxu0  ;;  %v1158_v43 = vpop.f32.mrb[37].mxu1  ;;  %v1429_v33 = vadd.f32 %v6225_v62, %v1156_v40 }
 0x2c7   : > { %v2117_v45 = vpop.f32.mrb[37].mxu0  ;;  %v1159_v46 = vpop.f32.mrb[38].mxu1  ;;  %v2369_v35 = vadd.f32 %v2115_v42, %v6225_v62 }
 0x2c8   : > { %v2118_v50 = vpop.f32.mrb[38].mxu0  ;;  %v1161_v51 = vpop.f32.mrb[39].mxu1  ;;  %v1430_v38 = vadd.f32 %v6260_v29, %v1159_v46  ;;  %v5487_v45 = vld [vmem:[#allocation8 + $0x1e0] ss:$8 sps:$4 sm:$0xff]   ;;  %v6278_v42 = vmul.f32 %v6214_v58, %v1429_v33 }
 0x2c9   : > { %v2120_v54 = vpop.f32.mrb[39].mxu0 }
 0x2ca   : > { %1371 = vmatmul.mubr.bf16.gmra.mrb[144].mxu1 %v5479_v44 }
 0x2cb   : > { %2330 = vmatmul.mubr.bf16.gmra.mrb[144].mxu0 %v5479_v44  ;;  %1378 = vmatprep.mubr.bf16.mxu1 %v5482_v47 }
 0x2cc   : > { %2337 = vmatprep.mubr.bf16.mxu0 %v5482_v47  ;;  %v2370_v47 = vadd.f32 %v2118_v50, %v6260_v29  ;;  %v6287_v50 = vmul.f32 %v6223_v61, %v2369_v35 }
 0x2cd   : > { %v1164_v63 = vpop.f32.mrb[40].mxu1 }
 0x2ce   : > { %v1431_v2 = vadd.f32 %v6193_v39, %v1164_v63  ;;  %v2123_v3 = vpop.f32.mrb[40].mxu0  ;;  %v1166_v4 = vpop.f32.mrb[41].mxu1 }
 0x2cf   : > { %v2371_v7 = vadd.f32 %v2123_v3, %v6193_v39  ;;  %v2125_v8 = vpop.f32.mrb[41].mxu0  ;;  %v1167_v9 = vpop.f32.mrb[42].mxu1 }
 0x2d0   : > { %v6239_v12 = vmul.f32 %v6218_v59, %v1431_v2  ;;  %v1432_v13 = vadd.f32 %v6209_v56, %v1167_v9  ;;  %v2126_v14 = vpop.f32.mrb[42].mxu0  ;;  %v1169_v15 = vpop.f32.mrb[43].mxu1  ;;  %v1538_v2 = vcombine.high %v6196_v48, %v6196_v48  ;;  %v6304_v9 = vmul.f32 %v6223_v61, %v2370_v47 }
 0x2d1   : > { %v6246_v17 = vmul.f32 %v6229_v0, %v2371_v7  ;;  %v2372_v18 = vadd.f32 %v2126_v14, %v6209_v56  ;;  %v2128_v19 = vpop.f32.mrb[43].mxu0  ;;  %v6296_v7 = vmul.f32 %v6214_v58, %v1430_v38  ;;  %v2542_v61 = vrot.slane %v2478_v6, %v6198_v49  ;;  %v5492_v6 = vld [vmem:[#allocation7 + $0x8] sm:$0xff]  }
 0x2d2   : > { %v1735_v25 = vmax.f32 %v6236_v11, %v6239_v12  ;;  %v6255_v26 = vmul.f32 %v6218_v59, %v1432_v13  ;;  %1379 = vmatmul.mubr.bf16.gmra.mrb[148].mxu1 %v5484_v5  ;;  %v1602_v58 = vrot.slane %v1538_v2, %v6198_v49 }
 0x2d3   : > { %v2675_v30 = vmax.f32 %v6243_v16, %v6246_v17  ;;  %v6265_v31 = vmul.f32 %v6229_v0, %v2372_v18  ;;  %2338 = vmatmul.mubr.bf16.gmra.mrb[148].mxu0 %v5484_v5  ;;  %1386 = vmatprep.mubr.bf16.mxu1 %v5485_v10 }
 0x2d4   : > { %v1750_v34 = vmax.f32 %v6250_v22, %v6255_v26  ;;  %2345 = vmatprep.mubr.bf16.mxu0 %v5485_v10  ;;  %v1540_v22 = vcombine.high %v6201_v52, %v6201_v52 }
 0x2d5   : > { %v2690_v36 = vmax.f32 %v6258_v27, %v6265_v31  ;;  %v1172_v37 = vpop.f32.mrb[44].mxu1 }
 0x2d6   : > { %v1433_v41 = vadd.f32 %v6225_v62, %v1172_v37  ;;  %v2131_v43 = vpop.f32.mrb[44].mxu0  ;;  %v1174_v44 = vpop.f32.mrb[45].mxu1  ;;  %v1606_v52 = vrot.slane %v1540_v22, %v6198_v49 }
 0x2d7   : > { %v2373_v40 = vadd.f32 %v2131_v43, %v6225_v62  ;;  %v2133_v51 = vpop.f32.mrb[45].mxu0  ;;  %v1175_v54 = vpop.f32.mrb[46].mxu1 }
 0x2d8   : > { %v6281_v60 = vmul.f32 %v6218_v59, %v1433_v41  ;;  %v1434_v46 = vadd.f32 %v6260_v29, %v1175_v54  ;;  %v2134_v63 = vpop.f32.mrb[46].mxu0  ;;  %v1177_v1 = vpop.f32.mrb[47].mxu1 }
 0x2d9   : > { %v6290_v3 = vmul.f32 %v6229_v0, %v2373_v40  ;;  %v2374_v4 = vadd.f32 %v2134_v63, %v6260_v29  ;;  %v2136_v5 = vpop.f32.mrb[47].mxu0 }
 0x2da   : > { %v1765_v8 = vmax.f32 %v6278_v42, %v6281_v60  ;;  %v6301_v48 = vmul.f32 %v6218_v59, %v1434_v46  ;;  %1387 = vmatmul.mubr.bf16.gmra.mrb[152].mxu1 %v5487_v45 }
 0x2db   : > { %v2705_v10 = vmax.f32 %v6287_v50, %v6290_v3  ;;  %v6309_v13 = vmul.f32 %v6229_v0, %v2374_v4  ;;  %2346 = vmatmul.mubr.bf16.gmra.mrb[152].mxu0 %v5487_v45  ;;  %1394 = vmatprep.mubr.bf16.mxu1 %v5488_v57  ;;  %v5490_v0 = vld [vmem:[#allocation8 + $0x1f0] ss:$8 sps:$4 sm:$0xff]   ;;  %v2480_v3 = vcombine.high %v6207_v55, %v6207_v55 }
 0x2dc   : > { %v1780_v53 = vmax.f32 %v6296_v7, %v6301_v48  ;;  %2353 = vmatprep.mubr.bf16.mxu0 %v5488_v57  ;;  %v5491_v57 = vld [vmem:[#allocation7] sm:$0xff]  }
 0x2dd   : > { %v2720_v59 = vmax.f32 %v6304_v9, %v6309_v13  ;;  %v1180_v14 = vpop.f32.mrb[48].mxu1  ;;  %v5493_v9 = vld [vmem:[#allocation7 + $0x10] sm:$0xff]   ;;  %v2546_v55 = vrot.slane %v2480_v3, %v6198_v49 }
 0x2de   : > { %v1435_v15 = vadd.f32 %v6193_v39, %v1180_v14  ;;  %v2139_v18 = vpop.f32.mrb[48].mxu0  ;;  %v1182_v19 = vpop.f32.mrb[49].mxu1 }
 0x2df   : > { %v2375_v27 = vadd.f32 %v2139_v18, %v6193_v39  ;;  %v2141_v31 = vpop.f32.mrb[49].mxu0  ;;  %v1183_v33 = vpop.f32.mrb[50].mxu1 }
 0x2e0   : > { %v1679_v35 = vmul.f32 %v1602_v58, %v1435_v15  ;;  %v1436_v37 = vadd.f32 %v6209_v56, %v1183_v33  ;;  %v2142_v38 = vpop.f32.mrb[50].mxu0  ;;  %v1185_v41 = vpop.f32.mrb[51].mxu1 }
 0x2e1   : > { %v2619_v43 = vmul.f32 %v2542_v61, %v2375_v27  ;;  %v2376_v44 = vadd.f32 %v2142_v38, %v6209_v56  ;;  %v2144_v45 = vpop.f32.mrb[51].mxu0  ;;  %v2433_v38 = vcombine.high %v6187_v28, %v6187_v28 }
 0x2e2   : > { %v6324_v47 = vmax.f32 %v1735_v25, %v1679_v35  ;;  %v1680_v40 = vmul.f32 %v1602_v58, %v1436_v37  ;;  %1395 = vmatmul.mubr.bf16.gmra.mrb[156].mxu1 %v5490_v0 }
 0x2e3   : > { %v6329_v51 = vmax.f32 %v2675_v30, %v2619_v43  ;;  %v2620_v54 = vmul.f32 %v2542_v61, %v2376_v44  ;;  %2354 = vmatmul.mubr.bf16.gmra.mrb[156].mxu0 %v5490_v0  ;;  %5174 = vmatprep.mubr.bf16.mxu1 %v5491_v57  ;;  %v5494_v43 = vld [vmem:[#allocation7 + $0x18] sm:$0xff]  }
 0x2e4   : > { %v6334_v42 = vmax.f32 %v1750_v34, %v1680_v40  ;;  %5222 = vmatprep.mubr.bf16.mxu0 %v5491_v57  ;;  %v5495_v40 = vld [vmem:[#allocation7 + $0x20] sm:$0xff]  }
 0x2e5   : > { %v6336_v11 = vmax.f32 %v2690_v36, %v2620_v54  ;;  %v1188_v12 = vpop.f32.mrb[52].mxu1 }
 0x2e6   : > { %v1437_v25 = vadd.f32 %v6225_v62, %v1188_v12  ;;  %v2147_v60 = vpop.f32.mrb[52].mxu0  ;;  %v1190_v46 = vpop.f32.mrb[53].mxu1  ;;  %v6382_v12 = vrot.slane %v2433_v38, %v6184_v24 }
 0x2e7   : > { %v2377_v16 = vadd.f32 %v2147_v60, %v6225_v62  ;;  %v2149_v17 = vpop.f32.mrb[53].mxu0  ;;  %v1191_v30 = vpop.f32.mrb[54].mxu1 }
 0x2e8   : > { %v1681_v63 = vmul.f32 %v1602_v58, %v1437_v25  ;;  %v1438_v1 = vadd.f32 %v6260_v29, %v1191_v30  ;;  %v2150_v2 = vpop.f32.mrb[54].mxu0  ;;  %v1193_v50 = vpop.f32.mrb[55].mxu1 }
 0x2e9   : > { %v2621_v26 = vmul.f32 %v2542_v61, %v2377_v16  ;;  %v2378_v34 = vadd.f32 %v2150_v2, %v6260_v29  ;;  %v2152_v36 = vpop.f32.mrb[55].mxu0 }
 0x2ea   : > { %v6346_v4 = vmax.f32 %v1765_v8, %v1681_v63  ;;  %v1682_v5 = vmul.f32 %v1602_v58, %v1438_v1  ;;  %5175 = vmatmul.mubr.bf16.vlgmr.msra.gmra.mrb[160].mxu1 %v5492_v6  ;;  %v5496_v36 = vld [vmem:[#allocation7 + $0x28] sm:$0xff]  }
 0x2eb   : > { %v6348_v7 = vmax.f32 %v2705_v10, %v2621_v26  ;;  %v2622_v48 = vmul.f32 %v2542_v61, %v2378_v34  ;;  %5223 = vmatmul.mubr.bf16.vlgmr.msra.gmra.mrb[160].mxu0 %v5492_v6  ;;  %5178 = vmatprep.mubr.bf16.mxu1 %v5493_v9  ;;  %v6400_v26 = vrot.slane %v6382_v12, %v6184_v24  ;;  %v5497_v6 = vld [vmem:[#allocation7 + $0x30] sm:$0xff]  }
 0x2ec   : > { %v6350_v13 = vmax.f32 %v1780_v53, %v1682_v5  ;;  %5226 = vmatprep.mubr.bf16.mxu0 %v5493_v9 }
 0x2ed   : > { %v6353_v14 = vmax.f32 %v2720_v59, %v2622_v48  ;;  %v1196_v15 = vpop.f32.mrb[56].mxu1  ;;  %v1493_v59 = vcombine.high %v6182_v23, %v6182_v23 }
 0x2ee   : > { %v1439_v8 = vadd.f32 %v6193_v39, %v1196_v15  ;;  %v2155_v58 = vpop.f32.mrb[56].mxu0  ;;  %v1198_v18 = vpop.f32.mrb[57].mxu1 }
 0x2ef   : > { %v2379_v10 = vadd.f32 %v2155_v58, %v6193_v39  ;;  %v2157_v61 = vpop.f32.mrb[57].mxu0  ;;  %v1199_v19 = vpop.f32.mrb[58].mxu1  ;;  %v6377_v54 = vrot.slane %v1493_v59, %v6184_v24 }
 0x2f0   : > { %v6358_v0 = vmul.f32 %v1606_v52, %v1439_v8  ;;  %v1440_v53 = vadd.f32 %v6209_v56, %v1199_v19  ;;  %v2158_v27 = vpop.f32.mrb[58].mxu0  ;;  %v1201_v31 = vpop.f32.mrb[59].mxu1  ;;  %v2550_v8 = vrot.slane %v6400_v26, %v6198_v49 }
 0x2f1   : > { %v6363_v33 = vmul.f32 %v2546_v55, %v2379_v10  ;;  %v2380_v35 = vadd.f32 %v2158_v27, %v6209_v56  ;;  %v2160_v37 = vpop.f32.mrb[59].mxu0  ;;  %v6393_v2 = vrot.slane %v6377_v54, %v6184_v24 }
 0x2f2   : > { %v6368_v41 = vmul.f32 %v1606_v52, %v1440_v53  ;;  %5179 = vmatmul.mubr.bf16.gmra.mrb[164].mxu1 %v5494_v43  ;;  %v1737_v44 = vmax.f32 %v6324_v47, %v6358_v0 }
 0x2f3   : > { %v6372_v45 = vmul.f32 %v2546_v55, %v2380_v35  ;;  %5227 = vmatmul.mubr.bf16.gmra.mrb[164].mxu0 %v5494_v43  ;;  %5182 = vmatprep.mubr.bf16.mxu1 %v5495_v40  ;;  %v2677_v23 = vmax.f32 %v6329_v51, %v6363_v33  ;;  %v1610_v9 = vrot.slane %v6393_v2, %v6198_v49  ;;  %v5498_v35 = vld [vmem:[#allocation7 + $0x38] sm:$0xff]  }
 0x2f4   : > { %5230 = vmatprep.mubr.bf16.mxu0 %v5495_v40  ;;  %v1752_v28 = vmax.f32 %v6334_v42, %v6368_v41  ;;  %v5499_v41 = vld [vmem:[#allocation7 + $0x40] sm:$0xff]  }
 0x2f5   : > { %v1204_v57 = vpop.f32.mrb[60].mxu1  ;;  %v2692_v47 = vmax.f32 %v6336_v11, %v6372_v45  ;;  %v1509_v45 = vcombine.high %v6377_v54, %v6377_v54 }
 0x2f6   : > { %v1441_v25 = vadd.f32 %v6225_v62, %v1204_v57  ;;  %v2163_v60 = vpop.f32.mrb[60].mxu0  ;;  %v1206_v46 = vpop.f32.mrb[61].mxu1 }
 0x2f7   : > { %v2381_v51 = vadd.f32 %v2163_v60, %v6225_v62  ;;  %v2165_v16 = vpop.f32.mrb[61].mxu0  ;;  %v1207_v17 = vpop.f32.mrb[62].mxu1  ;;  %v6438_v54 = vrot.slane %v1509_v45, %v6184_v24 }
 0x2f8   : > { %v6388_v30 = vmul.f32 %v1606_v52, %v1441_v25  ;;  %v1442_v63 = vadd.f32 %v6260_v29, %v1207_v17  ;;  %v2166_v42 = vpop.f32.mrb[62].mxu0  ;;  %v1209_v1 = vpop.f32.mrb[63].mxu1 }
 0x2f9   : > { %v6395_v50 = vmul.f32 %v2546_v55, %v2381_v51  ;;  %v2382_v11 = vadd.f32 %v2166_v42, %v6260_v29  ;;  %v2168_v22 = vpop.f32.mrb[63].mxu0 }
 0x2fa   : > { %v6402_v34 = vmul.f32 %v1606_v52, %v1442_v63  ;;  %5183 = vmatmul.mubr.bf16.gmra.mrb[168].mxu1 %v5496_v36  ;;  %v1767_v3 = vmax.f32 %v6346_v4, %v6388_v30  ;;  %v5500_v22 = vld [vmem:[#allocation7 + $0x48] sm:$0xff]  }
 0x2fb   : > { %v6406_v5 = vmul.f32 %v2546_v55, %v2382_v11  ;;  %5231 = vmatmul.mubr.bf16.gmra.mrb[168].mxu0 %v5496_v36  ;;  %5186 = vmatprep.mubr.bf16.mxu1 %v5497_v6  ;;  %v2707_v48 = vmax.f32 %v6348_v7, %v6395_v50 }
 0x2fc   : > { %5234 = vmatprep.mubr.bf16.mxu0 %v5497_v6  ;;  %v1782_v52 = vmax.f32 %v6350_v13, %v6402_v34 }
 0x2fd   : > { %v1212_v15 = vpop.f32.mrb[64].mxu1  ;;  %v2722_v4 = vmax.f32 %v6353_v14, %v6406_v5  ;;  %v5501_v5 = vld [vmem:[#allocation7 + $0x50] sm:$0xff]  }
 0x2fe   : > { %v1443_v55 = vadd.f32 %v6193_v39, %v1212_v15  ;;  %v2171_v58 = vpop.f32.mrb[64].mxu0  ;;  %v1214_v18 = vpop.f32.mrb[65].mxu1  ;;  %v1614_v15 = vrot.slane %v6438_v54, %v6198_v49 }
 0x2ff   : > { %v2383_v7 = vadd.f32 %v2171_v58, %v6193_v39  ;;  %v2173_v10 = vpop.f32.mrb[65].mxu0  ;;  %v1215_v61 = vpop.f32.mrb[66].mxu1 }
 0x300   : > { %v1687_v19 = vmul.f32 %v1610_v9, %v1443_v55  ;;  %v1444_v0 = vadd.f32 %v6209_v56, %v1215_v61  ;;  %v2174_v53 = vpop.f32.mrb[66].mxu0  ;;  %v1217_v13 = vpop.f32.mrb[67].mxu1 }
 0x301   : > { %v2627_v27 = vmul.f32 %v2550_v8, %v2383_v7  ;;  %v2384_v31 = vadd.f32 %v2174_v53, %v6209_v56  ;;  %v2176_v59 = vpop.f32.mrb[67].mxu0 }
 0x302   : > { %v6422_v33 = vmax.f32 %v1737_v44, %v1687_v19  ;;  %v1688_v14 = vmul.f32 %v1610_v9, %v1444_v0  ;;  %5187 = vmatmul.mubr.bf16.gmra.mrb[172].mxu1 %v5498_v35  ;;  %v2449_v44 = vcombine.high %v6382_v12, %v6382_v12  ;;  %v5502_v59 = vld [vmem:[#allocation7 + $0x58] sm:$0xff]  }
 0x303   : > { %v6424_v37 = vmax.f32 %v2677_v23, %v2627_v27  ;;  %v2628_v38 = vmul.f32 %v2550_v8, %v2384_v31  ;;  %5235 = vmatmul.mubr.bf16.gmra.mrb[172].mxu0 %v5498_v35  ;;  %5190 = vmatprep.mubr.bf16.mxu1 %v5499_v41 }
 0x304   : > { %v6426_v43 = vmax.f32 %v1752_v28, %v1688_v14  ;;  %5238 = vmatprep.mubr.bf16.mxu0 %v5499_v41  ;;  %v6442_v1 = vrot.slane %v2449_v44, %v6184_v24 }
 0x305   : > { %v6430_v40 = vmax.f32 %v2692_v47, %v2628_v38  ;;  %v1220_v57 = vpop.f32.mrb[68].mxu1  ;;  %v5503_v38 = vld [vmem:[#allocation7 + $0x60] sm:$0xff]  }
 0x306   : > { %v1445_v25 = vadd.f32 %v6225_v62, %v1220_v57  ;;  %v2179_v23 = vpop.f32.mrb[68].mxu0  ;;  %v1222_v60 = vpop.f32.mrb[69].mxu1 }
 0x307   : > { %v2385_v46 = vadd.f32 %v2179_v23, %v6225_v62  ;;  %v2181_v51 = vpop.f32.mrb[69].mxu0  ;;  %v1223_v16 = vpop.f32.mrb[70].mxu1 }
 0x308   : > { %v1689_v28 = vmul.f32 %v1610_v9, %v1445_v25  ;;  %v1446_v17 = vadd.f32 %v6260_v29, %v1223_v16  ;;  %v2182_v30 = vpop.f32.mrb[70].mxu0  ;;  %v1225_v63 = vpop.f32.mrb[71].mxu1 }
 0x309   : > { %v2629_v47 = vmul.f32 %v2550_v8, %v2385_v46  ;;  %v2386_v42 = vadd.f32 %v2182_v30, %v6260_v29  ;;  %v2184_v12 = vpop.f32.mrb[71].mxu0  ;;  %v2479_v63 = vcombine.high %v6400_v26, %v6400_v26 }
 0x30a   : > { %v6444_v50 = vmax.f32 %v1767_v3, %v1689_v28  ;;  %v1690_v11 = vmul.f32 %v1610_v9, %v1446_v17  ;;  %5191 = vmatmul.mubr.bf16.gmra.mrb[176].mxu1 %v5500_v22  ;;  %v2554_v3 = vrot.slane %v6442_v1, %v6198_v49  ;;  %v5504_v12 = vld [vmem:[#allocation7 + $0x68] sm:$0xff]  }
 0x30b   : > { %v6446_v34 = vmax.f32 %v2707_v48, %v2629_v47  ;;  %v2630_v36 = vmul.f32 %v2550_v8, %v2386_v42  ;;  %5239 = vmatmul.mubr.bf16.gmra.mrb[176].mxu0 %v5500_v22  ;;  %5194 = vmatprep.mubr.bf16.mxu1 %v5501_v5 }
 0x30c   : > { %v6448_v6 = vmax.f32 %v1782_v52, %v1690_v11  ;;  %5242 = vmatprep.mubr.bf16.mxu0 %v5501_v5 }
 0x30d   : > { %v6452_v55 = vmax.f32 %v2722_v4, %v2630_v36  ;;  %v1228_v58 = vpop.f32.mrb[72].mxu1 }
 0x30e   : > { %v1447_v9 = vadd.f32 %v6193_v39, %v1228_v58  ;;  %v2187_v48 = vpop.f32.mrb[72].mxu0  ;;  %v1230_v18 = vpop.f32.mrb[73].mxu1 }
 0x30f   : > { %v2387_v8 = vadd.f32 %v2187_v48, %v6193_v39  ;;  %v2189_v7 = vpop.f32.mrb[73].mxu0  ;;  %v1231_v10 = vpop.f32.mrb[74].mxu1 }
 0x310   : > { %v6458_v52 = vmul.f32 %v1614_v15, %v1447_v9  ;;  %v1448_v61 = vadd.f32 %v6209_v56, %v1231_v10  ;;  %v2190_v19 = vpop.f32.mrb[74].mxu0  ;;  %v1233_v0 = vpop.f32.mrb[75].mxu1 }
 0x311   : > { %v6461_v4 = vmul.f32 %v2554_v3, %v2387_v8  ;;  %v2388_v53 = vadd.f32 %v2190_v19, %v6209_v56  ;;  %v2192_v13 = vpop.f32.mrb[75].mxu0 }
 0x312   : > { %v1739_v27 = vmax.f32 %v6422_v33, %v6458_v52  ;;  %v6466_v31 = vmul.f32 %v1614_v15, %v1448_v61  ;;  %5195 = vmatmul.mubr.bf16.gmra.mrb[180].mxu1 %v5502_v59 }
 0x313   : > { %v2679_v14 = vmax.f32 %v6424_v37, %v6461_v4  ;;  %v6470_v35 = vmul.f32 %v2554_v3, %v2388_v53  ;;  %5243 = vmatmul.mubr.bf16.gmra.mrb[180].mxu0 %v5502_v59  ;;  %5198 = vmatprep.mubr.bf16.mxu1 %v5503_v38  ;;  %v5506_v4 = vld [vmem:[#allocation7 + $0x78] sm:$0xff]  }
 0x314   : > { %v1754_v41 = vmax.f32 %v6426_v43, %v6466_v31  ;;  %5246 = vmatprep.mubr.bf16.mxu0 %v5503_v38  ;;  %v1539_v43 = vcombine.high %v6393_v2, %v6393_v2  ;;  %v5505_v2 = vld [vmem:[#allocation7 + $0x70] sm:$0xff]   ;;  %v5507_v31 = vld [vmem:[#allocation8 + $0x4] ss:$8 sps:$4 sm:$0xff]  }
 0x315   : > { %v2694_v45 = vmax.f32 %v6430_v40, %v6470_v35  ;;  %v1236_v33 = vpop.f32.mrb[76].mxu1 }
 0x316   : > { %v1449_v57 = vadd.f32 %v6225_v62, %v1236_v33  ;;  %v2195_v44 = vpop.f32.mrb[76].mxu0  ;;  %v1238_v25 = vpop.f32.mrb[77].mxu1  ;;  %v1618_v5 = vrot.slane %v1539_v43, %v6198_v49 }
 0x317   : > { %v2389_v23 = vadd.f32 %v2195_v44, %v6225_v62  ;;  %v2197_v37 = vpop.f32.mrb[77].mxu0  ;;  %v1239_v60 = vpop.f32.mrb[78].mxu1 }
 0x318   : > { %v6478_v46 = vmul.f32 %v1614_v15, %v1449_v57  ;;  %v1450_v51 = vadd.f32 %v6260_v29, %v1239_v60  ;;  %v2198_v16 = vpop.f32.mrb[78].mxu0  ;;  %v1241_v28 = vpop.f32.mrb[79].mxu1 }
 0x319   : > { %v6483_v17 = vmul.f32 %v2554_v3, %v2389_v23  ;;  %v2390_v40 = vadd.f32 %v2198_v16, %v6260_v29  ;;  %v2200_v30 = vpop.f32.mrb[79].mxu0  ;;  %v2481_v28 = vcombine.high %v6442_v1, %v6442_v1 }
 0x31a   : > { %v1769_v47 = vmax.f32 %v6444_v50, %v6478_v46  ;;  %v1694_v42 = vmul.f32 %v1614_v15, %v1450_v51  ;;  %5199 = vmatmul.mubr.bf16.gmra.mrb[184].mxu1 %v5504_v12  ;;  %v2558_v50 = vrot.slane %v2479_v63, %v6198_v49 }
 0x31b   : > { %v2709_v11 = vmax.f32 %v6446_v34, %v6483_v17  ;;  %v2634_v22 = vmul.f32 %v2554_v3, %v2390_v40  ;;  %5247 = vmatmul.mubr.bf16.gmra.mrb[184].mxu0 %v5504_v12  ;;  %5202 = vmatprep.mubr.bf16.mxu1 %v5505_v2 }
 0x31c   : > { %v1784_v36 = vmax.f32 %v6448_v6, %v1694_v42  ;;  %5250 = vmatprep.mubr.bf16.mxu0 %v5505_v2 }
 0x31d   : > { %v2724_v26 = vmax.f32 %v6452_v55, %v2634_v22  ;;  %v1244_v58 = vpop.f32.mrb[80].mxu1  ;;  %v2562_v22 = vrot.slane %v2481_v28, %v6198_v49 }
 0x31e   : > { %v1451_v15 = vadd.f32 %v6193_v39, %v1244_v58  ;;  %v2203_v9 = vpop.f32.mrb[80].mxu0  ;;  %v1246_v48 = vpop.f32.mrb[81].mxu1 }
 0x31f   : > { %v2391_v34 = vadd.f32 %v2203_v9, %v6193_v39  ;;  %v2205_v3 = vpop.f32.mrb[81].mxu0  ;;  %v1247_v18 = vpop.f32.mrb[82].mxu1  ;;  %v6530_v48 = vunpack.c.h.bf16 %v6176_v20 }
 0x320   : > { %v1695_v8 = vmul.f32 %v1618_v5, %v1451_v15  ;;  %v1452_v7 = vadd.f32 %v6209_v56, %v1247_v18  ;;  %v2206_v6 = vpop.f32.mrb[82].mxu0  ;;  %v1249_v10 = vpop.f32.mrb[83].mxu1  ;;  %v6534_v18 = vunpack.c.h.bf16 %v6179_v21 }
 0x321   : > { %v2635_v52 = vmul.f32 %v2558_v50, %v2391_v34  ;;  %v2392_v61 = vadd.f32 %v2206_v6, %v6209_v56  ;;  %v2208_v55 = vpop.f32.mrb[83].mxu0 }
 0x322   : > { %v6500_v19 = vmax.f32 %v1739_v27, %v1695_v8  ;;  %v1696_v0 = vmul.f32 %v1618_v5, %v1452_v7  ;;  %5203 = vmatmul.mubr.bf16.gmra.mrb[188].mxu1 %v5506_v4 }
 0x323   : > { %v6502_v53 = vmax.f32 %v2679_v14, %v2635_v52  ;;  %v2636_v13 = vmul.f32 %v2558_v50, %v2392_v61  ;;  %5251 = vmatmul.mubr.bf16.gmra.mrb[188].mxu0 %v5506_v4  ;;  %3045 = vmatprep.mubr.bf16.mxu1 %v5507_v31  ;;  %v1549_v61 = vrot.slane %v6530_v48, %v6184_v24 }
 0x324   : > { %v6504_v59 = vmax.f32 %v1754_v41, %v1696_v0  ;;  %3985 = vmatprep.mubr.bf16.mxu0 %v5507_v31  ;;  %v1541_v41 = vcombine.high %v6438_v54, %v6438_v54  ;;  %v2489_v0 = vrot.slane %v6534_v18, %v6184_v24 }
 0x325   : > { %v6506_v35 = vmax.f32 %v2694_v45, %v2636_v13  ;;  %v1252_v38 = vpop.f32.mrb[84].mxu1 }
 0x326   : > { %v1453_v33 = vadd.f32 %v6225_v62, %v1252_v38  ;;  %v2211_v57 = vpop.f32.mrb[84].mxu0  ;;  %v1254_v27 = vpop.f32.mrb[85].mxu1  ;;  %v1622_v42 = vrot.slane %v1541_v41, %v6198_v49 }
 0x327   : > { %v2393_v44 = vadd.f32 %v2211_v57, %v6225_v62  ;;  %v2213_v25 = vpop.f32.mrb[85].mxu0  ;;  %v1255_v23 = vpop.f32.mrb[86].mxu1  ;;  %v6548_v27 = vrot.slane %v1549_v61, %v6184_v24 }
 0x328   : > { %v1697_v14 = vmul.f32 %v1618_v5, %v1453_v33  ;;  %v1454_v37 = vadd.f32 %v6260_v29, %v1255_v23  ;;  %v2214_v60 = vpop.f32.mrb[86].mxu0  ;;  %v1257_v46 = vpop.f32.mrb[87].mxu1  ;;  %v6552_v23 = vrot.slane %v2489_v0, %v6184_v24 }
 0x329   : > { %v2637_v51 = vmul.f32 %v2558_v50, %v2393_v44  ;;  %v2394_v45 = vadd.f32 %v2214_v60, %v6260_v29  ;;  %v2216_v16 = vpop.f32.mrb[87].mxu0 }
 0x32a   : > { %v6516_v43 = vmax.f32 %v1769_v47, %v1697_v14  ;;  %v1698_v17 = vmul.f32 %v1618_v5, %v1454_v37  ;;  %v2566_v28 = vrot.slane %v6552_v23, %v6198_v49 }
 0x32b   : > { %v6518_v40 = vmax.f32 %v2709_v11, %v2637_v51  ;;  %v2638_v30 = vmul.f32 %v2558_v50, %v2394_v45  ;;  %v1626_v51 = vrot.slane %v6548_v27, %v6198_v49 }
 0x32c   : > { %v6520_v63 = vmax.f32 %v1784_v36, %v1698_v17 }
 0x32d   : > { %v6523_v12 = vmax.f32 %v2724_v26, %v2638_v30  ;;  %v1260_v54 = vpop.f32.mrb[88].mxu1 }
 0x32e   : > { %v1455_v2 = vadd.f32 %v6193_v39, %v1260_v54  ;;  %v2219_v58 = vpop.f32.mrb[88].mxu0  ;;  %v1262_v15 = vpop.f32.mrb[89].mxu1 }
 0x32f   : > { %v2395_v1 = vadd.f32 %v2219_v58, %v6193_v39  ;;  %v2221_v47 = vpop.f32.mrb[89].mxu0  ;;  %v1263_v5 = vpop.f32.mrb[90].mxu1 }
 0x330   : > { %v1699_v11 = vmul.f32 %v1622_v42, %v1455_v2  ;;  %v1456_v50 = vadd.f32 %v6209_v56, %v1263_v5  ;;  %v2222_v36 = vpop.f32.mrb[90].mxu0  ;;  %v1265_v9 = vpop.f32.mrb[91].mxu1 }
 0x331   : > { %v2639_v26 = vmul.f32 %v2562_v22, %v2395_v1  ;;  %v2396_v34 = vadd.f32 %v2222_v36, %v6209_v56  ;;  %v2224_v3 = vpop.f32.mrb[91].mxu0  ;;  %v1557_v9 = vcombine.high %v1549_v61, %v1549_v61 }
 0x332   : > { %v1741_v8 = vmax.f32 %v6500_v19, %v1699_v11  ;;  %v1700_v7 = vmul.f32 %v1622_v42, %v1456_v50  ;;  %v2497_v3 = vcombine.high %v2489_v0, %v2489_v0 }
 0x333   : > { %v2681_v6 = vmax.f32 %v6502_v53, %v2639_v26  ;;  %v2640_v10 = vmul.f32 %v2562_v22, %v2396_v34 }
 0x334   : > { %v1756_v52 = vmax.f32 %v6504_v59, %v1700_v7 }
 0x335   : > { %v2696_v20 = vmax.f32 %v6506_v35, %v2640_v10  ;;  %v1268_v55 = vpop.f32.mrb[92].mxu1 }
 0x336   : > { %v1457_v21 = vadd.f32 %v6225_v62, %v1268_v55  ;;  %v2227_v4 = vpop.f32.mrb[92].mxu0  ;;  %v1270_v13 = vpop.f32.mrb[93].mxu1 }
 0x337   : > { %v2397_v19 = vadd.f32 %v2227_v4, %v6225_v62  ;;  %v2229_v31 = vpop.f32.mrb[93].mxu0  ;;  %v1271_v53 = vpop.f32.mrb[94].mxu1 }
 0x338   : > { %v1701_v38 = vmul.f32 %v1622_v42, %v1457_v21  ;;  %v1458_v59 = vadd.f32 %v6260_v29, %v1271_v53  ;;  %v2230_v33 = vpop.f32.mrb[94].mxu0  ;;  %v1273_v57 = vpop.f32.mrb[95].mxu1  ;;  %v6582_v53 = vrot.slane %v2497_v3, %v6184_v24 }
 0x339   : > { %v2641_v35 = vmul.f32 %v2562_v22, %v2397_v19  ;;  %v2398_v44 = vadd.f32 %v2230_v33, %v6260_v29  ;;  %v2232_v25 = vpop.f32.mrb[95].mxu0 }
 0x33a   : > { %v1771_v14 = vmax.f32 %v6516_v43, %v1701_v38  ;;  %v1702_v37 = vmul.f32 %v1622_v42, %v1458_v59 }
 0x33b   : > { %v2711_v60 = vmax.f32 %v6518_v40, %v2641_v35  ;;  %v2642_v46 = vmul.f32 %v2562_v22, %v2398_v44 }
 0x33c   : > { %v1786_v41 = vmax.f32 %v6520_v63, %v1702_v37 }
 0x33d   : > { %v2726_v45 = vmax.f32 %v6523_v12, %v2642_v46  ;;  %v1276_v16 = vpop.f32.mrb[96].mxu1  ;;  %v2570_v46 = vrot.slane %v6582_v53, %v6198_v49 }
 0x33e   : > { %v1459_v17 = vadd.f32 %v6193_v39, %v1276_v16  ;;  %v2235_v30 = vpop.f32.mrb[96].mxu0  ;;  %v1278_v54 = vpop.f32.mrb[97].mxu1 }
 0x33f   : > { %v2399_v43 = vadd.f32 %v2235_v30, %v6193_v39  ;;  %v2237_v42 = vpop.f32.mrb[97].mxu0  ;;  %v1279_v40 = vpop.f32.mrb[98].mxu1 }
 0x340   : > { %v1703_v22 = vmul.f32 %v1626_v51, %v1459_v17  ;;  %v1460_v63 = vadd.f32 %v6209_v56, %v1279_v40  ;;  %v2238_v2 = vpop.f32.mrb[98].mxu0  ;;  %v1281_v58 = vpop.f32.mrb[99].mxu1 }
 0x341   : > { %v2643_v15 = vmul.f32 %v2566_v28, %v2399_v43  ;;  %v2400_v12 = vadd.f32 %v2238_v2, %v6209_v56  ;;  %v2240_v1 = vpop.f32.mrb[99].mxu0 }
 0x342   : > { %v6566_v47 = vmax.f32 %v1741_v8, %v1703_v22  ;;  %v1704_v5 = vmul.f32 %v1626_v51, %v1460_v63 }
 0x343   : > { %v6568_v11 = vmax.f32 %v2681_v6, %v2643_v15  ;;  %v2644_v50 = vmul.f32 %v2566_v28, %v2400_v12 }
 0x344   : > { %v6570_v36 = vmax.f32 %v1756_v52, %v1704_v5  ;;  %v6578_v52 = vrot.slane %v1557_v9, %v6184_v24 }
 0x345   : > { %v6572_v26 = vmax.f32 %v2696_v20, %v2644_v50  ;;  %v1284_v34 = vpop.f32.mrb[100].mxu1 }
 0x346   : > { %v1461_v7 = vadd.f32 %v6225_v62, %v1284_v34  ;;  %v2243_v10 = vpop.f32.mrb[100].mxu0  ;;  %v1286_v55 = vpop.f32.mrb[101].mxu1  ;;  %v1630_v44 = vrot.slane %v6578_v52, %v6198_v49 }
 0x347   : > { %v2401_v21 = vadd.f32 %v2243_v10, %v6225_v62  ;;  %v2245_v4 = vpop.f32.mrb[101].mxu0  ;;  %v1287_v8 = vpop.f32.mrb[102].mxu1 }
 0x348   : > { %v1705_v13 = vmul.f32 %v1626_v51, %v1461_v7  ;;  %v1462_v6 = vadd.f32 %v6260_v29, %v1287_v8  ;;  %v2246_v19 = vpop.f32.mrb[102].mxu0  ;;  %v1289_v31 = vpop.f32.mrb[103].mxu1  ;;  %v2527_v8 = vcombine.high %v6552_v23, %v6552_v23 }
 0x349   : > { %v2645_v61 = vmul.f32 %v2566_v28, %v2401_v21  ;;  %v2402_v20 = vadd.f32 %v2246_v19, %v6260_v29  ;;  %v2248_v0 = vpop.f32.mrb[103].mxu0 }
 0x34a   : > { %v6584_v38 = vmax.f32 %v1771_v14, %v1705_v13  ;;  %v1706_v59 = vmul.f32 %v1626_v51, %v1462_v6 }
 0x34b   : > { %v6586_v33 = vmax.f32 %v2711_v60, %v2645_v61  ;;  %v2646_v57 = vmul.f32 %v2566_v28, %v2402_v20 }
 0x34c   : > { %v6588_v35 = vmax.f32 %v1786_v41, %v1706_v59  ;;  %v2574_v59 = vrot.slane %v2527_v8, %v6198_v49 }
 0x34d   : > { %v6592_v25 = vmax.f32 %v2726_v45, %v2646_v57  ;;  %v1292_v37 = vpop.f32.mrb[104].mxu1 }
 0x34e   : > { %v1463_v16 = vadd.f32 %v6193_v39, %v1292_v37  ;;  %v2251_v17 = vpop.f32.mrb[104].mxu0  ;;  %v1294_v14 = vpop.f32.mrb[105].mxu1 }
 0x34f   : > { %v2403_v51 = vadd.f32 %v2251_v17, %v6193_v39  ;;  %v2253_v60 = vpop.f32.mrb[105].mxu0  ;;  %v1295_v30 = vpop.f32.mrb[106].mxu1 }
 0x350   : > { %v1707_v28 = vmul.f32 %v1630_v44, %v1463_v16  ;;  %v1464_v41 = vadd.f32 %v6209_v56, %v1295_v30  ;;  %v2254_v54 = vpop.f32.mrb[106].mxu0  ;;  %v1297_v43 = vpop.f32.mrb[107].mxu1 }
 0x351   : > { %v2647_v42 = vmul.f32 %v2570_v46, %v2403_v51  ;;  %v2404_v45 = vadd.f32 %v2254_v54, %v6209_v56  ;;  %v2256_v40 = vpop.f32.mrb[107].mxu0 }
 0x352   : > { %v1743_v22 = vmax.f32 %v6566_v47, %v1707_v28  ;;  %v1708_v63 = vmul.f32 %v1630_v44, %v1464_v41 }
 0x353   : > { %v2683_v2 = vmax.f32 %v6568_v11, %v2647_v42  ;;  %v2648_v58 = vmul.f32 %v2570_v46, %v2404_v45  ;;  %v1587_v11 = vcombine.high %v6548_v27, %v6548_v27 }
 0x354   : > { %v1758_v15 = vmax.f32 %v6570_v36, %v1708_v63 }
 0x355   : > { %v2698_v12 = vmax.f32 %v6572_v26, %v2648_v58  ;;  %v1300_v1 = vpop.f32.mrb[108].mxu1  ;;  %v1634_v20 = vrot.slane %v1587_v11, %v6198_v49 }
 0x356   : > { %v1465_v5 = vadd.f32 %v6225_v62, %v1300_v1  ;;  %v2259_v50 = vpop.f32.mrb[108].mxu0  ;;  %v1302_v9 = vpop.f32.mrb[109].mxu1 }
 0x357   : > { %v2405_v34 = vadd.f32 %v2259_v50, %v6225_v62  ;;  %v2261_v3 = vpop.f32.mrb[109].mxu0  ;;  %v1303_v7 = vpop.f32.mrb[110].mxu1 }
 0x358   : > { %v1709_v10 = vmul.f32 %v1630_v44, %v1465_v5  ;;  %v1466_v47 = vadd.f32 %v6260_v29, %v1303_v7  ;;  %v2262_v55 = vpop.f32.mrb[110].mxu0  ;;  %v1305_v21 = vpop.f32.mrb[111].mxu1  ;;  %v2529_v7 = vcombine.high %v6582_v53, %v6582_v53 }
 0x359   : > { %v2649_v36 = vmul.f32 %v2570_v46, %v2405_v34  ;;  %v2406_v26 = vadd.f32 %v2262_v55, %v6260_v29  ;;  %v2264_v4 = vpop.f32.mrb[111].mxu0 }
 0x35a   : > { %v1773_v13 = vmax.f32 %v6584_v38, %v1709_v10  ;;  %v1710_v6 = vmul.f32 %v1630_v44, %v1466_v47  ;;  %v2578_v4 = vrot.slane %v2529_v7, %v6198_v49 }
 0x35b   : > { %v2713_v19 = vmax.f32 %v6586_v33, %v2649_v36  ;;  %v2650_v31 = vmul.f32 %v2570_v46, %v2406_v26 }
 0x35c   : > { %v1788_v61 = vmax.f32 %v6588_v35, %v1710_v6 }
 0x35d   : > { %v2728_v0 = vmax.f32 %v6592_v25, %v2650_v31  ;;  %v1308_v27 = vpop.f32.mrb[112].mxu1 }
 0x35e   : > { %v1467_v57 = vadd.f32 %v6193_v39, %v1308_v27  ;;  %v2267_v37 = vpop.f32.mrb[112].mxu0  ;;  %v1310_v16 = vpop.f32.mrb[113].mxu1 }
 0x35f   : > { %v2407_v23 = vadd.f32 %v2267_v37, %v6193_v39  ;;  %v2269_v38 = vpop.f32.mrb[113].mxu0  ;;  %v1311_v44 = vpop.f32.mrb[114].mxu1 }
 0x360   : > { %v1711_v17 = vmul.f32 %v1634_v20, %v1467_v57  ;;  %v1468_v33 = vadd.f32 %v6209_v56, %v1311_v44  ;;  %v2270_v46 = vpop.f32.mrb[114].mxu0  ;;  %v1313_v35 = vpop.f32.mrb[115].mxu1 }
 0x361   : > { %v2651_v14 = vmul.f32 %v2574_v59, %v2407_v23  ;;  %v2408_v51 = vadd.f32 %v2270_v46, %v6209_v56  ;;  %v2272_v25 = vpop.f32.mrb[115].mxu0  ;;  %v2482_v23 = vcombine.high %v6534_v18, %v6534_v18 }
 0x362   : > { %v6622_v60 = vmax.f32 %v1743_v22, %v1711_v17  ;;  %v1712_v30 = vmul.f32 %v1634_v20, %v1468_v33 }
 0x363   : > { %v6624_v28 = vmax.f32 %v2683_v2, %v2651_v14  ;;  %v2652_v41 = vmul.f32 %v2574_v59, %v2408_v51  ;;  %v2496_v51 = vrot.slane %v2482_v23, %v6184_v24 }
 0x364   : > { %v6626_v54 = vmax.f32 %v1758_v15, %v1712_v30  ;;  %v1589_v15 = vcombine.high %v6578_v52, %v6578_v52 }
 0x365   : > { %v6628_v43 = vmax.f32 %v2698_v12, %v2652_v41  ;;  %v1316_v42 = vpop.f32.mrb[116].mxu1 }
 0x366   : > { %v1469_v45 = vadd.f32 %v6225_v62, %v1316_v42  ;;  %v2275_v40 = vpop.f32.mrb[116].mxu0  ;;  %v1318_v63 = vpop.f32.mrb[117].mxu1  ;;  %v1638_v36 = vrot.slane %v1589_v15, %v6198_v49 }
 0x367   : > { %v2409_v58 = vadd.f32 %v2275_v40, %v6225_v62  ;;  %v2277_v1 = vpop.f32.mrb[117].mxu0  ;;  %v1319_v5 = vpop.f32.mrb[118].mxu1 }
 0x368   : > { %v1713_v50 = vmul.f32 %v1634_v20, %v1469_v45  ;;  %v1470_v22 = vadd.f32 %v6260_v29, %v1319_v5  ;;  %v2278_v9 = vpop.f32.mrb[118].mxu0  ;;  %v1321_v2 = vpop.f32.mrb[119].mxu1  ;;  %v6670_v5 = vrot.slane %v2496_v51, %v6184_v24 }
 0x369   : > { %v2653_v34 = vmul.f32 %v2574_v59, %v2409_v58  ;;  %v2410_v12 = vadd.f32 %v2278_v9, %v6260_v29  ;;  %v2280_v3 = vpop.f32.mrb[119].mxu0 }
 0x36a   : > { %v6638_v10 = vmax.f32 %v1773_v13, %v1713_v50  ;;  %v1714_v47 = vmul.f32 %v1634_v20, %v1470_v22  ;;  %v2582_v7 = vrot.slane %v6670_v5, %v6198_v49 }
 0x36b   : > { %v6640_v55 = vmax.f32 %v2713_v19, %v2653_v34  ;;  %v2654_v21 = vmul.f32 %v2574_v59, %v2410_v12 }
 0x36c   : > { %v6642_v11 = vmax.f32 %v1788_v61, %v1714_v47 }
 0x36d   : > { %v6645_v26 = vmax.f32 %v2728_v0, %v2654_v21  ;;  %v1324_v52 = vpop.f32.mrb[120].mxu1  ;;  %v1542_v0 = vcombine.high %v6530_v48, %v6530_v48 }
 0x36e   : > { %v1471_v8 = vadd.f32 %v6193_v39, %v1324_v52  ;;  %v2283_v6 = vpop.f32.mrb[120].mxu0  ;;  %v1326_v31 = vpop.f32.mrb[121].mxu1 }
 0x36f   : > { %v2411_v53 = vadd.f32 %v2283_v6, %v6193_v39  ;;  %v2285_v13 = vpop.f32.mrb[121].mxu0  ;;  %v1327_v20 = vpop.f32.mrb[122].mxu1  ;;  %v1556_v35 = vrot.slane %v1542_v0, %v6184_v24 }
 0x370   : > { %v1715_v19 = vmul.f32 %v1638_v36, %v1471_v8  ;;  %v1472_v27 = vadd.f32 %v6209_v56, %v1327_v20  ;;  %v2286_v61 = vpop.f32.mrb[122].mxu0  ;;  %v1329_v59 = vpop.f32.mrb[123].mxu1 }
 0x371   : > { %v2655_v57 = vmul.f32 %v2578_v4, %v2411_v53  ;;  %v2412_v37 = vadd.f32 %v2286_v61, %v6209_v56  ;;  %v2288_v16 = vpop.f32.mrb[123].mxu0  ;;  %v6666_v63 = vrot.slane %v1556_v35, %v6184_v24  ;;  %v1558_v59 = vcombine.high %v1556_v35, %v1556_v35 }
 0x372   : > { %v1745_v38 = vmax.f32 %v6622_v60, %v1715_v19  ;;  %v1716_v44 = vmul.f32 %v1638_v36, %v1472_v27 }
 0x373   : > { %v2685_v17 = vmax.f32 %v6624_v28, %v2655_v57  ;;  %v2656_v33 = vmul.f32 %v2578_v4, %v2412_v37  ;;  %v1642_v34 = vrot.slane %v6666_v63, %v6198_v49  ;;  %v2498_v37 = vcombine.high %v2496_v51, %v2496_v51 }
 0x374   : > { %v1760_v46 = vmax.f32 %v6626_v54, %v1716_v44 }
 0x375   : > { %v2700_v14 = vmax.f32 %v6628_v43, %v2656_v33  ;;  %v1332_v48 = vpop.f32.mrb[124].mxu1 }
 0x376   : > { %v1473_v25 = vadd.f32 %v6225_v62, %v1332_v48  ;;  %v2291_v30 = vpop.f32.mrb[124].mxu0  ;;  %v1334_v41 = vpop.f32.mrb[125].mxu1 }
 0x377   : > { %v2413_v18 = vadd.f32 %v2291_v30, %v6225_v62  ;;  %v2293_v60 = vpop.f32.mrb[125].mxu0  ;;  %v1335_v42 = vpop.f32.mrb[126].mxu1 }
 0x378   : > { %v1717_v45 = vmul.f32 %v1638_v36, %v1473_v25  ;;  %v1474_v28 = vadd.f32 %v6260_v29, %v1335_v42  ;;  %v2294_v40 = vpop.f32.mrb[126].mxu0  ;;  %v1337_v54 = vpop.f32.mrb[127].mxu1 }
 0x379   : > { %v2657_v43 = vmul.f32 %v2578_v4, %v2413_v18  ;;  %v2414_v58 = vadd.f32 %v2294_v40, %v6260_v29  ;;  %v2296_v1 = vpop.f32.mrb[127].mxu0  ;;  %v6700_v18 = vrot.slane %v2498_v37, %v6184_v24 }
 0x37a   : > { %v1775_v50 = vmax.f32 %v6638_v10, %v1717_v45  ;;  %v1718_v22 = vmul.f32 %v1638_v36, %v1474_v28 }
 0x37b   : > { %v2715_v9 = vmax.f32 %v6640_v55, %v2657_v43  ;;  %v2658_v2 = vmul.f32 %v2578_v4, %v2414_v58  ;;  %v2586_v1 = vrot.slane %v6700_v18, %v6198_v49 }
 0x37c   : > { %v1790_v15 = vmax.f32 %v6642_v11, %v1718_v22 }
 0x37d   : > { %v2730_v12 = vmax.f32 %v6645_v26, %v2658_v2  ;;  %v1340_v3 = vpop.f32.mrb[128].mxu1 }
 0x37e   : > { %v1475_v47 = vadd.f32 %v6193_v39, %v1340_v3  ;;  %v2299_v21 = vpop.f32.mrb[128].mxu0  ;;  %v1342_v52 = vpop.f32.mrb[129].mxu1 }
 0x37f   : > { %v2415_v10 = vadd.f32 %v2299_v21, %v6193_v39  ;;  %v2301_v36 = vpop.f32.mrb[129].mxu0  ;;  %v1343_v55 = vpop.f32.mrb[130].mxu1 }
 0x380   : > { %v1719_v4 = vmul.f32 %v1642_v34, %v1475_v47  ;;  %v1476_v11 = vadd.f32 %v6209_v56, %v1343_v55  ;;  %v2302_v8 = vpop.f32.mrb[130].mxu0  ;;  %v1345_v6 = vpop.f32.mrb[131].mxu1 }
 0x381   : > { %v2659_v31 = vmul.f32 %v2582_v7, %v2415_v10  ;;  %v2416_v26 = vadd.f32 %v2302_v8, %v6209_v56  ;;  %v2304_v53 = vpop.f32.mrb[131].mxu0 }
 0x382   : > { %v6684_v13 = vmax.f32 %v1745_v38, %v1719_v4  ;;  %v1720_v20 = vmul.f32 %v1642_v34, %v1476_v11 }
 0x383   : > { %v6686_v19 = vmax.f32 %v2685_v17, %v2659_v31  ;;  %v2660_v27 = vmul.f32 %v2582_v7, %v2416_v26 }
 0x384   : > { %v6688_v61 = vmax.f32 %v1760_v46, %v1720_v20  ;;  %v6696_v46 = vrot.slane %v1558_v59, %v6184_v24 }
 0x385   : > { %v6690_v0 = vmax.f32 %v2700_v14, %v2660_v27  ;;  %v1348_v57 = vpop.f32.mrb[132].mxu1 }
 0x386   : > { %v1477_v16 = vadd.f32 %v6225_v62, %v1348_v57  ;;  %v2307_v23 = vpop.f32.mrb[132].mxu0  ;;  %v1350_v44 = vpop.f32.mrb[133].mxu1  ;;  %v1646_v54 = vrot.slane %v6696_v46, %v6198_v49 }
 0x387   : > { %v2417_v33 = vadd.f32 %v2307_v23, %v6225_v62  ;;  %v2309_v48 = vpop.f32.mrb[133].mxu0  ;;  %v1351_v38 = vpop.f32.mrb[134].mxu1 }
 0x388   : > { %v1721_v25 = vmul.f32 %v1642_v34, %v1477_v16  ;;  %v1478_v17 = vadd.f32 %v6260_v29, %v1351_v38  ;;  %v2310_v30 = vpop.f32.mrb[134].mxu0  ;;  %v1353_v41 = vpop.f32.mrb[135].mxu1 }
 0x389   : > { %v2661_v35 = vmul.f32 %v2582_v7, %v2417_v33  ;;  %v2418_v14 = vadd.f32 %v2310_v30, %v6260_v29  ;;  %v2312_v51 = vpop.f32.mrb[135].mxu0  ;;  %v2528_v33 = vcombine.high %v6670_v5, %v6670_v5 }
 0x38a   : > { %v6702_v60 = vmax.f32 %v1775_v50, %v1721_v25  ;;  %v1722_v42 = vmul.f32 %v1642_v34, %v1478_v17 }
 0x38b   : > { %v6704_v45 = vmax.f32 %v2715_v9, %v2661_v35  ;;  %v2662_v28 = vmul.f32 %v2582_v7, %v2418_v14  ;;  %v2590_v14 = vrot.slane %v2528_v33, %v6198_v49 }
 0x38c   : > { %v6706_v40 = vmax.f32 %v1790_v15, %v1722_v42 }
 0x38d   : > { %v6710_v43 = vmax.f32 %v2730_v12, %v2662_v28  ;;  %v1356_v58 = vpop.f32.mrb[136].mxu1 }
 0x38e   : > { %v1479_v22 = vadd.f32 %v6193_v39, %v1356_v58  ;;  %v2315_v2 = vpop.f32.mrb[136].mxu0  ;;  %v1358_v50 = vpop.f32.mrb[137].mxu1 }
 0x38f   : > { %v2419_v34 = vadd.f32 %v2315_v2, %v6193_v39  ;;  %v2317_v9 = vpop.f32.mrb[137].mxu0  ;;  %v1359_v3 = vpop.f32.mrb[138].mxu1 }
 0x390   : > { %v1723_v7 = vmul.f32 %v1646_v54, %v1479_v22  ;;  %v1480_v15 = vadd.f32 %v6209_v56, %v1359_v3  ;;  %v2318_v47 = vpop.f32.mrb[138].mxu0  ;;  %v1361_v21 = vpop.f32.mrb[139].mxu1 }
 0x391   : > { %v2663_v52 = vmul.f32 %v2586_v1, %v2419_v34  ;;  %v2420_v12 = vadd.f32 %v2318_v47, %v6209_v56  ;;  %v2320_v10 = vpop.f32.mrb[139].mxu0 }
 0x392   : > { %v1747_v36 = vmax.f32 %v6684_v13, %v1723_v7  ;;  %v1724_v55 = vmul.f32 %v1646_v54, %v1480_v15 }
 0x393   : > { %v2687_v4 = vmax.f32 %v6686_v19, %v2663_v52  ;;  %v2664_v11 = vmul.f32 %v2586_v1, %v2420_v12  ;;  %v1588_v19 = vcombine.high %v6666_v63, %v6666_v63 }
 0x394   : > { %v1762_v8 = vmax.f32 %v6688_v61, %v1724_v55 }
 0x395   : > { %v2702_v6 = vmax.f32 %v6690_v0, %v2664_v11  ;;  %v1364_v31 = vpop.f32.mrb[140].mxu1  ;;  %v1650_v41 = vrot.slane %v1588_v19, %v6198_v49 }
 0x396   : > { %v1481_v26 = vadd.f32 %v6225_v62, %v1364_v31  ;;  %v2323_v53 = vpop.f32.mrb[140].mxu0  ;;  %v1366_v20 = vpop.f32.mrb[141].mxu1 }
 0x397   : > { %v2421_v27 = vadd.f32 %v2323_v53, %v6225_v62  ;;  %v2325_v59 = vpop.f32.mrb[141].mxu0  ;;  %v1367_v57 = vpop.f32.mrb[142].mxu1 }
 0x398   : > { %v1725_v37 = vmul.f32 %v1646_v54, %v1481_v26  ;;  %v1482_v13 = vadd.f32 %v6260_v29, %v1367_v57  ;;  %v2326_v16 = vpop.f32.mrb[142].mxu0  ;;  %v1369_v23 = vpop.f32.mrb[143].mxu1 }
 0x399   : > { %v2665_v61 = vmul.f32 %v2586_v1, %v2421_v27  ;;  %v2422_v0 = vadd.f32 %v2326_v16, %v6260_v29  ;;  %v2328_v44 = vpop.f32.mrb[143].mxu0  ;;  %v2530_v27 = vcombine.high %v6700_v18, %v6700_v18 }
 0x39a   : > { %v1777_v48 = vmax.f32 %v6702_v60, %v1725_v37  ;;  %v1726_v38 = vmul.f32 %v1646_v54, %v1482_v13 }
 0x39b   : > { %v2717_v25 = vmax.f32 %v6704_v45, %v2665_v61  ;;  %v2666_v17 = vmul.f32 %v2586_v1, %v2422_v0  ;;  %v2594_v0 = vrot.slane %v2530_v27, %v6198_v49 }
 0x39c   : > { %v1792_v30 = vmax.f32 %v6706_v40, %v1726_v38 }
 0x39d   : > { %v2732_v35 = vmax.f32 %v6710_v43, %v2666_v17  ;;  %v1372_v63 = vpop.f32.mrb[144].mxu1 }
 0x39e   : > { %v1483_v51 = vadd.f32 %v6193_v39, %v1372_v63  ;;  %v2331_v42 = vpop.f32.mrb[144].mxu0  ;;  %v1374_v28 = vpop.f32.mrb[145].mxu1 }
 0x39f   : > { %v2423_v5 = vadd.f32 %v2331_v42, %v6193_v39  ;;  %v2333_v60 = vpop.f32.mrb[145].mxu0  ;;  %v1375_v54 = vpop.f32.mrb[146].mxu1 }
 0x3a0   : > { %v1727_v58 = vmul.f32 %v1650_v41, %v1483_v51  ;;  %v1484_v45 = vadd.f32 %v6209_v56, %v1375_v54  ;;  %v2334_v1 = vpop.f32.mrb[146].mxu0  ;;  %v1377_v40 = vpop.f32.mrb[147].mxu1 }
 0x3a1   : > { %v2667_v22 = vmul.f32 %v2590_v14, %v2423_v5  ;;  %v2424_v2 = vadd.f32 %v2334_v1, %v6209_v56  ;;  %v2336_v43 = vpop.f32.mrb[147].mxu0 }
 0x3a2   : > { %v1748_v50 = vmax.f32 %v1747_v36, %v1727_v58  ;;  %v1728_v34 = vmul.f32 %v1650_v41, %v1484_v45  ;;  %v1590_v36 = vcombine.high %v6696_v46, %v6696_v46 }
 0x3a3   : > { %v2688_v9 = vmax.f32 %v2687_v4, %v2667_v22  ;;  %v2668_v3 = vmul.f32 %v2590_v14, %v2424_v2 }
 0x3a4   : > { %v1763_v7 = vmax.f32 %v1762_v8, %v1728_v34  ;;  %v1654_v23 = vrot.slane %v1590_v36, %v6198_v49 }
 0x3a5   : > { %v2703_v15 = vmax.f32 %v2702_v6, %v2668_v3  ;;  %v1380_v47 = vpop.f32.mrb[148].mxu1 }
 0x3a6   : > { %v1485_v21 = vadd.f32 %v6225_v62, %v1380_v47  ;;  %v2339_v52 = vpop.f32.mrb[148].mxu0  ;;  %v1382_v12 = vpop.f32.mrb[149].mxu1 }
 0x3a7   : > { %v2425_v10 = vadd.f32 %v2339_v52, %v6225_v62  ;;  %v2341_v55 = vpop.f32.mrb[149].mxu0  ;;  %v1383_v11 = vpop.f32.mrb[150].mxu1 }
 0x3a8   : > { %v1729_v31 = vmul.f32 %v1650_v41, %v1485_v21  ;;  %v1486_v26 = vadd.f32 %v6260_v29, %v1383_v11  ;;  %v2342_v53 = vpop.f32.mrb[150].mxu0  ;;  %v1385_v20 = vpop.f32.mrb[151].mxu1 }
 0x3a9   : > { %v2669_v4 = vmul.f32 %v2590_v14, %v2425_v10  ;;  %v2426_v8 = vadd.f32 %v2342_v53, %v6260_v29  ;;  %v2344_v6 = vpop.f32.mrb[151].mxu0 }
 0x3aa   : > { %v1778_v59 = vmax.f32 %v1777_v48, %v1729_v31  ;;  %v1730_v57 = vmul.f32 %v1650_v41, %v1486_v26 }
 0x3ab   : > { %v2718_v37 = vmax.f32 %v2717_v25, %v2669_v4  ;;  %v2670_v13 = vmul.f32 %v2590_v14, %v2426_v8 }
 0x3ac   : > { %v1793_v16 = vmax.f32 %v1792_v30, %v1730_v57 }
 0x3ad   : > { %v2733_v19 = vmax.f32 %v2732_v35, %v2670_v13  ;;  %v1388_v61 = vpop.f32.mrb[152].mxu1 }
 0x3ae   : > { %v1487_v46 = vadd.f32 %v6193_v39, %v1388_v61  ;;  %v2347_v44 = vpop.f32.mrb[152].mxu0  ;;  %v1390_v33 = vpop.f32.mrb[153].mxu1 }
 0x3af   : > { %v2427_v38 = vadd.f32 %v2347_v44, %v6193_v39  ;;  %v2349_v17 = vpop.f32.mrb[153].mxu0  ;;  %v1391_v63 = vpop.f32.mrb[154].mxu1 }
 0x3b0   : > { %v1731_v18 = vmul.f32 %v1654_v23, %v1487_v46  ;;  %v1488_v48 = vadd.f32 %v6209_v56, %v1391_v63  ;;  %v2350_v25 = vpop.f32.mrb[154].mxu0  ;;  %v1393_v41 = vpop.f32.mrb[155].mxu1 }
 0x3b1   : > { %v2671_v30 = vmul.f32 %v2594_v0, %v2427_v38  ;;  %v2428_v14 = vadd.f32 %v2350_v25, %v6209_v56  ;;  %v2352_v35 = vpop.f32.mrb[155].mxu0 }
 0x3b2   : > { %v1749_v51 = vmax.f32 %v1748_v50, %v1731_v18  ;;  %v1732_v42 = vmul.f32 %v1654_v23, %v1488_v48 }
 0x3b3   : > { %v2689_v28 = vmax.f32 %v2688_v9, %v2671_v30  ;;  %v2672_v5 = vmul.f32 %v2594_v0, %v2428_v14 }
 0x3b4   : > { %v1795_v60 = vmax.f32 %v1749_v51, 0.0  ;;  %v1764_v54 = vmax.f32 %v1763_v7, %v1732_v42 }
 0x3b5   : > { %v2704_v58 = vmax.f32 %v2703_v15, %v2672_v5  ;;  %v1396_v45 = vpop.f32.mrb[156].mxu1 }
 0x3b6   : > { %v6754_v1 = vmax.f32 %v1795_v60, %v2689_v28  ;;  %v1796_v40 = vmax.f32 %v1764_v54, 0.0  ;;  %v1489_v22 = vadd.f32 %v6225_v62, %v1396_v45  ;;  %v2355_v2 = vpop.f32.mrb[156].mxu0  ;;  %v1398_v43 = vpop.f32.mrb[157].mxu1 }
 0x3b7   : > { %v2429_v34 = vadd.f32 %v2355_v2, %v6225_v62  ;;  %v2357_v3 = vpop.f32.mrb[157].mxu0  ;;  %v1399_v47 = vpop.f32.mrb[158].mxu1 }
 0x3b8   : > { %v6758_v21 = vmax.f32 %v1796_v40, %v2704_v58  ;;  %v1733_v50 = vmul.f32 %v1654_v23, %v1489_v22  ;;  %v1490_v9 = vadd.f32 %v6260_v29, %v1399_v47  ;;  %v2358_v52 = vpop.f32.mrb[158].mxu0  ;;  %v1401_v7 = vpop.f32.mrb[159].mxu1 }
 0x3b9   : > { %v2673_v15 = vmul.f32 %v2594_v0, %v2429_v34  ;;  %v2430_v12 = vadd.f32 %v2358_v52, %v6260_v29  ;;  %v2360_v10 = vpop.f32.mrb[159].mxu0 }
 0x3ba   : > { %v1779_v55 = vmax.f32 %v1778_v59, %v1733_v50  ;;  %v1734_v11 = vmul.f32 %v1654_v23, %v1490_v9 }
 0x3bb   : > { %v2719_v31 = vmax.f32 %v2718_v37, %v2673_v15  ;;  %v2674_v26 = vmul.f32 %v2594_v0, %v2430_v12 }
 0x3bc   : > { %v1797_v53 = vmax.f32 %v1779_v55, 0.0  ;;  %v1794_v20 = vmax.f32 %v1793_v16, %v1734_v11 }
 0x3bd   : > { %v2734_v36 = vmax.f32 %v2733_v19, %v2674_v26  ;;  %v5176_v4 = vpop.f32.mrb[160].mxu1 }
 0x3be   : > { %v6762_v8 = vmax.f32 %v1797_v53, %v2719_v31  ;;  %v1798_v6 = vmax.f32 %v1794_v20, 0.0  ;;  %v5224_v27 = vpop.f32.mrb[160].mxu0  ;;  %v2838_v57 = vpop.f32.mrb[161].mxu1  ;;  %v2967_v33 = vmax.f32 %v5176_v4, 0.0 }
 0x3bf   : > { %v3907_v13 = vmax.f32 %v5224_v27, 0.0  ;;  %v3778_v61 = vpop.f32.mrb[161].mxu0  ;;  %v5177_v46 = vpop.f32.mrb[162].mxu1  ;;  %v2965_v0 = vmax.f32 %v2838_v57, 0.0 }
 0x3c0   : > { %v6764_v44 = vmax.f32 %v1798_v6, %v2734_v36  ;;  %v3905_v38 = vmax.f32 %v3778_v61, 0.0  ;;  %v2968_v59 = vmax.f32 %v5177_v46, 0.0  ;;  %v5225_v23 = vpop.f32.mrb[162].mxu0  ;;  %v2841_v37 = vpop.f32.mrb[163].mxu1 }
 0x3c1   : > { %v3908_v17 = vmax.f32 %v5225_v23, 0.0  ;;  %v2966_v16 = vmax.f32 %v2841_v37, 0.0  ;;  %v3781_v19 = vpop.f32.mrb[163].mxu0 }
 0x3c2   : > { %v2998_v63 = vpack.c.bf16 %v2968_v59, %v2967_v33  ;;  %v3906_v18 = vmax.f32 %v3781_v19, 0.0 }
 0x3c3   : > { %v3938_v48 = vpack.c.bf16 %v3908_v17, %v3907_v13  ;;  %v2997_v25 = vpack.c.bf16 %v2966_v16, %v2965_v0 }
 0x3c4   : > { %v3937_v41 = vpack.c.bf16 %v3906_v18, %v3905_v38 }
 0x3c5   : > { %v5180_v30 = vpop.f32.mrb[164].mxu1  ;;  %3014 = vmatpush1.bf16.msra.mxu1 %v2997_v25 }
 0x3c6   : > { %v5228_v14 = vpop.f32.mrb[164].mxu0  ;;  %3954 = vmatpush1.bf16.msra.mxu0 %v3937_v41  ;;  %v2854_v35 = vpop.f32.mrb[165].mxu1  ;;  %3015 = vmatprep.subr.bf16.mxu1 %v5804_v32  ;;  %v2971_v5 = vmax.f32 %v5180_v30, 0.0 }
 0x3c7   : > { %v3911_v51 = vmax.f32 %v5228_v14, 0.0  ;;  %v3794_v42 = vpop.f32.mrb[165].mxu0  ;;  %v5181_v28 = vpop.f32.mrb[166].mxu1  ;;  %3955 = vmatprep.subr.bf16.mxu0 %v5804_v32  ;;  %v2969_v40 = vmax.f32 %v2854_v35, 0.0 }
 0x3c8   : > { %v3909_v60 = vmax.f32 %v3794_v42, 0.0  ;;  %v2972_v54 = vmax.f32 %v5181_v28, 0.0  ;;  %v5229_v58 = vpop.f32.mrb[166].mxu0  ;;  %v2857_v45 = vpop.f32.mrb[167].mxu1 }
 0x3c9   : > { %v3912_v22 = vmax.f32 %v5229_v58, 0.0  ;;  %v2970_v2 = vmax.f32 %v2857_v45, 0.0  ;;  %v3797_v43 = vpop.f32.mrb[167].mxu0  ;;  %3016 = vmatpush1.bf16.msra.mxu1 %v2998_v63 }
 0x3ca   : > { %v3000_v34 = vpack.c.bf16 %v2972_v54, %v2971_v5  ;;  %v3910_v3 = vmax.f32 %v3797_v43, 0.0  ;;  %3956 = vmatpush1.bf16.msra.mxu0 %v3938_v48  ;;  %3017 = vmatprep.subr.bf16.mxu1 %v5804_v32 }
 0x3cb   : > { %v3940_v47 = vpack.c.bf16 %v3912_v22, %v3911_v51  ;;  %v2999_v50 = vpack.c.bf16 %v2970_v2, %v2969_v40  ;;  %3957 = vmatprep.subr.bf16.mxu0 %v5804_v32 }
 0x3cc   : > { %v3939_v9 = vpack.c.bf16 %v3910_v3, %v3909_v60 }
 0x3cd   : > { %v5184_v52 = vpop.f32.mrb[168].mxu1  ;;  %3018 = vmatpush1.bf16.msra.mxu1 %v2999_v50 }
 0x3ce   : > { %v5232_v7 = vpop.f32.mrb[168].mxu0  ;;  %3958 = vmatpush1.bf16.msra.mxu0 %v3939_v9  ;;  %v2870_v15 = vpop.f32.mrb[169].mxu1  ;;  %3019 = vmatprep.subr.bf16.mxu1 %v5804_v32  ;;  %v2975_v11 = vmax.f32 %v5184_v52, 0.0 }
 0x3cf   : > { %v3915_v12 = vmax.f32 %v5232_v7, 0.0  ;;  %v3810_v10 = vpop.f32.mrb[169].mxu0  ;;  %v5185_v55 = vpop.f32.mrb[170].mxu1  ;;  %3959 = vmatprep.subr.bf16.mxu0 %v5804_v32  ;;  %v2973_v36 = vmax.f32 %v2870_v15, 0.0 }
 0x3d0   : > { %v3913_v31 = vmax.f32 %v3810_v10, 0.0  ;;  %v2976_v26 = vmax.f32 %v5185_v55, 0.0  ;;  %v5233_v53 = vpop.f32.mrb[170].mxu0  ;;  %v2873_v20 = vpop.f32.mrb[171].mxu1 }
 0x3d1   : > { %v3916_v4 = vmax.f32 %v5233_v53, 0.0  ;;  %v2974_v6 = vmax.f32 %v2873_v20, 0.0  ;;  %v3813_v27 = vpop.f32.mrb[171].mxu0  ;;  %3020 = vmatpush1.bf16.msra.mxu1 %v3000_v34 }
 0x3d2   : > { %v3002_v57 = vpack.c.bf16 %v2976_v26, %v2975_v11  ;;  %v3914_v13 = vmax.f32 %v3813_v27, 0.0  ;;  %3960 = vmatpush1.bf16.msra.mxu0 %v3940_v47  ;;  %3021 = vmatprep.subr.bf16.mxu1 %v5804_v32 }
 0x3d3   : > { %v3942_v61 = vpack.c.bf16 %v3916_v4, %v3915_v12  ;;  %v3001_v46 = vpack.c.bf16 %v2974_v6, %v2973_v36  ;;  %3961 = vmatprep.subr.bf16.mxu0 %v5804_v32 }
 0x3d4   : > { %v3941_v33 = vpack.c.bf16 %v3914_v13, %v3913_v31 }
 0x3d5   : > { %v5188_v38 = vpop.f32.mrb[172].mxu1  ;;  %3022 = vmatpush1.bf16.msra.mxu1 %v3001_v46 }
 0x3d6   : > { %v5236_v59 = vpop.f32.mrb[172].mxu0  ;;  %3962 = vmatpush1.bf16.msra.mxu0 %v3941_v33  ;;  %v2886_v23 = vpop.f32.mrb[173].mxu1  ;;  %3023 = vmatprep.subr.bf16.mxu1 %v5804_v32  ;;  %v2979_v16 = vmax.f32 %v5188_v38, 0.0 }
 0x3d7   : > { %v3919_v37 = vmax.f32 %v5236_v59, 0.0  ;;  %v3826_v0 = vpop.f32.mrb[173].mxu0  ;;  %v5189_v17 = vpop.f32.mrb[174].mxu1  ;;  %3963 = vmatprep.subr.bf16.mxu0 %v5804_v32  ;;  %v2977_v25 = vmax.f32 %v2886_v23, 0.0 }
 0x3d8   : > { %v3917_v19 = vmax.f32 %v3826_v0, 0.0  ;;  %v2980_v63 = vmax.f32 %v5189_v17, 0.0  ;;  %v5237_v18 = vpop.f32.mrb[174].mxu0  ;;  %v2889_v48 = vpop.f32.mrb[175].mxu1 }
 0x3d9   : > { %v3920_v41 = vmax.f32 %v5237_v18, 0.0  ;;  %v2978_v30 = vmax.f32 %v2889_v48, 0.0  ;;  %v3829_v14 = vpop.f32.mrb[175].mxu0  ;;  %3024 = vmatpush1.bf16.msra.mxu1 %v3002_v57 }
 0x3da   : > { %v3004_v35 = vpack.c.bf16 %v2980_v63, %v2979_v16  ;;  %v3918_v51 = vmax.f32 %v3829_v14, 0.0  ;;  %3964 = vmatpush1.bf16.msra.mxu0 %v3942_v61  ;;  %3025 = vmatprep.subr.bf16.mxu1 %v5804_v32 }
 0x3db   : > { %v3944_v42 = vpack.c.bf16 %v3920_v41, %v3919_v37  ;;  %v3003_v28 = vpack.c.bf16 %v2978_v30, %v2977_v25  ;;  %3965 = vmatprep.subr.bf16.mxu0 %v5804_v32 }
 0x3dc   : > { %v3943_v5 = vpack.c.bf16 %v3918_v51, %v3917_v19 }
 0x3dd   : > { %v5192_v60 = vpop.f32.mrb[176].mxu1  ;;  %3026 = vmatpush1.bf16.msra.mxu1 %v3003_v28 }
 0x3de   : > { %v5240_v54 = vpop.f32.mrb[176].mxu0  ;;  %3966 = vmatpush1.bf16.msra.mxu0 %v3943_v5  ;;  %v2902_v58 = vpop.f32.mrb[177].mxu1  ;;  %3027 = vmatprep.subr.bf16.mxu1 %v5804_v32  ;;  %v2983_v2 = vmax.f32 %v5192_v60, 0.0 }
 0x3df   : > { %v3923_v45 = vmax.f32 %v5240_v54, 0.0  ;;  %v3842_v40 = vpop.f32.mrb[177].mxu0  ;;  %v5193_v22 = vpop.f32.mrb[178].mxu1  ;;  %3967 = vmatprep.subr.bf16.mxu0 %v5804_v32  ;;  %v2981_v50 = vmax.f32 %v2902_v58, 0.0 }
 0x3e0   : > { %v3921_v43 = vmax.f32 %v3842_v40, 0.0  ;;  %v2984_v34 = vmax.f32 %v5193_v22, 0.0  ;;  %v5241_v3 = vpop.f32.mrb[178].mxu0  ;;  %v2905_v47 = vpop.f32.mrb[179].mxu1 }
 0x3e1   : > { %v3924_v9 = vmax.f32 %v5241_v3, 0.0  ;;  %v2982_v52 = vmax.f32 %v2905_v47, 0.0  ;;  %v3845_v7 = vpop.f32.mrb[179].mxu0  ;;  %3028 = vmatpush1.bf16.msra.mxu1 %v3004_v35 }
 0x3e2   : > { %v3006_v15 = vpack.c.bf16 %v2984_v34, %v2983_v2  ;;  %v3922_v12 = vmax.f32 %v3845_v7, 0.0  ;;  %3968 = vmatpush1.bf16.msra.mxu0 %v3944_v42  ;;  %3029 = vmatprep.subr.bf16.mxu1 %v5804_v32 }
 0x3e3   : > { %v3946_v10 = vpack.c.bf16 %v3924_v9, %v3923_v45  ;;  %v3005_v55 = vpack.c.bf16 %v2982_v52, %v2981_v50  ;;  %3969 = vmatprep.subr.bf16.mxu0 %v5804_v32 }
 0x3e4   : > { %v3945_v11 = vpack.c.bf16 %v3922_v12, %v3921_v43 }
 0x3e5   : > { %v5196_v31 = vpop.f32.mrb[180].mxu1  ;;  %3030 = vmatpush1.bf16.msra.mxu1 %v3005_v55 }
 0x3e6   : > { %v5244_v26 = vpop.f32.mrb[180].mxu0  ;;  %3970 = vmatpush1.bf16.msra.mxu0 %v3945_v11  ;;  %v2918_v53 = vpop.f32.mrb[181].mxu1  ;;  %3031 = vmatprep.subr.bf16.mxu1 %v5804_v32  ;;  %v2987_v6 = vmax.f32 %v5196_v31, 0.0 }
 0x3e7   : > { %v3927_v20 = vmax.f32 %v5244_v26, 0.0  ;;  %v3858_v36 = vpop.f32.mrb[181].mxu0  ;;  %v5197_v4 = vpop.f32.mrb[182].mxu1  ;;  %3971 = vmatprep.subr.bf16.mxu0 %v5804_v32  ;;  %v2985_v46 = vmax.f32 %v2918_v53, 0.0 }
 0x3e8   : > { %v3925_v27 = vmax.f32 %v3858_v36, 0.0  ;;  %v2988_v57 = vmax.f32 %v5197_v4, 0.0  ;;  %v5245_v13 = vpop.f32.mrb[182].mxu0  ;;  %v2921_v61 = vpop.f32.mrb[183].mxu1 }
 0x3e9   : > { %v3928_v33 = vmax.f32 %v5245_v13, 0.0  ;;  %v2986_v38 = vmax.f32 %v2921_v61, 0.0  ;;  %v3861_v59 = vpop.f32.mrb[183].mxu0  ;;  %3032 = vmatpush1.bf16.msra.mxu1 %v3006_v15  ;;  %v5510_v13 = vld [vmem:[#allocation8 + $0x10] ss:$8 sps:$4 sm:$0xff]  }
 0x3ea   : > { %v3008_v23 = vpack.c.bf16 %v2988_v57, %v2987_v6  ;;  %v3926_v37 = vmax.f32 %v3861_v59, 0.0  ;;  %3972 = vmatpush1.bf16.msra.mxu0 %v3946_v10  ;;  %3033 = vmatprep.subr.bf16.mxu1 %v5804_v32  ;;  %v5509_v57 = vld [vmem:[#allocation8 + $0x14] ss:$8 sps:$4 sm:$0xff]   ;;  %v5511_v61 = vld [vmem:[#allocation8 + $0x24] ss:$8 sps:$4 sm:$0xff]  }
 0x3eb   : > { %v3948_v0 = vpack.c.bf16 %v3928_v33, %v3927_v20  ;;  %v3007_v17 = vpack.c.bf16 %v2986_v38, %v2985_v46  ;;  %3973 = vmatprep.subr.bf16.mxu0 %v5804_v32  ;;  %v5512_v46 = vld [vmem:[#allocation8 + $0x20] ss:$8 sps:$4 sm:$0xff]   ;;  %v5513_v33 = vld [vmem:[#allocation8 + $0x34] ss:$8 sps:$4 sm:$0xff]   ;;  %v5515_v38 = vld [vmem:[#allocation8 + $0x44] ss:$8 sps:$4 sm:$0xff]  }
 0x3ec   : > { %v3947_v16 = vpack.c.bf16 %v3926_v37, %v3925_v27  ;;  %v5508_v27 = vld [vmem:[#allocation8] ss:$8 sps:$4 sm:$0xff]   ;;  %v5518_v37 = vld [vmem:[#allocation8 + $0x50] ss:$8 sps:$4 sm:$0xff]  }
 0x3ed   : > { %v5200_v19 = vpop.f32.mrb[184].mxu1  ;;  %3034 = vmatpush1.bf16.msra.mxu1 %v3007_v17  ;;  %v5516_v59 = vld [vmem:[#allocation8 + $0x40] ss:$8 sps:$4 sm:$0xff]  }
 0x3ee   : > { %v5248_v63 = vpop.f32.mrb[184].mxu0  ;;  %3974 = vmatpush1.bf16.msra.mxu0 %v3947_v16  ;;  %v2934_v18 = vpop.f32.mrb[185].mxu1  ;;  %3035 = vmatprep.subr.bf16.mxu1 %v5804_v32  ;;  %v2991_v30 = vmax.f32 %v5200_v19, 0.0  ;;  %v5520_v17 = vld [vmem:[#allocation8 + $0x60] ss:$8 sps:$4 sm:$0xff]  }
 0x3ef   : > { %v3931_v48 = vmax.f32 %v5248_v63, 0.0  ;;  %v3874_v25 = vpop.f32.mrb[185].mxu0  ;;  %v5201_v41 = vpop.f32.mrb[186].mxu1  ;;  %3975 = vmatprep.subr.bf16.mxu0 %v5804_v32  ;;  %v2989_v28 = vmax.f32 %v2934_v18, 0.0  ;;  %v5521_v16 = vld [vmem:[#allocation8 + $0x74] ss:$8 sps:$4 sm:$0xff]  }
 0x3f0   : > { %v3929_v14 = vmax.f32 %v3874_v25, 0.0  ;;  %v2992_v35 = vmax.f32 %v5201_v41, 0.0  ;;  %v5249_v51 = vpop.f32.mrb[186].mxu0  ;;  %v2937_v42 = vpop.f32.mrb[187].mxu1  ;;  %v5522_v19 = vld [vmem:[#allocation8 + $0x70] ss:$8 sps:$4 sm:$0xff]  }
 0x3f1   : > { %v3932_v5 = vmax.f32 %v5249_v51, 0.0  ;;  %v2990_v60 = vmax.f32 %v2937_v42, 0.0  ;;  %v3877_v54 = vpop.f32.mrb[187].mxu0  ;;  %3036 = vmatpush1.bf16.msra.mxu1 %v3008_v23  ;;  %v5517_v23 = vld [vmem:[#allocation8 + $0x54] ss:$8 sps:$4 sm:$0xff]  }
 0x3f2   : > { %v3010_v58 = vpack.c.bf16 %v2992_v35, %v2991_v30  ;;  %v3930_v45 = vmax.f32 %v3877_v54, 0.0  ;;  %3976 = vmatpush1.bf16.msra.mxu0 %v3948_v0  ;;  %3037 = vmatprep.subr.bf16.mxu1 %v5804_v32  ;;  %v5519_v0 = vld [vmem:[#allocation8 + $0x64] ss:$8 sps:$4 sm:$0xff]   ;;  %v5524_v18 = vld [vmem:[#allocation8 + $0x80] ss:$8 sps:$4 sm:$0xff]  }
 0x3f3   : > { %v3950_v40 = vpack.c.bf16 %v3932_v5, %v3931_v48  ;;  %v3009_v22 = vpack.c.bf16 %v2990_v60, %v2989_v28  ;;  %3977 = vmatprep.subr.bf16.mxu0 %v5804_v32  ;;  %v5523_v63 = vld [vmem:[#allocation8 + $0x84] ss:$8 sps:$4 sm:$0xff]   ;;  %v5525_v48 = vld [vmem:[#allocation8 + $0x94] ss:$8 sps:$4 sm:$0xff]   ;;  %v5526_v25 = vld [vmem:[#allocation8 + $0x90] ss:$8 sps:$4 sm:$0xff]  }
 0x3f4   : > { %v3949_v2 = vpack.c.bf16 %v3930_v45, %v3929_v14  ;;  %v5527_v41 = vld [vmem:[#allocation8 + $0xa4] ss:$8 sps:$4 sm:$0xff]   ;;  %v5528_v30 = vld [vmem:[#allocation8 + $0xa0] ss:$8 sps:$4 sm:$0xff]   ;;  %v5529_v14 = vld [vmem:[#allocation8 + $0xb4] ss:$8 sps:$4 sm:$0xff]  }
 0x3f5   : > { %v5204_v43 = vpop.f32.mrb[188].mxu1  ;;  %3038 = vmatpush1.bf16.msra.mxu1 %v3009_v22  ;;  %v5530_v35 = vld [vmem:[#allocation8 + $0xb0] ss:$8 sps:$4 sm:$0xff]   ;;  %v5531_v51 = vld [vmem:[#allocation8 + $0xc4] ss:$8 sps:$4 sm:$0xff]  }
 0x3f6   : > { %v5252_v34 = vpop.f32.mrb[188].mxu0  ;;  %3978 = vmatpush1.bf16.msra.mxu0 %v3949_v2  ;;  %v2950_v3 = vpop.f32.mrb[189].mxu1  ;;  %3039 = vmatprep.subr.bf16.mxu1 %v5804_v32  ;;  %v2995_v52 = vmax.f32 %v5204_v43, 0.0  ;;  %v5532_v42 = vld [vmem:[#allocation8 + $0xc0] ss:$8 sps:$4 sm:$0xff]  }
 0x3f7   : > { %v3935_v47 = vmax.f32 %v5252_v34, 0.0  ;;  %v3890_v50 = vpop.f32.mrb[189].mxu0  ;;  %v5205_v9 = vpop.f32.mrb[190].mxu1  ;;  %3979 = vmatprep.subr.bf16.mxu0 %v5804_v32  ;;  %v2993_v55 = vmax.f32 %v2950_v3, 0.0  ;;  %v5533_v28 = vld [vmem:[#allocation8 + $0xd4] ss:$8 sps:$4 sm:$0xff]  }
 0x3f8   : > { %v3933_v7 = vmax.f32 %v3890_v50, 0.0  ;;  %v2996_v15 = vmax.f32 %v5205_v9, 0.0  ;;  %v5253_v12 = vpop.f32.mrb[190].mxu0  ;;  %v2953_v10 = vpop.f32.mrb[191].mxu1  ;;  %v5534_v5 = vld [vmem:[#allocation8 + $0xd0] ss:$8 sps:$4 sm:$0xff]  }
 0x3f9   : > { %v3936_v11 = vmax.f32 %v5253_v12, 0.0  ;;  %v2994_v31 = vmax.f32 %v2953_v10, 0.0  ;;  %v3893_v26 = vpop.f32.mrb[191].mxu0  ;;  %3040 = vmatpush1.bf16.msra.mxu1 %v3010_v58  ;;  %v5535_v60 = vld [vmem:[#allocation8 + $0xe4] ss:$8 sps:$4 sm:$0xff]  }
 0x3fa   : > { %v3012_v53 = vpack.c.bf16 %v2996_v15, %v2995_v52  ;;  %v3934_v20 = vmax.f32 %v3893_v26, 0.0  ;;  %3980 = vmatpush1.bf16.msra.mxu0 %v3950_v40  ;;  %3041 = vmatprep.subr.bf16.mxu1 %v5804_v32  ;;  %v5536_v54 = vld [vmem:[#allocation8 + $0xe0] ss:$8 sps:$4 sm:$0xff]   ;;  %v5537_v58 = vld [vmem:[#allocation8 + $0xf4] ss:$8 sps:$4 sm:$0xff]  }
 0x3fb   : > { %v3952_v36 = vpack.c.bf16 %v3936_v11, %v3935_v47  ;;  %v3011_v4 = vpack.c.bf16 %v2994_v31, %v2993_v55  ;;  %3981 = vmatprep.subr.bf16.mxu0 %v5804_v32  ;;  %v5538_v45 = vld [vmem:[#allocation8 + $0xf0] ss:$8 sps:$4 sm:$0xff]   ;;  %v5539_v40 = vld [vmem:[#allocation8 + $0x104] ss:$8 sps:$4 sm:$0xff]   ;;  %v5540_v22 = vld [vmem:[#allocation8 + $0x100] ss:$8 sps:$4 sm:$0xff]  }
 0x3fc   : > { %v3951_v6 = vpack.c.bf16 %v3934_v20, %v3933_v7  ;;  %v5541_v2 = vld [vmem:[#allocation8 + $0x114] ss:$8 sps:$4 sm:$0xff]   ;;  %v5542_v43 = vld [vmem:[#allocation8 + $0x110] ss:$8 sps:$4 sm:$0xff]   ;;  %v5543_v34 = vld [vmem:[#allocation8 + $0x124] ss:$8 sps:$4 sm:$0xff]  }
 0x3fd   : > { %3042 = vmatpush1.bf16.msra.mxu1 %v3011_v4  ;;  %v5544_v3 = vld [vmem:[#allocation8 + $0x120] ss:$8 sps:$4 sm:$0xff]   ;;  %v5545_v47 = vld [vmem:[#allocation8 + $0x134] ss:$8 sps:$4 sm:$0xff]   ;;  %v5546_v50 = vld [vmem:[#allocation8 + $0x130] ss:$8 sps:$4 sm:$0xff]  }
 0x3fe   : > { %3982 = vmatpush1.bf16.msra.mxu0 %v3951_v6  ;;  %3043 = vmatprep.subr.bf16.mxu1 %v5804_v32  ;;  %v5547_v9 = vld [vmem:[#allocation8 + $0x144] ss:$8 sps:$4 sm:$0xff]   ;;  %v5548_v52 = vld [vmem:[#allocation8 + $0x140] ss:$8 sps:$4 sm:$0xff]   ;;  %v5549_v7 = vld [vmem:[#allocation8 + $0x154] ss:$8 sps:$4 sm:$0xff]  }
 0x3ff   : > { %3983 = vmatprep.subr.bf16.mxu0 %v5804_v32  ;;  %v5514_v32 = vld [vmem:[#allocation8 + $0x30] ss:$8 sps:$4 sm:$0xff]   ;;  %v5551_v12 = vld [vmem:[#allocation8 + $0x164] ss:$8 sps:$4 sm:$0xff]   ;;  %v5552_v10 = vld [vmem:[#allocation8 + $0x160] ss:$8 sps:$4 sm:$0xff]  }
 0x400   : > { %v5550_v15 = vld [vmem:[#allocation8 + $0x150] ss:$8 sps:$4 sm:$0xff]   ;;  %v5553_v55 = vld [vmem:[#allocation8 + $0x174] ss:$8 sps:$4 sm:$0xff]   ;;  %v5555_v31 = vld [vmem:[#allocation8 + $0x184] ss:$8 sps:$4 sm:$0xff]  }
 0x401   : > { %3044 = vmatpush1.bf16.msra.mxu1 %v3012_v53  ;;  %v5554_v11 = vld [vmem:[#allocation8 + $0x170] ss:$8 sps:$4 sm:$0xff]   ;;  %v5556_v26 = vld [vmem:[#allocation8 + $0x180] ss:$8 sps:$4 sm:$0xff]   ;;  %v5557_v53 = vld [vmem:[#allocation8 + $0x194] ss:$8 sps:$4 sm:$0xff]  }
 0x402   : > { %3984 = vmatpush1.bf16.msra.mxu0 %v3952_v36  ;;  %v5558_v20 = vld [vmem:[#allocation8 + $0x190] ss:$8 sps:$4 sm:$0xff]   ;;  %v5559_v36 = vld [vmem:[#allocation8 + $0x1a4] ss:$8 sps:$4 sm:$0xff]   ;;  %v5560_v4 = vld [vmem:[#allocation8 + $0x1a0] ss:$8 sps:$4 sm:$0xff]  }
 0x403   : > { %v6797_v6 = vld [vmem:[%s6093_s28 + $0x10] sm:$0xff]  }
 0x404   : > { %3046 = vmatmul.mubr.bf16.vlgmr.msra.gmra.mrb[192].mxu1 %v5508_v27 }
 0x405   : > { %3986 = vmatmul.mubr.bf16.vlgmr.msra.gmra.mrb[192].mxu0 %v5508_v27  ;;  %3053 = vmatprep.mubr.bf16.mxu1 %v5509_v57  ;;  %v5561_v27 = vld [vmem:[#allocation8 + $0x1b4] ss:$8 sps:$4 sm:$0xff]  }
 0x406   : > { %3993 = vmatprep.mubr.bf16.mxu0 %v5509_v57  ;;  %v6800_v57 = vld [vmem:[%s6093_s28 + $0x18] sm:$0xff]  }
 0x40c   : > { %3054 = vmatmul.mubr.bf16.gmra.mrb[196].mxu1 %v5510_v13 }
 0x40d   : > { %3994 = vmatmul.mubr.bf16.gmra.mrb[196].mxu0 %v5510_v13  ;;  %3061 = vmatprep.mubr.bf16.mxu1 %v5511_v61 }
 0x40e   : > { %4001 = vmatprep.mubr.bf16.mxu0 %v5511_v61  ;;  %v6803_v61 = vunpack.c.l.bf16 %v6797_v6 }
 0x414   : > { %3062 = vmatmul.mubr.bf16.gmra.mrb[200].mxu1 %v5512_v46 }
 0x415   : > { %4002 = vmatmul.mubr.bf16.gmra.mrb[200].mxu0 %v5512_v46  ;;  %3069 = vmatprep.mubr.bf16.mxu1 %v5513_v33 }
 0x416   : > { %4009 = vmatprep.mubr.bf16.mxu0 %v5513_v33 }
 0x41c   : > { %3070 = vmatmul.mubr.bf16.gmra.mrb[204].mxu1 %v5514_v32 }
 0x41d   : > { %4010 = vmatmul.mubr.bf16.gmra.mrb[204].mxu0 %v5514_v32  ;;  %3077 = vmatprep.mubr.bf16.mxu1 %v5515_v38  ;;  %v6806_v32 = vunpack.c.l.bf16 %v6800_v57 }
 0x41e   : > { %4017 = vmatprep.mubr.bf16.mxu0 %v5515_v38 }
 0x424   : > { %3078 = vmatmul.mubr.bf16.gmra.mrb[208].mxu1 %v5516_v59 }
 0x425   : > { %4018 = vmatmul.mubr.bf16.gmra.mrb[208].mxu0 %v5516_v59  ;;  %3085 = vmatprep.mubr.bf16.mxu1 %v5517_v23 }
 0x426   : > { %4025 = vmatprep.mubr.bf16.mxu0 %v5517_v23 }
 0x42c   : > { %3086 = vmatmul.mubr.bf16.gmra.mrb[212].mxu1 %v5518_v37 }
 0x42d   : > { %4026 = vmatmul.mubr.bf16.gmra.mrb[212].mxu0 %v5518_v37  ;;  %3093 = vmatprep.mubr.bf16.mxu1 %v5519_v0 }
 0x42e   : > { %4033 = vmatprep.mubr.bf16.mxu0 %v5519_v0 }
 0x434   : > { %3094 = vmatmul.mubr.bf16.gmra.mrb[216].mxu1 %v5520_v17 }
 0x435   : > { %4034 = vmatmul.mubr.bf16.gmra.mrb[216].mxu0 %v5520_v17  ;;  %3101 = vmatprep.mubr.bf16.mxu1 %v5521_v16  ;;  %v3380_v17 = vrot.slane %v6803_v61, %v6184_v24 }
 0x436   : > { %4041 = vmatprep.mubr.bf16.mxu0 %v5521_v16  ;;  %v5562_v16 = vld [vmem:[#allocation8 + $0x1b0] ss:$8 sps:$4 sm:$0xff]  }
 0x43c   : > { %3102 = vmatmul.mubr.bf16.gmra.mrb[220].mxu1 %v5522_v19 }
 0x43d   : > { %4042 = vmatmul.mubr.bf16.gmra.mrb[220].mxu0 %v5522_v19  ;;  %3109 = vmatprep.mubr.bf16.mxu1 %v5523_v63  ;;  %v4320_v19 = vrot.slane %v6806_v32, %v6184_v24 }
 0x43e   : > { %4049 = vmatprep.mubr.bf16.mxu0 %v5523_v63  ;;  %v5563_v63 = vld [vmem:[#allocation8 + $0x1c4] ss:$8 sps:$4 sm:$0xff]  }
 0x444   : > { %3110 = vmatmul.mubr.bf16.gmra.mrb[224].mxu1 %v5524_v18 }
 0x445   : > { %4050 = vmatmul.mubr.bf16.gmra.mrb[224].mxu0 %v5524_v18  ;;  %3117 = vmatprep.mubr.bf16.mxu1 %v5525_v48  ;;  %v3388_v18 = vcombine.high %v3380_v17, %v3380_v17 }
 0x446   : > { %4057 = vmatprep.mubr.bf16.mxu0 %v5525_v48 }
 0x44c   : > { %3118 = vmatmul.mubr.bf16.gmra.mrb[228].mxu1 %v5526_v25 }
 0x44d   : > { %4058 = vmatmul.mubr.bf16.gmra.mrb[228].mxu0 %v5526_v25  ;;  %3125 = vmatprep.mubr.bf16.mxu1 %v5527_v41  ;;  %v4328_v25 = vcombine.high %v4320_v19, %v4320_v19 }
 0x44e   : > { %4065 = vmatprep.mubr.bf16.mxu0 %v5527_v41 }
 0x454   : > { %3126 = vmatmul.mubr.bf16.gmra.mrb[232].mxu1 %v5528_v30 }
 0x455   : > { %4066 = vmatmul.mubr.bf16.gmra.mrb[232].mxu0 %v5528_v30  ;;  %3133 = vmatprep.mubr.bf16.mxu1 %v5529_v14 }
 0x456   : > { %4073 = vmatprep.mubr.bf16.mxu0 %v5529_v14 }
 0x45c   : > { %3134 = vmatmul.mubr.bf16.gmra.mrb[236].mxu1 %v5530_v35 }
 0x45d   : > { %4074 = vmatmul.mubr.bf16.gmra.mrb[236].mxu0 %v5530_v35  ;;  %3141 = vmatprep.mubr.bf16.mxu1 %v5531_v51 }
 0x45e   : > { %4081 = vmatprep.mubr.bf16.mxu0 %v5531_v51  ;;  %v6813_v51 = vrot.slane %v3380_v17, %v6184_v24 }
 0x464   : > { %3142 = vmatmul.mubr.bf16.gmra.mrb[240].mxu1 %v5532_v42 }
 0x465   : > { %4082 = vmatmul.mubr.bf16.gmra.mrb[240].mxu0 %v5532_v42  ;;  %3149 = vmatprep.mubr.bf16.mxu1 %v5533_v28 }
 0x466   : > { %4089 = vmatprep.mubr.bf16.mxu0 %v5533_v28 }
 0x46c   : > { %3150 = vmatmul.mubr.bf16.gmra.mrb[244].mxu1 %v5534_v5 }
 0x46d   : > { %4090 = vmatmul.mubr.bf16.gmra.mrb[244].mxu0 %v5534_v5  ;;  %3157 = vmatprep.mubr.bf16.mxu1 %v5535_v60  ;;  %v6816_v5 = vrot.slane %v3388_v18, %v6184_v24 }
 0x46e   : > { %4097 = vmatprep.mubr.bf16.mxu0 %v5535_v60  ;;  %v6819_v60 = vrot.slane %v4320_v19, %v6184_v24 }
 0x474   : > { %3158 = vmatmul.mubr.bf16.gmra.mrb[248].mxu1 %v5536_v54 }
 0x475   : > { %4098 = vmatmul.mubr.bf16.gmra.mrb[248].mxu0 %v5536_v54  ;;  %3165 = vmatprep.mubr.bf16.mxu1 %v5537_v58 }
 0x476   : > { %4105 = vmatprep.mubr.bf16.mxu0 %v5537_v58  ;;  %v6822_v58 = vrot.slane %v4328_v25, %v6184_v24 }
 0x47c   : > { %3166 = vmatmul.mubr.bf16.gmra.mrb[252].mxu1 %v5538_v45 }
 0x47d   : > { %4106 = vmatmul.mubr.bf16.gmra.mrb[252].mxu0 %v5538_v45  ;;  %3173 = vmatprep.mubr.bf16.mxu1 %v5539_v40  ;;  %v5564_v45 = vld [vmem:[#allocation8 + $0x1c0] ss:$8 sps:$4 sm:$0xff]  }
 0x47e   : > { %4113 = vmatprep.mubr.bf16.mxu0 %v5539_v40  ;;  %v5565_v40 = vld [vmem:[#allocation8 + $0x1d4] ss:$8 sps:$4 sm:$0xff]  }
 0x484   : > { %3174 = vmatmul.mubr.bf16.gmra.mrb[0].mxu1 %v5540_v22 }
 0x485   : > { %4114 = vmatmul.mubr.bf16.gmra.mrb[0].mxu0 %v5540_v22  ;;  %3181 = vmatprep.mubr.bf16.mxu1 %v5541_v2 }
 0x486   : > { %4121 = vmatprep.mubr.bf16.mxu0 %v5541_v2  ;;  %v3474_v2 = vrot.slane %v6813_v51, %v6198_v49 }
 0x48c   : > { %3182 = vmatmul.mubr.bf16.gmra.mrb[4].mxu1 %v5542_v43 }
 0x48d   : > { %4122 = vmatmul.mubr.bf16.gmra.mrb[4].mxu0 %v5542_v43  ;;  %3189 = vmatprep.mubr.bf16.mxu1 %v5543_v34  ;;  %v3478_v43 = vrot.slane %v6816_v5, %v6198_v49 }
 0x48e   : > { %4129 = vmatprep.mubr.bf16.mxu0 %v5543_v34 }
 0x494   : > { %3190 = vmatmul.mubr.bf16.gmra.mrb[8].mxu1 %v5544_v3 }
 0x495   : > { %4130 = vmatmul.mubr.bf16.gmra.mrb[8].mxu0 %v5544_v3  ;;  %3197 = vmatprep.mubr.bf16.mxu1 %v5545_v47  ;;  %v4414_v3 = vrot.slane %v6819_v60, %v6198_v49 }
 0x496   : > { %4137 = vmatprep.mubr.bf16.mxu0 %v5545_v47 }
 0x49c   : > { %3198 = vmatmul.mubr.bf16.gmra.mrb[12].mxu1 %v5546_v50 }
 0x49d   : > { %4138 = vmatmul.mubr.bf16.gmra.mrb[12].mxu0 %v5546_v50  ;;  %3205 = vmatprep.mubr.bf16.mxu1 %v5547_v9  ;;  %v4418_v50 = vrot.slane %v6822_v58, %v6198_v49 }
 0x49e   : > { %4145 = vmatprep.mubr.bf16.mxu0 %v5547_v9 }
 0x4a4   : > { %3206 = vmatmul.mubr.bf16.gmra.mrb[16].mxu1 %v5548_v52 }
 0x4a5   : > { %4146 = vmatmul.mubr.bf16.gmra.mrb[16].mxu0 %v5548_v52  ;;  %3213 = vmatprep.mubr.bf16.mxu1 %v5549_v7 }
 0x4a6   : > { %4153 = vmatprep.mubr.bf16.mxu0 %v5549_v7 }
 0x4ac   : > { %3214 = vmatmul.mubr.bf16.gmra.mrb[20].mxu1 %v5550_v15 }
 0x4ad   : > { %4154 = vmatmul.mubr.bf16.gmra.mrb[20].mxu0 %v5550_v15  ;;  %3221 = vmatprep.mubr.bf16.mxu1 %v5551_v12 }
 0x4ae   : > { %4161 = vmatprep.mubr.bf16.mxu0 %v5551_v12 }
 0x4b4   : > { %3222 = vmatmul.mubr.bf16.gmra.mrb[24].mxu1 %v5552_v10 }
 0x4b5   : > { %4162 = vmatmul.mubr.bf16.gmra.mrb[24].mxu0 %v5552_v10  ;;  %3229 = vmatprep.mubr.bf16.mxu1 %v5553_v55 }
 0x4b6   : > { %4169 = vmatprep.mubr.bf16.mxu0 %v5553_v55 }
 0x4bc   : > { %3230 = vmatmul.mubr.bf16.gmra.mrb[28].mxu1 %v5554_v11 }
 0x4bd   : > { %4170 = vmatmul.mubr.bf16.gmra.mrb[28].mxu0 %v5554_v11  ;;  %3237 = vmatprep.mubr.bf16.mxu1 %v5555_v31 }
 0x4be   : > { %4177 = vmatprep.mubr.bf16.mxu0 %v5555_v31 }
 0x4c4   : > { %3238 = vmatmul.mubr.bf16.gmra.mrb[32].mxu1 %v5556_v26 }
 0x4c5   : > { %4178 = vmatmul.mubr.bf16.gmra.mrb[32].mxu0 %v5556_v26  ;;  %3245 = vmatprep.mubr.bf16.mxu1 %v5557_v53 }
 0x4c6   : > { %4185 = vmatprep.mubr.bf16.mxu0 %v5557_v53 }
 0x4cc   : > { %3246 = vmatmul.mubr.bf16.gmra.mrb[36].mxu1 %v5558_v20 }
 0x4cd   : > { %4186 = vmatmul.mubr.bf16.gmra.mrb[36].mxu0 %v5558_v20  ;;  %3253 = vmatprep.mubr.bf16.mxu1 %v5559_v36 }
 0x4ce   : > { %4193 = vmatprep.mubr.bf16.mxu0 %v5559_v36 }
 0x4d4   : > { %3254 = vmatmul.mubr.bf16.gmra.mrb[40].mxu1 %v5560_v4 }
 0x4d5   : > { %4194 = vmatmul.mubr.bf16.gmra.mrb[40].mxu0 %v5560_v4  ;;  %3261 = vmatprep.mubr.bf16.mxu1 %v5561_v27 }
 0x4d6   : > { %4201 = vmatprep.mubr.bf16.mxu0 %v5561_v27 }
 0x4d7   : > { %v3047_v13 = vpop.f32.mrb[192].mxu1 }
 0x4d8   : > { %v3987_v46 = vpop.f32.mrb[192].mxu0  ;;  %v3049_v33 = vpop.f32.mrb[193].mxu1  ;;  %v3307_v22 = vadd.f32 %v3047_v13, %v6193_v39 }
 0x4d9   : > { %v3989_v38 = vpop.f32.mrb[193].mxu0  ;;  %v3050_v59 = vpop.f32.mrb[194].mxu1  ;;  %v4247_v34 = vadd.f32 %v3987_v46, %v6193_v39 }
 0x4da   : > { %v3990_v23 = vpop.f32.mrb[194].mxu0  ;;  %v3052_v37 = vpop.f32.mrb[195].mxu1  ;;  %v3308_v9 = vadd.f32 %v3050_v59, %v6209_v56  ;;  %v6838_v31 = vmul.f32 %v3474_v2, %v3307_v22 }
 0x4db   : > { %v3992_v0 = vpop.f32.mrb[195].mxu0  ;;  %v4248_v12 = vadd.f32 %v3990_v23, %v6209_v56  ;;  %v6843_v4 = vmul.f32 %v4414_v3, %v4247_v34  ;;  %v5566_v23 = vld [vmem:[#allocation8 + $0x1d0] ss:$8 sps:$4 sm:$0xff]  }
 0x4dc   : > { %3262 = vmatmul.mubr.bf16.gmra.mrb[44].mxu1 %v5562_v16  ;;  %v6848_v33 = vmul.f32 %v3474_v2, %v3308_v9 }
 0x4dd   : > { %4202 = vmatmul.mubr.bf16.gmra.mrb[44].mxu0 %v5562_v16  ;;  %3269 = vmatprep.mubr.bf16.mxu1 %v5563_v63  ;;  %v6854_v37 = vmul.f32 %v4414_v3, %v4248_v12  ;;  %v5567_v16 = vld [vmem:[#allocation8 + $0x1e4] ss:$8 sps:$4 sm:$0xff]  }
 0x4de   : > { %4209 = vmatprep.mubr.bf16.mxu0 %v5563_v63 }
 0x4df   : > { %v3055_v48 = vpop.f32.mrb[196].mxu1 }
 0x4e0   : > { %v3995_v41 = vpop.f32.mrb[196].mxu0  ;;  %v3057_v30 = vpop.f32.mrb[197].mxu1  ;;  %v3309_v19 = vadd.f32 %v3055_v48, %v6225_v62 }
 0x4e1   : > { %v3997_v14 = vpop.f32.mrb[197].mxu0  ;;  %v3058_v35 = vpop.f32.mrb[198].mxu1  ;;  %v4249_v18 = vadd.f32 %v3995_v41, %v6225_v62 }
 0x4e2   : > { %v3998_v42 = vpop.f32.mrb[198].mxu0  ;;  %v3060_v28 = vpop.f32.mrb[199].mxu1  ;;  %v3310_v14 = vadd.f32 %v3058_v35, %v6260_v29  ;;  %v3418_v35 = vcombine.high %v6813_v51, %v6813_v51 }
 0x4e3   : > { %v4000_v54 = vpop.f32.mrb[199].mxu0 }
 0x4e4   : > { %3270 = vmatmul.mubr.bf16.gmra.mrb[48].mxu1 %v5564_v45 }
 0x4e5   : > { %4210 = vmatmul.mubr.bf16.gmra.mrb[48].mxu0 %v5564_v45  ;;  %3277 = vmatprep.mubr.bf16.mxu1 %v5565_v40 }
 0x4e6   : > { %4217 = vmatprep.mubr.bf16.mxu0 %v5565_v40  ;;  %v4250_v40 = vadd.f32 %v3998_v42, %v6260_v29 }
 0x4e7   : > { %v3063_v47 = vpop.f32.mrb[200].mxu1 }
 0x4e8   : > { %v3311_v52 = vadd.f32 %v3063_v47, %v6193_v39  ;;  %v4003_v7 = vpop.f32.mrb[200].mxu0  ;;  %v3065_v15 = vpop.f32.mrb[201].mxu1  ;;  %v6870_v47 = vmul.f32 %v3474_v2, %v3309_v19 }
 0x4e9   : > { %v4251_v10 = vadd.f32 %v4003_v7, %v6193_v39  ;;  %v4005_v55 = vpop.f32.mrb[201].mxu0  ;;  %v3066_v11 = vpop.f32.mrb[202].mxu1  ;;  %v6877_v15 = vmul.f32 %v4414_v3, %v4249_v18 }
 0x4ea   : > { %v6840_v26 = vmul.f32 %v3478_v43, %v3311_v52  ;;  %v3312_v53 = vadd.f32 %v3066_v11, %v6209_v56  ;;  %v4006_v20 = vpop.f32.mrb[202].mxu0  ;;  %v3068_v36 = vpop.f32.mrb[203].mxu1  ;;  %v4358_v55 = vcombine.high %v6819_v60, %v6819_v60  ;;  %v3554_v11 = vmul.f32 %v3474_v2, %v3310_v14 }
 0x4eb   : > { %v6845_v27 = vmul.f32 %v4418_v50, %v4251_v10  ;;  %v4252_v13 = vadd.f32 %v4006_v20, %v6209_v56  ;;  %v4008_v46 = vpop.f32.mrb[203].mxu0  ;;  %v5568_v36 = vld [vmem:[#allocation8 + $0x1e0] ss:$8 sps:$4 sm:$0xff]  }
 0x4ec   : > { %v3615_v38 = vmax.f32 %v6838_v31, %v6840_v26  ;;  %v6852_v59 = vmul.f32 %v3478_v43, %v3312_v53  ;;  %3278 = vmatmul.mubr.bf16.gmra.mrb[52].mxu1 %v5566_v23  ;;  %v4422_v2 = vrot.slane %v4358_v55, %v6198_v49 }
 0x4ed   : > { %v4555_v0 = vmax.f32 %v6843_v4, %v6845_v27  ;;  %v6858_v17 = vmul.f32 %v4418_v50, %v4252_v13  ;;  %4218 = vmatmul.mubr.bf16.gmra.mrb[52].mxu0 %v5566_v23  ;;  %3285 = vmatprep.mubr.bf16.mxu1 %v5567_v16  ;;  %v4494_v13 = vmul.f32 %v4414_v3, %v4250_v40 }
 0x4ee   : > { %v3630_v63 = vmax.f32 %v6848_v33, %v6852_v59  ;;  %4225 = vmatprep.mubr.bf16.mxu0 %v5567_v16  ;;  %v5569_v33 = vld [vmem:[#allocation8 + $0x1f4] ss:$8 sps:$4 sm:$0xff]   ;;  %v3482_v23 = vrot.slane %v3418_v35, %v6198_v49 }
 0x4ef   : > { %v4570_v25 = vmax.f32 %v6854_v37, %v6858_v17  ;;  %v3071_v30 = vpop.f32.mrb[204].mxu1 }
 0x4f0   : > { %v3313_v28 = vadd.f32 %v3071_v30, %v6225_v62  ;;  %v4011_v54 = vpop.f32.mrb[204].mxu0  ;;  %v3073_v45 = vpop.f32.mrb[205].mxu1 }
 0x4f1   : > { %v4253_v48 = vadd.f32 %v4011_v54, %v6225_v62  ;;  %v4013_v22 = vpop.f32.mrb[205].mxu0  ;;  %v3074_v34 = vpop.f32.mrb[206].mxu1 }
 0x4f2   : > { %v6872_v9 = vmul.f32 %v3478_v43, %v3313_v28  ;;  %v3314_v41 = vadd.f32 %v3074_v34, %v6260_v29  ;;  %v4014_v52 = vpop.f32.mrb[206].mxu0  ;;  %v3076_v7 = vpop.f32.mrb[207].mxu1  ;;  %v5570_v34 = vld [vmem:[#allocation8 + $0x1f0] ss:$8 sps:$4 sm:$0xff]  }
 0x4f3   : > { %v4497_v12 = vmul.f32 %v4418_v50, %v4253_v48  ;;  %v4254_v42 = vadd.f32 %v4014_v52, %v6260_v29  ;;  %v4016_v10 = vpop.f32.mrb[207].mxu0 }
 0x4f4   : > { %v3645_v53 = vmax.f32 %v6870_v47, %v6872_v9  ;;  %v3558_v20 = vmul.f32 %v3478_v43, %v3314_v41  ;;  %3286 = vmatmul.mubr.bf16.gmra.mrb[56].mxu1 %v5568_v36 }
 0x4f5   : > { %v4585_v46 = vmax.f32 %v6877_v15, %v4497_v12  ;;  %v4498_v51 = vmul.f32 %v4418_v50, %v4254_v42  ;;  %4226 = vmatmul.mubr.bf16.gmra.mrb[56].mxu0 %v5568_v36  ;;  %3293 = vmatprep.mubr.bf16.mxu1 %v5569_v33 }
 0x4f6   : > { %v3660_v59 = vmax.f32 %v3554_v11, %v3558_v20  ;;  %4233 = vmatprep.mubr.bf16.mxu0 %v5569_v33  ;;  %v4360_v11 = vcombine.high %v6822_v58, %v6822_v58 }
 0x4f7   : > { %v4600_v37 = vmax.f32 %v4494_v13, %v4498_v51  ;;  %v3079_v60 = vpop.f32.mrb[208].mxu1 }
 0x4f8   : > { %v3315_v17 = vadd.f32 %v3079_v60, %v6193_v39  ;;  %v4019_v43 = vpop.f32.mrb[208].mxu0  ;;  %v3081_v16 = vpop.f32.mrb[209].mxu1 }
 0x4f9   : > { %v4255_v3 = vadd.f32 %v4019_v43, %v6193_v39  ;;  %v4021_v19 = vpop.f32.mrb[209].mxu0  ;;  %v3082_v18 = vpop.f32.mrb[210].mxu1  ;;  %v4426_v43 = vrot.slane %v4360_v11, %v6198_v49 }
 0x4fa   : > { %v3559_v50 = vmul.f32 %v3482_v23, %v3315_v17  ;;  %v3316_v30 = vadd.f32 %v3082_v18, %v6209_v56  ;;  %v4022_v14 = vpop.f32.mrb[210].mxu0  ;;  %v3084_v28 = vpop.f32.mrb[211].mxu1 }
 0x4fb   : > { %v4499_v54 = vmul.f32 %v4422_v2, %v4255_v3  ;;  %v4256_v45 = vadd.f32 %v4022_v14, %v6209_v56  ;;  %v4024_v40 = vpop.f32.mrb[211].mxu0  ;;  %v4313_v28 = vcombine.high %v6806_v32, %v6806_v32 }
 0x4fc   : > { %v6894_v48 = vmax.f32 %v3615_v38, %v3559_v50  ;;  %v3560_v22 = vmul.f32 %v3482_v23, %v3316_v30  ;;  %3294 = vmatmul.mubr.bf16.gmra.mrb[60].mxu1 %v5570_v34 }
 0x4fd   : > { %v6899_v47 = vmax.f32 %v4555_v0, %v4499_v54  ;;  %v4500_v9 = vmul.f32 %v4422_v2, %v4256_v45  ;;  %4234 = vmatmul.mubr.bf16.gmra.mrb[60].mxu0 %v5570_v34 }
 0x4fe   : > { %v6901_v41 = vmax.f32 %v3630_v63, %v3560_v22  ;;  %v3420_v63 = vcombine.high %v6816_v5, %v6816_v5 }
 0x4ff   : > { %v6903_v52 = vmax.f32 %v4570_v25, %v4500_v9  ;;  %v3087_v7 = vpop.f32.mrb[212].mxu1 }
 0x500   : > { %v3317_v35 = vadd.f32 %v3087_v7, %v6225_v62  ;;  %v4027_v31 = vpop.f32.mrb[212].mxu0  ;;  %v3089_v26 = vpop.f32.mrb[213].mxu1  ;;  %v3486_v60 = vrot.slane %v3420_v63, %v6198_v49 }
 0x501   : > { %v4257_v38 = vadd.f32 %v4027_v31, %v6225_v62  ;;  %v4029_v15 = vpop.f32.mrb[213].mxu0  ;;  %v3090_v12 = vpop.f32.mrb[214].mxu1 }
 0x502   : > { %v3561_v42 = vmul.f32 %v3482_v23, %v3317_v35  ;;  %v3318_v4 = vadd.f32 %v3090_v12, %v6260_v29  ;;  %v4030_v27 = vpop.f32.mrb[214].mxu0  ;;  %v3092_v0 = vpop.f32.mrb[215].mxu1  ;;  %v4327_v35 = vrot.slane %v4313_v28, %v6184_v24 }
 0x503   : > { %v4501_v10 = vmul.f32 %v4422_v2, %v4257_v38  ;;  %v4258_v25 = vadd.f32 %v4030_v27, %v6260_v29  ;;  %v4032_v55 = vpop.f32.mrb[215].mxu0 }
 0x504   : > { %v6913_v20 = vmax.f32 %v3645_v53, %v3561_v42  ;;  %v3562_v36 = vmul.f32 %v3482_v23, %v3318_v4  ;;  %v6945_v63 = vrot.slane %v4327_v35, %v6184_v24 }
 0x505   : > { %v6915_v13 = vmax.f32 %v4585_v46, %v4501_v10  ;;  %v4502_v51 = vmul.f32 %v4422_v2, %v4258_v25 }
 0x506   : > { %v6917_v33 = vmax.f32 %v3660_v59, %v3562_v36 }
 0x507   : > { %v6920_v17 = vmax.f32 %v4600_v37, %v4502_v51  ;;  %v3095_v5 = vpop.f32.mrb[216].mxu1  ;;  %v3373_v37 = vcombine.high %v6803_v61, %v6803_v61 }
 0x508   : > { %v3319_v16 = vadd.f32 %v3095_v5, %v6193_v39  ;;  %v4035_v3 = vpop.f32.mrb[216].mxu0  ;;  %v3097_v19 = vpop.f32.mrb[217].mxu1 }
 0x509   : > { %v4259_v58 = vadd.f32 %v4035_v3, %v6193_v39  ;;  %v4037_v53 = vpop.f32.mrb[217].mxu0  ;;  %v3098_v23 = vpop.f32.mrb[218].mxu1  ;;  %v3387_v9 = vrot.slane %v3373_v37, %v6184_v24  ;;  %v4430_v3 = vrot.slane %v6945_v63, %v6198_v49 }
 0x50a   : > { %v3563_v46 = vmul.f32 %v3486_v60, %v3319_v16  ;;  %v3320_v2 = vadd.f32 %v3098_v23, %v6209_v56  ;;  %v4038_v59 = vpop.f32.mrb[218].mxu0  ;;  %v3100_v18 = vpop.f32.mrb[219].mxu1 }
 0x50b   : > { %v4503_v50 = vmul.f32 %v4426_v43, %v4259_v58  ;;  %v4260_v30 = vadd.f32 %v4038_v59, %v6209_v56  ;;  %v4040_v14 = vpop.f32.mrb[219].mxu0  ;;  %v6941_v4 = vrot.slane %v3387_v9, %v6184_v24  ;;  %v3389_v28 = vcombine.high %v3387_v9, %v3387_v9 }
 0x50c   : > { %v3617_v54 = vmax.f32 %v6894_v48, %v3563_v46  ;;  %v3564_v45 = vmul.f32 %v3486_v60, %v3320_v2 }
 0x50d   : > { %v4557_v40 = vmax.f32 %v6899_v47, %v4503_v50  ;;  %v4504_v22 = vmul.f32 %v4426_v43, %v4260_v30  ;;  %v3490_v51 = vrot.slane %v6941_v4, %v6198_v49 }
 0x50e   : > { %v3632_v34 = vmax.f32 %v6901_v41, %v3564_v45 }
 0x50f   : > { %v4572_v7 = vmax.f32 %v6903_v52, %v4504_v22  ;;  %v3103_v61 = vpop.f32.mrb[220].mxu1 }
 0x510   : > { %v3321_v31 = vadd.f32 %v3103_v61, %v6225_v62  ;;  %v4043_v26 = vpop.f32.mrb[220].mxu0  ;;  %v3105_v38 = vpop.f32.mrb[221].mxu1  ;;  %v4329_v61 = vcombine.high %v4327_v35, %v4327_v35 }
 0x511   : > { %v4261_v32 = vadd.f32 %v4043_v26, %v6225_v62  ;;  %v4045_v48 = vpop.f32.mrb[221].mxu0  ;;  %v3106_v15 = vpop.f32.mrb[222].mxu1 }
 0x512   : > { %v3565_v12 = vmul.f32 %v3486_v60, %v3321_v31  ;;  %v3322_v47 = vadd.f32 %v3106_v15, %v6260_v29  ;;  %v4046_v42 = vpop.f32.mrb[222].mxu0  ;;  %v3108_v41 = vpop.f32.mrb[223].mxu1 }
 0x513   : > { %v4505_v52 = vmul.f32 %v4426_v43, %v4261_v32  ;;  %v4262_v27 = vadd.f32 %v4046_v42, %v6260_v29  ;;  %v4048_v0 = vpop.f32.mrb[223].mxu0  ;;  %v6975_v42 = vrot.slane %v4329_v61, %v6184_v24 }
 0x514   : > { %v3647_v10 = vmax.f32 %v6913_v20, %v3565_v12  ;;  %v3566_v25 = vmul.f32 %v3486_v60, %v3322_v47 }
 0x515   : > { %v4587_v55 = vmax.f32 %v6915_v13, %v4505_v52  ;;  %v4506_v11 = vmul.f32 %v4426_v43, %v4262_v27 }
 0x516   : > { %v3662_v36 = vmax.f32 %v6917_v33, %v3566_v25 }
 0x517   : > { %v4602_v5 = vmax.f32 %v6920_v17, %v4506_v11  ;;  %v3111_v16 = vpop.f32.mrb[224].mxu1 }
 0x518   : > { %v3323_v19 = vadd.f32 %v3111_v16, %v6193_v39  ;;  %v4051_v58 = vpop.f32.mrb[224].mxu0  ;;  %v3113_v53 = vpop.f32.mrb[225].mxu1 }
 0x519   : > { %v4263_v20 = vadd.f32 %v4051_v58, %v6193_v39  ;;  %v4053_v60 = vpop.f32.mrb[225].mxu0  ;;  %v3114_v13 = vpop.f32.mrb[226].mxu1  ;;  %v4434_v58 = vrot.slane %v6975_v42, %v6198_v49 }
 0x51a   : > { %v3567_v43 = vmul.f32 %v3490_v51, %v3323_v19  ;;  %v3324_v33 = vadd.f32 %v3114_v13, %v6209_v56  ;;  %v4054_v23 = vpop.f32.mrb[226].mxu0  ;;  %v3116_v46 = vpop.f32.mrb[227].mxu1 }
 0x51b   : > { %v4507_v2 = vmul.f32 %v4430_v3, %v4263_v20  ;;  %v4264_v17 = vadd.f32 %v4054_v23, %v6209_v56  ;;  %v4056_v59 = vpop.f32.mrb[227].mxu0 }
 0x51c   : > { %v6959_v18 = vmax.f32 %v3617_v54, %v3567_v43  ;;  %v3568_v37 = vmul.f32 %v3490_v51, %v3324_v33 }
 0x51d   : > { %v6961_v50 = vmax.f32 %v4557_v40, %v4507_v2  ;;  %v4508_v30 = vmul.f32 %v4430_v3, %v4264_v17 }
 0x51e   : > { %v6963_v14 = vmax.f32 %v3632_v34, %v3568_v37  ;;  %v6971_v34 = vrot.slane %v3389_v28, %v6184_v24 }
 0x51f   : > { %v6965_v45 = vmax.f32 %v4572_v7, %v4508_v30  ;;  %v3119_v22 = vpop.f32.mrb[228].mxu1 }
 0x520   : > { %v3325_v31 = vadd.f32 %v3119_v22, %v6225_v62  ;;  %v4059_v26 = vpop.f32.mrb[228].mxu0  ;;  %v3121_v38 = vpop.f32.mrb[229].mxu1  ;;  %v3494_v11 = vrot.slane %v6971_v34, %v6198_v49 }
 0x521   : > { %v4265_v32 = vadd.f32 %v4059_v26, %v6225_v62  ;;  %v4061_v48 = vpop.f32.mrb[229].mxu0  ;;  %v3122_v54 = vpop.f32.mrb[230].mxu1 }
 0x522   : > { %v3569_v15 = vmul.f32 %v3490_v51, %v3325_v31  ;;  %v3326_v40 = vadd.f32 %v3122_v54, %v6260_v29  ;;  %v4062_v12 = vpop.f32.mrb[230].mxu0  ;;  %v3124_v47 = vpop.f32.mrb[231].mxu1 }
 0x523   : > { %v4509_v9 = vmul.f32 %v4430_v3, %v4265_v32  ;;  %v4266_v7 = vadd.f32 %v4062_v12, %v6260_v29  ;;  %v4064_v35 = vpop.f32.mrb[231].mxu0  ;;  %v4359_v12 = vcombine.high %v6945_v63, %v6945_v63 }
 0x524   : > { %v6977_v41 = vmax.f32 %v3647_v10, %v3569_v15  ;;  %v3570_v52 = vmul.f32 %v3490_v51, %v3326_v40 }
 0x525   : > { %v6979_v27 = vmax.f32 %v4587_v55, %v4509_v9  ;;  %v4510_v0 = vmul.f32 %v4430_v3, %v4266_v7 }
 0x526   : > { %v6981_v25 = vmax.f32 %v3662_v36, %v3570_v52 }
 0x527   : > { %v6985_v16 = vmax.f32 %v4602_v5, %v4510_v0  ;;  %v3127_v19 = vpop.f32.mrb[232].mxu1 }
 0x528   : > { %v3327_v53 = vadd.f32 %v3127_v19, %v6193_v39  ;;  %v4067_v20 = vpop.f32.mrb[232].mxu0  ;;  %v3129_v10 = vpop.f32.mrb[233].mxu1 }
 0x529   : > { %v4267_v51 = vadd.f32 %v4067_v20, %v6193_v39  ;;  %v4069_v55 = vpop.f32.mrb[233].mxu0  ;;  %v3130_v60 = vpop.f32.mrb[234].mxu1 }
 0x52a   : > { %v3571_v3 = vmul.f32 %v3494_v11, %v3327_v53  ;;  %v3328_v36 = vadd.f32 %v3130_v60, %v6209_v56  ;;  %v4070_v13 = vpop.f32.mrb[234].mxu0  ;;  %v3132_v43 = vpop.f32.mrb[235].mxu1  ;;  %v4438_v53 = vrot.slane %v4359_v12, %v6198_v49 }
 0x52b   : > { %v4511_v33 = vmul.f32 %v4434_v58, %v4267_v51  ;;  %v4268_v5 = vadd.f32 %v4070_v13, %v6209_v56  ;;  %v4072_v23 = vpop.f32.mrb[235].mxu0 }
 0x52c   : > { %v3619_v46 = vmax.f32 %v6959_v18, %v3571_v3  ;;  %v3572_v2 = vmul.f32 %v3494_v11, %v3328_v36 }
 0x52d   : > { %v4559_v17 = vmax.f32 %v6961_v50, %v4511_v33  ;;  %v4512_v59 = vmul.f32 %v4434_v58, %v4268_v5  ;;  %v3419_v50 = vcombine.high %v6941_v4, %v6941_v4 }
 0x52e   : > { %v3634_v37 = vmax.f32 %v6963_v14, %v3572_v2 }
 0x52f   : > { %v4574_v30 = vmax.f32 %v6965_v45, %v4512_v59  ;;  %v3135_v28 = vpop.f32.mrb[236].mxu1  ;;  %v3498_v0 = vrot.slane %v3419_v50, %v6198_v49 }
 0x530   : > { %v3329_v22 = vadd.f32 %v3135_v28, %v6225_v62  ;;  %v4075_v61 = vpop.f32.mrb[236].mxu0  ;;  %v3137_v31 = vpop.f32.mrb[237].mxu1 }
 0x531   : > { %v4269_v26 = vadd.f32 %v4075_v61, %v6225_v62  ;;  %v4077_v38 = vpop.f32.mrb[237].mxu0  ;;  %v3138_v32 = vpop.f32.mrb[238].mxu1 }
 0x532   : > { %v3573_v48 = vmul.f32 %v3494_v11, %v3329_v22  ;;  %v3330_v18 = vadd.f32 %v3138_v32, %v6260_v29  ;;  %v4078_v54 = vpop.f32.mrb[238].mxu0  ;;  %v3140_v15 = vpop.f32.mrb[239].mxu1 }
 0x533   : > { %v4513_v14 = vmul.f32 %v4434_v58, %v4269_v26  ;;  %v4270_v45 = vadd.f32 %v4078_v54, %v6260_v29  ;;  %v4080_v40 = vpop.f32.mrb[239].mxu0  ;;  %v4361_v54 = vcombine.high %v6975_v42, %v6975_v42 }
 0x534   : > { %v3649_v47 = vmax.f32 %v6977_v41, %v3573_v48  ;;  %v3574_v9 = vmul.f32 %v3494_v11, %v3330_v18 }
 0x535   : > { %v4589_v7 = vmax.f32 %v6979_v27, %v4513_v14  ;;  %v4514_v35 = vmul.f32 %v4434_v58, %v4270_v45 }
 0x536   : > { %v3664_v52 = vmax.f32 %v6981_v25, %v3574_v9 }
 0x537   : > { %v4604_v19 = vmax.f32 %v6985_v16, %v4514_v35  ;;  %v3143_v4 = vpop.f32.mrb[240].mxu1  ;;  %v4442_v35 = vrot.slane %v4361_v54, %v6198_v49 }
 0x538   : > { %v3331_v20 = vadd.f32 %v3143_v4, %v6193_v39  ;;  %v4083_v10 = vpop.f32.mrb[240].mxu0  ;;  %v3145_v51 = vpop.f32.mrb[241].mxu1 }
 0x539   : > { %v4271_v63 = vadd.f32 %v4083_v10, %v6193_v39  ;;  %v4085_v41 = vpop.f32.mrb[241].mxu0  ;;  %v3146_v11 = vpop.f32.mrb[242].mxu1 }
 0x53a   : > { %v3575_v55 = vmul.f32 %v3498_v0, %v3331_v20  ;;  %v3332_v27 = vadd.f32 %v3146_v11, %v6209_v56  ;;  %v4086_v58 = vpop.f32.mrb[242].mxu0  ;;  %v3148_v25 = vpop.f32.mrb[243].mxu1 }
 0x53b   : > { %v4515_v60 = vmul.f32 %v4438_v53, %v4271_v63  ;;  %v4272_v3 = vadd.f32 %v4086_v58, %v6209_v56  ;;  %v4088_v16 = vpop.f32.mrb[243].mxu0  ;;  %v7045_v63 = vunpack.c.h.bf16 %v6797_v6 }
 0x53c   : > { %v7015_v36 = vmax.f32 %v3619_v46, %v3575_v55  ;;  %v3576_v13 = vmul.f32 %v3498_v0, %v3332_v27  ;;  %v7049_v55 = vunpack.c.h.bf16 %v6800_v57 }
 0x53d   : > { %v7017_v43 = vmax.f32 %v4559_v17, %v4515_v60  ;;  %v4516_v33 = vmul.f32 %v4438_v53, %v4272_v3  ;;  %v3429_v16 = vrot.slane %v7045_v63, %v6184_v24 }
 0x53e   : > { %v7019_v5 = vmax.f32 %v3634_v37, %v3576_v13  ;;  %v3421_v37 = vcombine.high %v6971_v34, %v6971_v34 }
 0x53f   : > { %v7021_v23 = vmax.f32 %v4574_v30, %v4516_v33  ;;  %v3151_v2 = vpop.f32.mrb[244].mxu1  ;;  %v4369_v33 = vrot.slane %v7049_v55, %v6184_v24 }
 0x540   : > { %v3333_v59 = vadd.f32 %v3151_v2, %v6225_v62  ;;  %v4091_v28 = vpop.f32.mrb[244].mxu0  ;;  %v3153_v22 = vpop.f32.mrb[245].mxu1  ;;  %v3502_v12 = vrot.slane %v3421_v37, %v6198_v49 }
 0x541   : > { %v4273_v61 = vadd.f32 %v4091_v28, %v6225_v62  ;;  %v4093_v31 = vpop.f32.mrb[245].mxu0  ;;  %v3154_v26 = vpop.f32.mrb[246].mxu1 }
 0x542   : > { %v3577_v38 = vmul.f32 %v3498_v0, %v3333_v59  ;;  %v3334_v46 = vadd.f32 %v3154_v26, %v6260_v29  ;;  %v4094_v32 = vpop.f32.mrb[246].mxu0  ;;  %v3156_v17 = vpop.f32.mrb[247].mxu1  ;;  %v7063_v26 = vrot.slane %v3429_v16, %v6184_v24 }
 0x543   : > { %v4517_v48 = vmul.f32 %v4438_v53, %v4273_v61  ;;  %v4274_v30 = vadd.f32 %v4094_v32, %v6260_v29  ;;  %v4096_v18 = vpop.f32.mrb[247].mxu0  ;;  %v7067_v32 = vrot.slane %v4369_v33, %v6184_v24 }
 0x544   : > { %v7031_v15 = vmax.f32 %v3649_v47, %v3577_v38  ;;  %v3578_v50 = vmul.f32 %v3498_v0, %v3334_v46  ;;  %v3506_v54 = vrot.slane %v7063_v26, %v6198_v49 }
 0x545   : > { %v7033_v14 = vmax.f32 %v4589_v7, %v4517_v48  ;;  %v4518_v45 = vmul.f32 %v4438_v53, %v4274_v30 }
 0x546   : > { %v7035_v40 = vmax.f32 %v3664_v52, %v3578_v50 }
 0x547   : > { %v7038_v9 = vmax.f32 %v4604_v19, %v4518_v45  ;;  %v3159_v34 = vpop.f32.mrb[248].mxu1 }
 0x548   : > { %v3335_v4 = vadd.f32 %v3159_v34, %v6193_v39  ;;  %v4099_v20 = vpop.f32.mrb[248].mxu0  ;;  %v3161_v10 = vpop.f32.mrb[249].mxu1  ;;  %v4446_v34 = vrot.slane %v7067_v32, %v6198_v49 }
 0x549   : > { %v4275_v42 = vadd.f32 %v4099_v20, %v6193_v39  ;;  %v4101_v47 = vpop.f32.mrb[249].mxu0  ;;  %v3162_v0 = vpop.f32.mrb[250].mxu1 }
 0x54a   : > { %v3579_v7 = vmul.f32 %v3502_v12, %v3335_v4  ;;  %v3336_v53 = vadd.f32 %v3162_v0, %v6209_v56  ;;  %v4102_v52 = vpop.f32.mrb[250].mxu0  ;;  %v3164_v51 = vpop.f32.mrb[251].mxu1 }
 0x54b   : > { %v4519_v19 = vmul.f32 %v4442_v35, %v4275_v42  ;;  %v4276_v41 = vadd.f32 %v4102_v52, %v6209_v56  ;;  %v4104_v11 = vpop.f32.mrb[251].mxu0 }
 0x54c   : > { %v3621_v27 = vmax.f32 %v7015_v36, %v3579_v7  ;;  %v3580_v58 = vmul.f32 %v3502_v12, %v3336_v53  ;;  %v3437_v11 = vcombine.high %v3429_v16, %v3429_v16 }
 0x54d   : > { %v4561_v25 = vmax.f32 %v7017_v43, %v4519_v19  ;;  %v4520_v60 = vmul.f32 %v4442_v35, %v4276_v41 }
 0x54e   : > { %v3636_v3 = vmax.f32 %v7019_v5, %v3580_v58 }
 0x54f   : > { %v4576_v6 = vmax.f32 %v7021_v23, %v4520_v60  ;;  %v3167_v13 = vpop.f32.mrb[252].mxu1 }
 0x550   : > { %v3337_v57 = vadd.f32 %v3167_v13, %v6225_v62  ;;  %v4107_v2 = vpop.f32.mrb[252].mxu0  ;;  %v3169_v59 = vpop.f32.mrb[253].mxu1  ;;  %v4377_v13 = vcombine.high %v4369_v33, %v4369_v33 }
 0x551   : > { %v4277_v36 = vadd.f32 %v4107_v2, %v6225_v62  ;;  %v4109_v28 = vpop.f32.mrb[253].mxu0  ;;  %v3170_v43 = vpop.f32.mrb[254].mxu1 }
 0x552   : > { %v3581_v22 = vmul.f32 %v3502_v12, %v3337_v57  ;;  %v3338_v5 = vadd.f32 %v3170_v43, %v6260_v29  ;;  %v4110_v61 = vpop.f32.mrb[254].mxu0  ;;  %v3172_v31 = vpop.f32.mrb[255].mxu1 }
 0x553   : > { %v4521_v23 = vmul.f32 %v4442_v35, %v4277_v36  ;;  %v4278_v38 = vadd.f32 %v4110_v61, %v6260_v29  ;;  %v4112_v46 = vpop.f32.mrb[255].mxu0  ;;  %v7097_v61 = vrot.slane %v4377_v13, %v6184_v24 }
 0x554   : > { %v3651_v17 = vmax.f32 %v7031_v15, %v3581_v22  ;;  %v3582_v37 = vmul.f32 %v3502_v12, %v3338_v5 }
 0x555   : > { %v4591_v48 = vmax.f32 %v7033_v14, %v4521_v23  ;;  %v4522_v30 = vmul.f32 %v4442_v35, %v4278_v38 }
 0x556   : > { %v3666_v18 = vmax.f32 %v7035_v40, %v3582_v37 }
 0x557   : > { %v4606_v50 = vmax.f32 %v7038_v9, %v4522_v30  ;;  %v3175_v45 = vpop.f32.mrb[0].mxu1 }
 0x558   : > { %v3339_v4 = vadd.f32 %v3175_v45, %v6193_v39  ;;  %v4115_v20 = vpop.f32.mrb[0].mxu0  ;;  %v3177_v10 = vpop.f32.mrb[1].mxu1 }
 0x559   : > { %v4279_v15 = vadd.f32 %v4115_v20, %v6193_v39  ;;  %v4117_v12 = vpop.f32.mrb[1].mxu0  ;;  %v3178_v14 = vpop.f32.mrb[2].mxu1  ;;  %v4450_v20 = vrot.slane %v7097_v61, %v6198_v49 }
 0x55a   : > { %v3583_v35 = vmul.f32 %v3506_v54, %v3339_v4  ;;  %v3340_v40 = vadd.f32 %v3178_v14, %v6209_v56  ;;  %v4118_v42 = vpop.f32.mrb[2].mxu0  ;;  %v3180_v47 = vpop.f32.mrb[3].mxu1 }
 0x55b   : > { %v4523_v0 = vmul.f32 %v4446_v34, %v4279_v15  ;;  %v4280_v9 = vadd.f32 %v4118_v42, %v6209_v56  ;;  %v4120_v7 = vpop.f32.mrb[3].mxu0 }
 0x55c   : > { %v7081_v53 = vmax.f32 %v3621_v27, %v3583_v35  ;;  %v3584_v52 = vmul.f32 %v3506_v54, %v3340_v40 }
 0x55d   : > { %v7083_v51 = vmax.f32 %v4561_v25, %v4523_v0  ;;  %v4524_v19 = vmul.f32 %v4446_v34, %v4280_v9 }
 0x55e   : > { %v7085_v41 = vmax.f32 %v3636_v3, %v3584_v52  ;;  %v7093_v3 = vrot.slane %v3437_v11, %v6184_v24 }
 0x55f   : > { %v7087_v58 = vmax.f32 %v4576_v6, %v4524_v19  ;;  %v3183_v60 = vpop.f32.mrb[4].mxu1 }
 0x560   : > { %v3341_v57 = vadd.f32 %v3183_v60, %v6225_v62  ;;  %v4123_v2 = vpop.f32.mrb[4].mxu0  ;;  %v3185_v59 = vpop.f32.mrb[5].mxu1  ;;  %v3510_v30 = vrot.slane %v7093_v3, %v6198_v49 }
 0x561   : > { %v4281_v36 = vadd.f32 %v4123_v2, %v6225_v62  ;;  %v4125_v28 = vpop.f32.mrb[5].mxu0  ;;  %v3186_v27 = vpop.f32.mrb[6].mxu1 }
 0x562   : > { %v3585_v43 = vmul.f32 %v3506_v54, %v3341_v57  ;;  %v3342_v25 = vadd.f32 %v3186_v27, %v6260_v29  ;;  %v4126_v22 = vpop.f32.mrb[6].mxu0  ;;  %v3188_v5 = vpop.f32.mrb[7].mxu1 }
 0x563   : > { %v4525_v16 = vmul.f32 %v4446_v34, %v4281_v36  ;;  %v4282_v6 = vadd.f32 %v4126_v22, %v6260_v29  ;;  %v4128_v33 = vpop.f32.mrb[7].mxu0  ;;  %v4407_v22 = vcombine.high %v7067_v32, %v7067_v32 }
 0x564   : > { %v7099_v31 = vmax.f32 %v3651_v17, %v3585_v43  ;;  %v3586_v23 = vmul.f32 %v3506_v54, %v3342_v25 }
 0x565   : > { %v7101_v38 = vmax.f32 %v4591_v48, %v4525_v16  ;;  %v4526_v46 = vmul.f32 %v4446_v34, %v4282_v6 }
 0x566   : > { %v7103_v37 = vmax.f32 %v3666_v18, %v3586_v23 }
 0x567   : > { %v7107_v45 = vmax.f32 %v4606_v50, %v4526_v46  ;;  %v3191_v4 = vpop.f32.mrb[8].mxu1 }
 0x568   : > { %v3343_v10 = vadd.f32 %v3191_v4, %v6193_v39  ;;  %v4131_v15 = vpop.f32.mrb[8].mxu0  ;;  %v3193_v17 = vpop.f32.mrb[9].mxu1 }
 0x569   : > { %v4283_v54 = vadd.f32 %v4131_v15, %v6193_v39  ;;  %v4133_v48 = vpop.f32.mrb[9].mxu0  ;;  %v3194_v12 = vpop.f32.mrb[10].mxu1 }
 0x56a   : > { %v3587_v34 = vmul.f32 %v3510_v30, %v3343_v10  ;;  %v3344_v18 = vadd.f32 %v3194_v12, %v6209_v56  ;;  %v4134_v14 = vpop.f32.mrb[10].mxu0  ;;  %v3196_v35 = vpop.f32.mrb[11].mxu1  ;;  %v4454_v10 = vrot.slane %v4407_v22, %v6198_v49 }
 0x56b   : > { %v4527_v40 = vmul.f32 %v4450_v20, %v4283_v54  ;;  %v4284_v50 = vadd.f32 %v4134_v14, %v6209_v56  ;;  %v4136_v42 = vpop.f32.mrb[11].mxu0 }
 0x56c   : > { %v3623_v47 = vmax.f32 %v7081_v53, %v3587_v34  ;;  %v3588_v0 = vmul.f32 %v3510_v30, %v3344_v18 }
 0x56d   : > { %v4563_v9 = vmax.f32 %v7083_v51, %v4527_v40  ;;  %v4528_v7 = vmul.f32 %v4450_v20, %v4284_v50  ;;  %v3467_v51 = vcombine.high %v7063_v26, %v7063_v26 }
 0x56e   : > { %v3638_v52 = vmax.f32 %v7085_v41, %v3588_v0 }
 0x56f   : > { %v4578_v19 = vmax.f32 %v7087_v58, %v4528_v7  ;;  %v3199_v11 = vpop.f32.mrb[12].mxu1  ;;  %v3514_v46 = vrot.slane %v3467_v51, %v6198_v49 }
 0x570   : > { %v3345_v60 = vadd.f32 %v3199_v11, %v6225_v62  ;;  %v4139_v13 = vpop.f32.mrb[12].mxu0  ;;  %v3201_v57 = vpop.f32.mrb[13].mxu1 }
 0x571   : > { %v4285_v2 = vadd.f32 %v4139_v13, %v6225_v62  ;;  %v4141_v59 = vpop.f32.mrb[13].mxu0  ;;  %v3202_v36 = vpop.f32.mrb[14].mxu1 }
 0x572   : > { %v3589_v28 = vmul.f32 %v3510_v30, %v3345_v60  ;;  %v3346_v53 = vadd.f32 %v3202_v36, %v6260_v29  ;;  %v4142_v27 = vpop.f32.mrb[14].mxu0  ;;  %v3204_v43 = vpop.f32.mrb[15].mxu1 }
 0x573   : > { %v4529_v41 = vmul.f32 %v4450_v20, %v4285_v2  ;;  %v4286_v58 = vadd.f32 %v4142_v27, %v6260_v29  ;;  %v4144_v25 = vpop.f32.mrb[15].mxu0  ;;  %v4409_v27 = vcombine.high %v7097_v61, %v7097_v61 }
 0x574   : > { %v3653_v5 = vmax.f32 %v7099_v31, %v3589_v28  ;;  %v3590_v16 = vmul.f32 %v3510_v30, %v3346_v53 }
 0x575   : > { %v4593_v6 = vmax.f32 %v7101_v38, %v4529_v41  ;;  %v4530_v33 = vmul.f32 %v4450_v20, %v4286_v58 }
 0x576   : > { %v3668_v23 = vmax.f32 %v7103_v37, %v3590_v16 }
 0x577   : > { %v4608_v4 = vmax.f32 %v7107_v45, %v4530_v33  ;;  %v3207_v26 = vpop.f32.mrb[16].mxu1  ;;  %v4458_v33 = vrot.slane %v4409_v27, %v6198_v49 }
 0x578   : > { %v3347_v15 = vadd.f32 %v3207_v26, %v6193_v39  ;;  %v4147_v17 = vpop.f32.mrb[16].mxu0  ;;  %v3209_v54 = vpop.f32.mrb[17].mxu1 }
 0x579   : > { %v4287_v32 = vadd.f32 %v4147_v17, %v6193_v39  ;;  %v4149_v31 = vpop.f32.mrb[17].mxu0  ;;  %v3210_v30 = vpop.f32.mrb[18].mxu1 }
 0x57a   : > { %v3591_v48 = vmul.f32 %v3514_v46, %v3347_v15  ;;  %v3348_v38 = vadd.f32 %v3210_v30, %v6209_v56  ;;  %v4150_v20 = vpop.f32.mrb[18].mxu0  ;;  %v3212_v37 = vpop.f32.mrb[19].mxu1 }
 0x57b   : > { %v4531_v12 = vmul.f32 %v4454_v10, %v4287_v32  ;;  %v4288_v34 = vadd.f32 %v4150_v20, %v6209_v56  ;;  %v4152_v45 = vpop.f32.mrb[19].mxu0 }
 0x57c   : > { %v7137_v18 = vmax.f32 %v3623_v47, %v3591_v48  ;;  %v3592_v14 = vmul.f32 %v3514_v46, %v3348_v38  ;;  %v4362_v48 = vcombine.high %v7049_v55, %v7049_v55 }
 0x57d   : > { %v7139_v35 = vmax.f32 %v4563_v9, %v4531_v12  ;;  %v4532_v40 = vmul.f32 %v4454_v10, %v4288_v34 }
 0x57e   : > { %v7141_v50 = vmax.f32 %v3638_v52, %v3592_v14  ;;  %v3469_v52 = vcombine.high %v7093_v3, %v7093_v3 }
 0x57f   : > { %v7143_v42 = vmax.f32 %v4578_v19, %v4532_v40  ;;  %v3215_v0 = vpop.f32.mrb[20].mxu1  ;;  %v4376_v40 = vrot.slane %v4362_v48, %v6184_v24 }
 0x580   : > { %v3349_v7 = vadd.f32 %v3215_v0, %v6225_v62  ;;  %v4155_v11 = vpop.f32.mrb[20].mxu0  ;;  %v3217_v60 = vpop.f32.mrb[21].mxu1  ;;  %v3518_v22 = vrot.slane %v3469_v52, %v6198_v49 }
 0x581   : > { %v4289_v13 = vadd.f32 %v4155_v11, %v6225_v62  ;;  %v4157_v57 = vpop.f32.mrb[21].mxu0  ;;  %v3218_v2 = vpop.f32.mrb[22].mxu1 }
 0x582   : > { %v3593_v59 = vmul.f32 %v3514_v46, %v3349_v7  ;;  %v3350_v47 = vadd.f32 %v3218_v2, %v6260_v29  ;;  %v4158_v36 = vpop.f32.mrb[22].mxu0  ;;  %v3220_v9 = vpop.f32.mrb[23].mxu1 }
 0x583   : > { %v4533_v28 = vmul.f32 %v4454_v10, %v4289_v13  ;;  %v4290_v19 = vadd.f32 %v4158_v36, %v6260_v29  ;;  %v4160_v53 = vpop.f32.mrb[23].mxu0  ;;  %v7185_v36 = vrot.slane %v4376_v40, %v6184_v24 }
 0x584   : > { %v7153_v43 = vmax.f32 %v3653_v5, %v3593_v59  ;;  %v3594_v51 = vmul.f32 %v3514_v46, %v3350_v47 }
 0x585   : > { %v7155_v41 = vmax.f32 %v4593_v6, %v4533_v28  ;;  %v4534_v58 = vmul.f32 %v4454_v10, %v4290_v19 }
 0x586   : > { %v7157_v25 = vmax.f32 %v3668_v23, %v3594_v51 }
 0x587   : > { %v7160_v16 = vmax.f32 %v4608_v4, %v4534_v58  ;;  %v3223_v3 = vpop.f32.mrb[24].mxu1  ;;  %v3422_v4 = vcombine.high %v7045_v63, %v7045_v63 }
 0x588   : > { %v3351_v26 = vadd.f32 %v3223_v3, %v6193_v39  ;;  %v4163_v15 = vpop.f32.mrb[24].mxu0  ;;  %v3225_v17 = vpop.f32.mrb[25].mxu1  ;;  %v4462_v3 = vrot.slane %v7185_v36, %v6198_v49 }
 0x589   : > { %v4291_v61 = vadd.f32 %v4163_v15, %v6193_v39  ;;  %v4165_v5 = vpop.f32.mrb[25].mxu0  ;;  %v3226_v46 = vpop.f32.mrb[26].mxu1  ;;  %v3436_v45 = vrot.slane %v3422_v4, %v6184_v24 }
 0x58a   : > { %v3595_v6 = vmul.f32 %v3518_v22, %v3351_v26  ;;  %v3352_v10 = vadd.f32 %v3226_v46, %v6209_v56  ;;  %v4166_v23 = vpop.f32.mrb[26].mxu0  ;;  %v3228_v54 = vpop.f32.mrb[27].mxu1 }
 0x58b   : > { %v4535_v32 = vmul.f32 %v4458_v33, %v4291_v61  ;;  %v4292_v31 = vadd.f32 %v4166_v23, %v6209_v56  ;;  %v4168_v30 = vpop.f32.mrb[27].mxu0  ;;  %v7181_v2 = vrot.slane %v3436_v45, %v6184_v24 }
 0x58c   : > { %v3625_v38 = vmax.f32 %v7137_v18, %v3595_v6  ;;  %v3596_v20 = vmul.f32 %v3518_v22, %v3352_v10 }
 0x58d   : > { %v4565_v37 = vmax.f32 %v7139_v35, %v4535_v32  ;;  %v4536_v12 = vmul.f32 %v4458_v33, %v4292_v31  ;;  %v3522_v27 = vrot.slane %v7181_v2, %v6198_v49  ;;  %v3438_v31 = vcombine.high %v3436_v45, %v3436_v45 }
 0x58e   : > { %v3640_v34 = vmax.f32 %v7141_v50, %v3596_v20  ;;  %v4378_v20 = vcombine.high %v4376_v40, %v4376_v40 }
 0x58f   : > { %v4580_v14 = vmax.f32 %v7143_v42, %v4536_v12  ;;  %v3231_v63 = vpop.f32.mrb[28].mxu1 }
 0x590   : > { %v3353_v0 = vadd.f32 %v3231_v63, %v6225_v62  ;;  %v4171_v7 = vpop.f32.mrb[28].mxu0  ;;  %v3233_v11 = vpop.f32.mrb[29].mxu1 }
 0x591   : > { %v4293_v55 = vadd.f32 %v4171_v7, %v6225_v62  ;;  %v4173_v18 = vpop.f32.mrb[29].mxu0  ;;  %v3234_v60 = vpop.f32.mrb[30].mxu1 }
 0x592   : > { %v3597_v13 = vmul.f32 %v3518_v22, %v3353_v0  ;;  %v3354_v35 = vadd.f32 %v3234_v60, %v6260_v29  ;;  %v4174_v57 = vpop.f32.mrb[30].mxu0  ;;  %v3236_v50 = vpop.f32.mrb[31].mxu1 }
 0x593   : > { %v4537_v42 = vmul.f32 %v4458_v33, %v4293_v55  ;;  %v4294_v59 = vadd.f32 %v4174_v57, %v6260_v29  ;;  %v4176_v47 = vpop.f32.mrb[31].mxu0 }
 0x594   : > { %v3655_v9 = vmax.f32 %v7153_v43, %v3597_v13  ;;  %v3598_v52 = vmul.f32 %v3518_v22, %v3354_v35  ;;  %v7215_v13 = vrot.slane %v4378_v20, %v6184_v24 }
 0x595   : > { %v4595_v28 = vmax.f32 %v7155_v41, %v4537_v42  ;;  %v4538_v19 = vmul.f32 %v4458_v33, %v4294_v59 }
 0x596   : > { %v3670_v53 = vmax.f32 %v7157_v25, %v3598_v52 }
 0x597   : > { %v4610_v51 = vmax.f32 %v7160_v16, %v4538_v19  ;;  %v3239_v58 = vpop.f32.mrb[32].mxu1 }
 0x598   : > { %v3355_v26 = vadd.f32 %v3239_v58, %v6193_v39  ;;  %v4179_v15 = vpop.f32.mrb[32].mxu0  ;;  %v3241_v17 = vpop.f32.mrb[33].mxu1  ;;  %v4466_v58 = vrot.slane %v7215_v13, %v6198_v49 }
 0x599   : > { %v4295_v43 = vadd.f32 %v4179_v15, %v6193_v39  ;;  %v4181_v22 = vpop.f32.mrb[33].mxu0  ;;  %v3242_v41 = vpop.f32.mrb[34].mxu1 }
 0x59a   : > { %v3599_v33 = vmul.f32 %v3522_v27, %v3355_v26  ;;  %v3356_v25 = vadd.f32 %v3242_v41, %v6209_v56  ;;  %v4182_v61 = vpop.f32.mrb[34].mxu0  ;;  %v3244_v5 = vpop.f32.mrb[35].mxu1 }
 0x59b   : > { %v4539_v46 = vmul.f32 %v4462_v3, %v4295_v43  ;;  %v4296_v16 = vadd.f32 %v4182_v61, %v6209_v56  ;;  %v4184_v6 = vpop.f32.mrb[35].mxu0 }
 0x59c   : > { %v7199_v10 = vmax.f32 %v3625_v38, %v3599_v33  ;;  %v3600_v23 = vmul.f32 %v3522_v27, %v3356_v25 }
 0x59d   : > { %v7201_v54 = vmax.f32 %v4565_v37, %v4539_v46  ;;  %v4540_v4 = vmul.f32 %v4462_v3, %v4296_v16 }
 0x59e   : > { %v7203_v32 = vmax.f32 %v3640_v34, %v3600_v23  ;;  %v7211_v34 = vrot.slane %v3438_v31, %v6184_v24 }
 0x59f   : > { %v7205_v30 = vmax.f32 %v4580_v14, %v4540_v4  ;;  %v3247_v48 = vpop.f32.mrb[36].mxu1 }
 0x5a0   : > { %v3357_v12 = vadd.f32 %v3247_v48, %v6225_v62  ;;  %v4187_v63 = vpop.f32.mrb[36].mxu0  ;;  %v3249_v0 = vpop.f32.mrb[37].mxu1  ;;  %v3526_v47 = vrot.slane %v7211_v34, %v6198_v49 }
 0x5a1   : > { %v4297_v7 = vadd.f32 %v4187_v63, %v6225_v62  ;;  %v4189_v11 = vpop.f32.mrb[37].mxu0  ;;  %v3250_v38 = vpop.f32.mrb[38].mxu1 }
 0x5a2   : > { %v3601_v55 = vmul.f32 %v3522_v27, %v3357_v12  ;;  %v3358_v37 = vadd.f32 %v3250_v38, %v6260_v29  ;;  %v4190_v18 = vpop.f32.mrb[38].mxu0  ;;  %v3252_v60 = vpop.f32.mrb[39].mxu1  ;;  %v4408_v38 = vcombine.high %v7185_v36, %v7185_v36 }
 0x5a3   : > { %v4541_v45 = vmul.f32 %v4462_v3, %v4297_v7  ;;  %v4298_v14 = vadd.f32 %v4190_v18, %v6260_v29  ;;  %v4192_v40 = vpop.f32.mrb[39].mxu0 }
 0x5a4   : > { %v7217_v35 = vmax.f32 %v3655_v9, %v3601_v55  ;;  %v3602_v57 = vmul.f32 %v3522_v27, %v3358_v37 }
 0x5a5   : > { %v7219_v50 = vmax.f32 %v4595_v28, %v4541_v45  ;;  %v4542_v42 = vmul.f32 %v4462_v3, %v4298_v14 }
 0x5a6   : > { %v7221_v59 = vmax.f32 %v3670_v53, %v3602_v57  ;;  %v4470_v57 = vrot.slane %v4408_v38, %v6198_v49 }
 0x5a7   : > { %v7225_v52 = vmax.f32 %v4610_v51, %v4542_v42  ;;  %v3255_v19 = vpop.f32.mrb[40].mxu1 }
 0x5a8   : > { %v3359_v24 = vadd.f32 %v3255_v19, %v6193_v39  ;;  %v4195_v26 = vpop.f32.mrb[40].mxu0  ;;  %v3257_v9 = vpop.f32.mrb[41].mxu1 }
 0x5a9   : > { %v4299_v27 = vadd.f32 %v4195_v26, %v6193_v39  ;;  %v4197_v28 = vpop.f32.mrb[41].mxu0  ;;  %v3258_v15 = vpop.f32.mrb[42].mxu1 }
 0x5aa   : > { %v3603_v3 = vmul.f32 %v3526_v47, %v3359_v24  ;;  %v3360_v53 = vadd.f32 %v3258_v15, %v6209_v56  ;;  %v4198_v17 = vpop.f32.mrb[42].mxu0  ;;  %v3260_v43 = vpop.f32.mrb[43].mxu1 }
 0x5ab   : > { %v4543_v22 = vmul.f32 %v4466_v58, %v4299_v27  ;;  %v4300_v51 = vadd.f32 %v4198_v17, %v6209_v56  ;;  %v4200_v41 = vpop.f32.mrb[43].mxu0 }
 0x5ac   : > { %v3627_v33 = vmax.f32 %v7199_v10, %v3603_v3  ;;  %v3604_v25 = vmul.f32 %v3526_v47, %v3360_v53 }
 0x5ad   : > { %v4567_v61 = vmax.f32 %v7201_v54, %v4543_v22  ;;  %v4544_v5 = vmul.f32 %v4466_v58, %v4300_v51  ;;  %v3468_v54 = vcombine.high %v7181_v2, %v7181_v2 }
 0x5ae   : > { %v3642_v46 = vmax.f32 %v7203_v32, %v3604_v25 }
 0x5af   : > { %v4582_v16 = vmax.f32 %v7205_v30, %v4544_v5  ;;  %v3263_v6 = vpop.f32.mrb[44].mxu1  ;;  %v3530_v14 = vrot.slane %v3468_v54, %v6198_v49 }
 0x5b0   : > { %v3361_v23 = vadd.f32 %v3263_v6, %v6225_v62  ;;  %v4203_v4 = vpop.f32.mrb[44].mxu0  ;;  %v3265_v31 = vpop.f32.mrb[45].mxu1 }
 0x5b1   : > { %v4301_v48 = vadd.f32 %v4203_v4, %v6225_v62  ;;  %v4205_v20 = vpop.f32.mrb[45].mxu0  ;;  %v3266_v12 = vpop.f32.mrb[46].mxu1 }
 0x5b2   : > { %v3605_v63 = vmul.f32 %v3526_v47, %v3361_v23  ;;  %v3362_v10 = vadd.f32 %v3266_v12, %v6260_v29  ;;  %v4206_v0 = vpop.f32.mrb[46].mxu0  ;;  %v3268_v7 = vpop.f32.mrb[47].mxu1  ;;  %v4410_v12 = vcombine.high %v7215_v13, %v7215_v13 }
 0x5b3   : > { %v4545_v32 = vmul.f32 %v4466_v58, %v4301_v48  ;;  %v4302_v30 = vadd.f32 %v4206_v0, %v6260_v29  ;;  %v4208_v11 = vpop.f32.mrb[47].mxu0 }
 0x5b4   : > { %v3657_v55 = vmax.f32 %v7217_v35, %v3605_v63  ;;  %v3606_v37 = vmul.f32 %v3526_v47, %v3362_v10  ;;  %v4474_v38 = vrot.slane %v4410_v12, %v6198_v49 }
 0x5b5   : > { %v4597_v18 = vmax.f32 %v7219_v50, %v4545_v32  ;;  %v4546_v60 = vmul.f32 %v4466_v58, %v4302_v30 }
 0x5b6   : > { %v3672_v45 = vmax.f32 %v7221_v59, %v3606_v37 }
 0x5b7   : > { %v4612_v40 = vmax.f32 %v7225_v52, %v4546_v60  ;;  %v3271_v2 = vpop.f32.mrb[48].mxu1 }
 0x5b8   : > { %v3363_v42 = vadd.f32 %v3271_v2, %v6193_v39  ;;  %v4211_v19 = vpop.f32.mrb[48].mxu0  ;;  %v3273_v24 = vpop.f32.mrb[49].mxu1 }
 0x5b9   : > { %v4303_v36 = vadd.f32 %v4211_v19, %v6193_v39  ;;  %v4213_v35 = vpop.f32.mrb[49].mxu0  ;;  %v3274_v47 = vpop.f32.mrb[50].mxu1 }
 0x5ba   : > { %v3607_v26 = vmul.f32 %v3530_v14, %v3363_v42  ;;  %v3364_v50 = vadd.f32 %v3274_v47, %v6209_v56  ;;  %v4214_v58 = vpop.f32.mrb[50].mxu0  ;;  %v3276_v59 = vpop.f32.mrb[51].mxu1 }
 0x5bb   : > { %v4547_v9 = vmul.f32 %v4470_v57, %v4303_v36  ;;  %v4304_v27 = vadd.f32 %v4214_v58, %v6209_v56  ;;  %v4216_v52 = vpop.f32.mrb[51].mxu0 }
 0x5bc   : > { %v3628_v28 = vmax.f32 %v3627_v33, %v3607_v26  ;;  %v3608_v15 = vmul.f32 %v3530_v14, %v3364_v50  ;;  %v3470_v33 = vcombine.high %v7211_v34, %v7211_v34 }
 0x5bd   : > { %v4568_v3 = vmax.f32 %v4567_v61, %v4547_v9  ;;  %v4548_v53 = vmul.f32 %v4470_v57, %v4304_v27 }
 0x5be   : > { %v3643_v17 = vmax.f32 %v3642_v46, %v3608_v15  ;;  %v3534_v32 = vrot.slane %v3470_v33, %v6198_v49 }
 0x5bf   : > { %v4583_v43 = vmax.f32 %v4582_v16, %v4548_v53  ;;  %v3279_v22 = vpop.f32.mrb[52].mxu1 }
 0x5c0   : > { %v3365_v51 = vadd.f32 %v3279_v22, %v6225_v62  ;;  %v4219_v41 = vpop.f32.mrb[52].mxu0  ;;  %v3281_v25 = vpop.f32.mrb[53].mxu1 }
 0x5c1   : > { %v4305_v5 = vadd.f32 %v4219_v41, %v6225_v62  ;;  %v4221_v6 = vpop.f32.mrb[53].mxu0  ;;  %v3282_v23 = vpop.f32.mrb[54].mxu1 }
 0x5c2   : > { %v3609_v4 = vmul.f32 %v3530_v14, %v3365_v51  ;;  %v3366_v31 = vadd.f32 %v3282_v23, %v6260_v29  ;;  %v4222_v48 = vpop.f32.mrb[54].mxu0  ;;  %v3284_v20 = vpop.f32.mrb[55].mxu1 }
 0x5c3   : > { %v4549_v61 = vmul.f32 %v4470_v57, %v4305_v5  ;;  %v4306_v46 = vadd.f32 %v4222_v48, %v6260_v29  ;;  %v4224_v16 = vpop.f32.mrb[55].mxu0 }
 0x5c4   : > { %v3658_v63 = vmax.f32 %v3657_v55, %v3609_v4  ;;  %v3610_v10 = vmul.f32 %v3530_v14, %v3366_v31 }
 0x5c5   : > { %v4598_v0 = vmax.f32 %v4597_v18, %v4549_v61  ;;  %v4550_v7 = vmul.f32 %v4470_v57, %v4306_v46 }
 0x5c6   : > { %v3673_v54 = vmax.f32 %v3672_v45, %v3610_v10 }
 0x5c7   : > { %v4613_v30 = vmax.f32 %v4612_v40, %v4550_v7  ;;  %v3287_v11 = vpop.f32.mrb[56].mxu1 }
 0x5c8   : > { %v3367_v34 = vadd.f32 %v3287_v11, %v6193_v39  ;;  %v4227_v37 = vpop.f32.mrb[56].mxu0  ;;  %v3289_v60 = vpop.f32.mrb[57].mxu1 }
 0x5c9   : > { %v4307_v2 = vadd.f32 %v4227_v37, %v6193_v39  ;;  %v4229_v42 = vpop.f32.mrb[57].mxu0  ;;  %v3290_v19 = vpop.f32.mrb[58].mxu1 }
 0x5ca   : > { %v3611_v13 = vmul.f32 %v3534_v32, %v3367_v34  ;;  %v3368_v55 = vadd.f32 %v3290_v19, %v6209_v56  ;;  %v4230_v18 = vpop.f32.mrb[58].mxu0  ;;  %v3292_v14 = vpop.f32.mrb[59].mxu1 }
 0x5cb   : > { %v4551_v45 = vmul.f32 %v4474_v38, %v4307_v2  ;;  %v4308_v57 = vadd.f32 %v4230_v18, %v6209_v56  ;;  %v4232_v40 = vpop.f32.mrb[59].mxu0 }
 0x5cc   : > { %v3629_v24 = vmax.f32 %v3628_v28, %v3611_v13  ;;  %v3612_v49 = vmul.f32 %v3534_v32, %v3368_v55 }
 0x5cd   : > { %v4569_v36 = vmax.f32 %v4568_v3, %v4551_v45  ;;  %v4552_v35 = vmul.f32 %v4474_v38, %v4308_v57 }
 0x5ce   : > { %v3675_v47 = vmax.f32 %v6754_v1, %v3629_v24  ;;  %v3644_v26 = vmax.f32 %v3643_v17, %v3612_v49 }
 0x5cf   : > { %v4584_v39 = vmax.f32 %v4583_v43, %v4552_v35  ;;  %v3295_v50 = vpop.f32.mrb[60].mxu1 }
 0x5d0   : > { %v4615_v58 = vmax.f32 %v3675_v47, %v4569_v36  ;;  %v3676_v59 = vmax.f32 %v6758_v21, %v3644_v26  ;;  %v3369_v9 = vadd.f32 %v3295_v50, %v6225_v62  ;;  %v4235_v27 = vpop.f32.mrb[60].mxu0  ;;  %v3297_v52 = vpop.f32.mrb[61].mxu1 }
 0x5d1   : > { %v4309_v56 = vadd.f32 %v4235_v27, %v6225_v62  ;;  %v4237_v15 = vpop.f32.mrb[61].mxu0  ;;  %v3298_v28 = vpop.f32.mrb[62].mxu1 }
 0x5d2   : > { %4619 = vst [vmem:[%s323_s29] sm:$0xff] %v4615_v58  ;;  %v4616_v3 = vmax.f32 %v3676_v59, %v4584_v39  ;;  %v3613_v1 = vmul.f32 %v3534_v32, %v3369_v9  ;;  %v3370_v53 = vadd.f32 %v3298_v28, %v6260_v29  ;;  %v4238_v17 = vpop.f32.mrb[62].mxu0  ;;  %v3300_v43 = vpop.f32.mrb[63].mxu1 }
 0x5d3   : > { %v4553_v22 = vmul.f32 %v4474_v38, %v4309_v56  ;;  %v4310_v21 = vadd.f32 %v4238_v17, %v6260_v29  ;;  %v4240_v51 = vpop.f32.mrb[63].mxu0 }
 0x5d4   : > { %4620 = vst [vmem:[%s323_s29 + $0x8] sm:$0xff] %v4616_v3  ;;  %v3659_v41 = vmax.f32 %v3658_v63, %v3613_v1  ;;  %v3614_v62 = vmul.f32 %v3534_v32, %v3370_v53 }
 0x5d5   : > { %v4599_v25 = vmax.f32 %v4598_v0, %v4553_v22  ;;  %v4554_v5 = vmul.f32 %v4474_v38, %v4310_v21 }
 0x5d6   : > { %v3677_v6 = vmax.f32 %v6762_v8, %v3659_v41  ;;  %v3674_v23 = vmax.f32 %v3673_v54, %v3614_v62 }
 0x5d7   : > { %v4614_v4 = vmax.f32 %v4613_v30, %v4554_v5 }
 0x5d8   : > { %v4617_v29 = vmax.f32 %v3677_v6, %v4599_v25  ;;  %v3678_v31 = vmax.f32 %v6764_v44, %v3674_v23 }
 0x5da   : > { %4621 = vst [vmem:[%s323_s29 + $0x10] sm:$0xff] %v4617_v29  ;;  %v4618_v48 = vmax.f32 %v3678_v31, %v4614_v4 }
 0x5dc   : > { %4622 = vst [vmem:[%s323_s29 + $0x18] sm:$0xff] %v4618_v48 }
 0x5dd   : > { %5728 = shalt.err (!%p5725_p10)
}
 0x5de   : > { %s5729_s12 = scalar_lea.hbm %s7285_s25, 512  ;;  %s5733_s23 = scalar_lea.hbm %s7334_s5, 1024 }
 0x5df   : > { %p5730_p3 = scmp.ne.s32.totalorder %s7285_s25, %s5729_s12  ;;  %p5734_p1 = scmp.lt.u32.totalorder %s7285_s25, %s7334_s5 }
 0x5e0   : > { %p5735_p4 = scmp.lt.u32.totalorder %s5733_s23, %s5729_s12  ;;  %p5737_p2 = scmp.lt.u32.totalorder %s5729_s12, %s7285_s25 }
 0x5e1   : > { %p5731_p7 = pnand %p5730_p3, %p7371_p5 }
 0x5e2   : > { %p5736_p0 = por %p5735_p4, %p5734_p1 }
 0x5e3   : > { %p5732_p8 = pneg %p5731_p7 }
 0x5e4   : > { %p5738_p11 = por %p5737_p2, %p5736_p0 }
 0x5e6   : > { %p5739_p12 = pnand %p5738_p11, %p5732_p8 }
 0x5e8   : > { %5742 = shalt.err (!%p5739_p12)
}
 0x5e9   : > { %s5807_s16 = smov 128   ;;  %s5808_s27 = smov 256  }
 0x5ea   : > { %s5809_s28 = smov 8  }
 0x5eb   : > { %5270 = dma.vmem_to_hbm [thread:$0]  (%p7371_p5), %s7279_s15, 512, %s7285_s25, %s4624_s9, %s5807_s16, %s5808_s27, %s5809_s28  }
 0x5ec PF: > { %s7372_s29 = sld [smem:[#allocation19_spill]]  ;;  %s4651_s2 = sand.u32 1, %s5781_s18  }
 0x5ed   : > { %p7374_p13 = scmp.ge.s32.totalorder %s5793_s21, 2  ;;  %s4652_s11 = scalar_lea.sflag [#allocation4], %s4651_s2 }
 0x5f2   : > { %p7373_p6 = scmp.ne.s32.totalorder %s7372_s29, 0 }
 0x5f4   : > { %p5290_p9 = pnand %p7374_p13, %p7373_p6 }
 0x5f6   : > { %5776 = dma.done.wait (!%p5290_p9), %s4652_s11, 512  }
 0x5f7   : > { %5778 = vsyncadd (!%p5290_p9), %s4652_s11, 4294966784  ;;  %s7375_s21 = sld [smem:[#allocation17_spill]]  ;;  %s7376_s13 = sld [smem:[#allocation18_spill]] }
 0x5f8   : > { %s7377_s18 = smov %s5785_s19  ;;  %s7378_s19 = smov %s5789_s20 }
 0x5fd   : > { %p22_p10 = scmp.ge.s32.totalorder %s7375_s21, 4   ;;  %s7379_s20 = smov %s7376_s13 }
 0x5ff   :  { %24 = sbr.rel (!%p22_p10) target bundleno = 10 (0xa), region = 116 }
 0x606   :  { %4657 = vsyncpa [#allocation3], 1 }
 0x607   :  { %4659 = vsyncpa [#allocation3 + $0x1], 1 }
 0x608   :  { %4660 = vsyncpa [#allocation6], 1 }
 0x609   :  { %4662 = vsyncpa [#allocation6 + $0x1], 1 }
 0x60a   :  { %4663 = vsyncpa [#allocation9], 1 }
 0x60b   :  { %4664 = vsyncpa [#allocation4], 1 }
 0x60c   :  { %4666 = vsyncpa [#allocation4 + $0x1], 1 }

</bundles_post_ra>
